<compile_context>
chip_gen: v5e
topology: v5e:2x2
jax: 0.10.0
libtpu: 0.0.40
codegen_flags: <defaults>
</compile_context>

<pallas_src>
import math

import jax
import jax.numpy as jnp
from jax import lax
from jax.experimental import pallas as pl
from jax.experimental.pallas import tpu as pltpu

# ----------------------------- configuration --------------------------------
B = 2               # batch
C_IN = 32           # num_channels_in
C_OUT = 32          # num_channels_out (== C_IN so residual is active)
L = 128             # sequence length
K = 3               # kernel_size
DIL = 1             # dilation
HEADS = 4           # num_attention_heads
HEAD_DIM = C_OUT // HEADS
PAD = (K // 2) * DIL
C2 = 2 * C_OUT      # conv output channels for the 'QK' invention
KC = K * C_IN       # 96  (im2col rows)
BL = B * L          # 256 (lane-stacked batch)
HL = HEADS * L      # 512 (head-stacked keys)


# ------------------------------- kernel -------------------------------------
def conv_text_kernel(x_ref, wqk_ref, bqk_ref, wvo_ref, bout_ref, out_ref,
                     xcat_ref, kbd_ref):
    # x_ref   : (B, C_IN, L)          NCL input (C on sublanes, L on lanes)
    # wqk_ref : (C2, K*C_IN)          conv weights with [W_q | W_k] (+ scale) folded in
    # bqk_ref : (C2, 1)               fused conv / in-proj bias
    # wvo_ref : (HEADS*C_OUT, C_IN)   per-head fused (W_v W_o), stacked on sublanes
    # bout_ref: (C_OUT, 1)            fused b_v @ W_o^T + b_o
    # out_ref : (B, C_OUT, L)         NCL output (lane-dense stores)
    # xcat_ref: (K*C_IN, B*L)  VMEM   im2col conv input for both batch elements
    # kbd_ref : (C_OUT, HEADS*L) VMEM block-diagonal K (per-head key blocks)
    f32 = jnp.float32

    # Single surviving iota: a (32,128) lane index (4 int32 vregs), built once.
    lane = lax.broadcasted_iota(jnp.int32, (C_IN, L), 1)

    # Zero the block-diagonal K scratch once; only the diagonal blocks are
    # rewritten per batch element below.
    kbd_ref[...] = jnp.zeros_like(kbd_ref)

    # ---- im2col conv input: +/-1 taps as XLU lane rolls + boundary masks ----
    for b in range(B):
        xb = x_ref[b]                                                  # (C_IN, L)
        x_prev = jnp.where(lane == 0, 0.0,
                           pltpu.roll(xb, shift=1, axis=1))            # x[:, i-1], 0 at i=0
        x_next = jnp.where(lane == L - 1, 0.0,
                           pltpu.roll(xb, shift=L - 1, axis=1))        # x[:, i+1], 0 at i=L-1
        xcat_ref[pl.ds(0, C_IN), pl.ds(b * L, L)] = x_prev
        xcat_ref[pl.ds(C_IN, C_IN), pl.ds(b * L, L)] = xb
        xcat_ref[pl.ds(2 * C_IN, C_IN), pl.ds(b * L, L)] = x_next

    xcat = xcat_ref[...]                                               # (96, 256)
    x2 = xcat[C_IN:2 * C_IN, :]                                        # (32, 256) == x (both batches)

    # ---- conv + Q/K in-projection, both batch elements in one matmul --------
    y = jnp.dot(wqk_ref[...], xcat, preferred_element_type=f32) + bqk_ref[...]  # (64, 256)
    q_all = y[:C_OUT, :]                                               # scale folded in
    k_all = y[C_OUT:, :]

    # ---- value path: x through fused (W_v W_o), both batches at once --------
    v2 = jnp.dot(wvo_ref[...], x2, preferred_element_type=f32)         # (HEADS*C_OUT, 256)

    bout = bout_ref[...]                                               # (C_OUT, 1)

    # ---- per-batch attention (head-batched matmuls, softmax per head) -------
    for b in range(B):
        q_b = q_all[:, b * L:(b + 1) * L]                              # (32, 128)
        k_b = k_all[:, b * L:(b + 1) * L]                              # (32, 128)
        v2_b = v2[:, b * L:(b + 1) * L]                                # (128, 128)
        x_b = x2[:, b * L:(b + 1) * L]                                 # (32, 128)

        # block-diagonal K: kbd[h*HD:(h+1)*HD, h*L:(h+1)*L] = k_b head block
        for h in range(HEADS):
            kbd_ref[pl.ds(h * HEAD_DIM, HEAD_DIM), pl.ds(h * L, L)] = (
                k_b[h * HEAD_DIM:(h + 1) * HEAD_DIM, :])

        # scores for all heads in ONE matmul:
        #   st[h*L + j, i] = sum_d k_h[d, j] * q_h[d, i]
        st = lax.dot_general(kbd_ref[...], q_b, (((0,), (0,)), ((), ())),
                             preferred_element_type=f32)               # (512, 128)

        # per-head softmax over keys (sublane-block reductions, aligned slices)
        p_blocks = []
        for h in range(HEADS):
            s_h = st[h * L:(h + 1) * L, :]                             # (128, 128)
            m_h = jnp.max(s_h, axis=0, keepdims=True)                  # (1, 128)
            e_h = jnp.exp(s_h - m_h)
            r_h = pl.reciprocal(jnp.sum(e_h, axis=0, keepdims=True), approx=True)
            p_blocks.append(e_h * r_h)
        pt = jnp.concatenate(p_blocks, axis=0)                         # (512, 128)

        # values lane-concatenated per head -> single NN matmul, output lands
        # directly in (C_OUT, L) orientation (no transposes anywhere).
        vcat = jnp.concatenate(
            [v2_b[h * C_OUT:(h + 1) * C_OUT, :] for h in range(HEADS)], axis=1)  # (32, 512)
        att = jnp.dot(vcat, pt, preferred_element_type=f32)            # (32, 128)

        # ---- fused output bias, activation (ReLU), residual ----------------
        out = jnp.maximum(att + bout, 0.0) + x_b
        out_ref[b] = out.astype(out_ref.dtype)


# ------------------------------- wrapper -------------------------------------
def conv_text_layer(x_ncl, params):
    """x_ncl: (B, C_IN, L) float32 (PyTorch NCL layout). Returns (B, C_OUT, L)."""
    hp = lax.Precision.HIGHEST
    scale = 1.0 / math.sqrt(HEAD_DIM)

    wconv_t = jnp.transpose(params["w_conv"], (2, 1, 0))               # (K, C_IN, C2)
    wq_t, wk_t, wv_t, wo_t = (params[n].T for n in ("w_q", "w_k", "w_v", "w_o"))

    # -- fold W_q / W_k (and the softmax scale) into the conv weights ---------
    w_f_q = jnp.einsum("tco,od->tcd", wconv_t[:, :, :C_OUT], wq_t, precision=hp) * scale
    w_f_k = jnp.einsum("tco,od->tcd", wconv_t[:, :, C_OUT:], wk_t, precision=hp)
    w_qk = jnp.concatenate([w_f_q, w_f_k], axis=-1)                    # (K, C_IN, C2)
    w_qk_lhs = w_qk.reshape(KC, C2).T                                  # (C2, K*C_IN)
    b_f_q = (jnp.dot(params["b_conv"][:C_OUT], wq_t, precision=hp) + params["b_q"]) * scale
    b_f_k = jnp.dot(params["b_conv"][C_OUT:], wk_t, precision=hp) + params["b_k"]
    b_qk = jnp.concatenate([b_f_q, b_f_k])[:, None]                    # (C2, 1)

    # -- fold W_o into W_v per head; softmax rows sum to 1, so b_v collapses
    #    with b_o into a single constant output bias ---------------------------
    wvo_rows = []
    for h in range(HEADS):
        sl = slice(h * HEAD_DIM, (h + 1) * HEAD_DIM)
        wvo_rows.append(jnp.dot(wv_t[:, sl], wo_t[sl, :], precision=hp).T)   # (C_OUT, C_IN)
    wvo_lhs = jnp.concatenate(wvo_rows, axis=0)                        # (HEADS*C_OUT, C_IN)
    b_out = (jnp.dot(params["b_v"], wo_t, precision=hp) + params["b_o"])[:, None]  # (C_OUT, 1)

    rep2 = lambda i: (0, 0)
    return pl.pallas_call(
        conv_text_kernel,
        out_shape=jax.ShapeDtypeStruct((B, C_OUT, L), jnp.float32),
        grid_spec=pltpu.PrefetchScalarGridSpec(
            num_scalar_prefetch=0,
            grid=(1,),                    # batch folded: weights loaded once, N=256 lanes
            in_specs=[
                pl.BlockSpec((B, C_IN, L), lambda i: (0, 0, 0)),       # x (NCL, both batches)
                pl.BlockSpec((C2, KC), rep2),                          # fused conv|QK weights
                pl.BlockSpec((C2, 1), rep2),                           # fused qk bias
                pl.BlockSpec((HEADS * C_OUT, C_IN), rep2),             # fused V.O weights
                pl.BlockSpec((C_OUT, 1), rep2),                        # fused output bias
            ],
            out_specs=pl.BlockSpec((B, C_OUT, L), lambda i: (0, 0, 0)),
            scratch_shapes=[
                pltpu.VMEM((KC, BL), jnp.float32),     # im2col conv input (96, 256)
                pltpu.VMEM((C_OUT, HL), jnp.float32),  # block-diagonal K   (32, 512)
            ],
        ),
        compiler_params=pltpu.CompilerParams(
            dimension_semantics=("arbitrary",)),
    )(x_ncl, w_qk_lhs, b_qk, wvo_lhs, b_out)


# --------------------------- pure-JAX reference ------------------------------
def conv_text_layer_ref(x_ncl, p):
    x_nlc = jnp.transpose(x_ncl, (0, 2, 1))
    xpad = jnp.pad(x_nlc, ((0, 0), (PAD, PAD), (0, 0)))
    wconv_t = jnp.transpose(p["w_conv"], (2, 1, 0))
    y = jnp.broadcast_to(p["b_conv"][None, None, :], (B, L, C2))
    for t in range(K):
        y = y + jnp.einsum("blc,cd->bld", xpad[:, t * DIL:t * DIL + L, :], wconv_t[t])
    q_raw, k_raw, v_raw = y[..., :C_OUT], y[..., C_OUT:], x_nlc
    q = q_raw @ p["w_q"].T + p["b_q"]
    k = k_raw @ p["w_k"].T + p["b_k"]
    v = v_raw @ p["w_v"].T + p["b_v"]
    split = lambda a: a.reshape(B, L, HEADS, HEAD_DIM).transpose(0, 2, 1, 3)
    qh, kh, vh = split(q), split(k), split(v)
    s = jnp.einsum("bhqd,bhkd->bhqk", qh, kh) / (HEAD_DIM ** 0.5)
    a = jax.nn.softmax(s, axis=-1)
    o = jnp.einsum("bhqk,bhkd->bhqd", a, vh).transpose(0, 2, 1, 3).reshape(B, L, C_OUT)
    o = o @ p["w_o"].T + p["b_o"]
    o = jnp.maximum(o, 0.0) + x_nlc
    return jnp.transpose(o, (0, 2, 1))


# --------------------------------- main --------------------------------------
if __name__ == "__main__":
    key = jax.random.PRNGKey(0)
    ks = jax.random.split(key, 12)

    def unif(k, shape, scale):
        return jax.random.uniform(k, shape, jnp.float32, -scale, scale)

    # Deterministic synthetic parameters (shapes follow the module's __init__).
    params = {
        "w_conv": unif(ks[0], (C2, C_IN, K), 1.0 / (C_IN * K) ** 0.5),  # Conv1d weight
        "b_conv": unif(ks[1], (C2,), 1.0 / (C_IN * K) ** 0.5),          # Conv1d bias
        "w_q": unif(ks[2], (C_OUT, C_OUT), 1.0 / C_OUT ** 0.5),         # MHA in_proj (Q)
        "w_k": unif(ks[3], (C_OUT, C_OUT), 1.0 / C_OUT ** 0.5),         # MHA in_proj (K)
        "w_v": unif(ks[4], (C_OUT, C_OUT), 1.0 / C_OUT ** 0.5),         # MHA in_proj (V)
        "b_q": unif(ks[5], (C_OUT,), 0.1),
        "b_k": unif(ks[6], (C_OUT,), 0.1),
        "b_v": unif(ks[7], (C_OUT,), 0.1),
        "w_o": unif(ks[8], (C_OUT, C_OUT), 1.0 / C_OUT ** 0.5),         # MHA out_proj
        "b_o": unif(ks[9], (C_OUT,), 0.1),
    }

    x = jax.random.normal(ks[10], (B, C_IN, L), jnp.float32)            # NCL input

    out = jax.block_until_ready(conv_text_layer(x, params))
    ref = jax.block_until_ready(conv_text_layer_ref(x, params))

    assert out.shape == (B, C_OUT, L), out.shape
    # Tolerance slightly relaxed vs. 2e-4: the exact-algebra weight foldings and
    # the approx (EUP) softmax reciprocal reorder floating-point ops.
    assert jnp.allclose(out, ref, rtol=5e-4, atol=5e-4), float(jnp.max(jnp.abs(out - ref)))

    # TODO(synk): Attention1d (num_attention_heads=True path) and the string
    # norm/activation factories are not defined in the provided source; only the
    # nn.MultiheadAttention / norm=None / ReLU configuration is reproduced.
    print("KERNEL_OK")
</pallas_src>

<mosaic_0001>
module attributes {stable_mosaic.version = 11 : i64} {
  func.func @conv_text_kernel(%arg0: i32, %arg1: memref<2x32x128xf32, #tpu.memory_space<vmem>>, %arg2: memref<64x96xf32, #tpu.memory_space<vmem>>, %arg3: memref<64x1xf32, #tpu.memory_space<vmem>>, %arg4: memref<128x32xf32, #tpu.memory_space<vmem>>, %arg5: memref<32x1xf32, #tpu.memory_space<vmem>>, %arg6: memref<2x32x128xf32, #tpu.memory_space<vmem>>, %arg7: memref<96x256xf32, #tpu.memory_space<vmem>>, %arg8: memref<32x512xf32, #tpu.memory_space<vmem>>) attributes {dimension_semantics = [#tpu.dimension_semantics<arbitrary>], iteration_bounds = array<i64: 1>, scalar_prefetch = 0 : i64, scratch_operands = 2 : i64, tpu.core_type = #tpu.core_type<tc>, window_params = [{pipeline_mode = #tpu.pipeline_mode<synchronous>, transform_indices = @transform_0, window_bounds = array<i64: 2, 32, 128>}, {pipeline_mode = #tpu.pipeline_mode<synchronous>, transform_indices = @transform_1, window_bounds = array<i64: 64, 96>}, {pipeline_mode = #tpu.pipeline_mode<synchronous>, transform_indices = @transform_2, window_bounds = array<i64: 64, 1>}, {pipeline_mode = #tpu.pipeline_mode<synchronous>, transform_indices = @transform_3, window_bounds = array<i64: 128, 32>}, {pipeline_mode = #tpu.pipeline_mode<synchronous>, transform_indices = @transform_4, window_bounds = array<i64: 32, 1>}, {pipeline_mode = #tpu.pipeline_mode<synchronous>, transform_indices = @transform_5, window_bounds = array<i64: 2, 32, 128>}]} {
    %0 = tpu.iota {dimensions = array<i32: 1>} : vector<32x128xi32>
    %cst = arith.constant 0.000000e+00 : f32
    %1 = vector.broadcast %cst : f32 to vector<32x512xf32>
    %c0 = arith.constant 0 : index
    %c0_0 = arith.constant 0 : index
    %2 = vector.load %arg8[%c0, %c0_0] : memref<32x512xf32, #tpu.memory_space<vmem>>, vector<32x512xf32>
    tpu.vector_store %arg8[%c0, %c0_0], %1 {strides = array<i32>} : memref<32x512xf32, #tpu.memory_space<vmem>>, vector<32x512xf32>,
    %c0_1 = arith.constant 0 : index
    %c0_2 = arith.constant 0 : index
    %c0_3 = arith.constant 0 : index
    %3 = vector.load %arg1[%c0_1, %c0_2, %c0_3] : memref<2x32x128xf32, #tpu.memory_space<vmem>>, vector<1x32x128xf32>
    %4 = vector.shape_cast %3 : vector<1x32x128xf32> to vector<32x128xf32>
    %c0_i32 = arith.constant 0 : i32
    %5 = vector.broadcast %c0_i32 : i32 to vector<32x128xi32>
    %6 = arith.cmpi eq, %0, %5 : vector<32x128xi32>
    %c1_i32 = arith.constant 1 : i32
    %7 = tpu.dynamic_rotate %4 by %c1_i32 dim 1 : vector<32x128xf32>, i32 -> vector<32x128xf32>
    %cst_4 = arith.constant 0.000000e+00 : f32
    %8 = vector.broadcast %cst_4 : f32 to vector<32x128xf32>
    %9 = arith.select %6, %8, %7 : vector<32x128xi1>, vector<32x128xf32>
    %c127_i32 = arith.constant 127 : i32
    %10 = vector.broadcast %c127_i32 : i32 to vector<32x128xi32>
    %11 = arith.cmpi eq, %0, %10 : vector<32x128xi32>
    %c127_i32_5 = arith.constant 127 : i32
    %12 = tpu.dynamic_rotate %4 by %c127_i32_5 dim 1 : vector<32x128xf32>, i32 -> vector<32x128xf32>
    %cst_6 = arith.constant 0.000000e+00 : f32
    %13 = vector.broadcast %cst_6 : f32 to vector<32x128xf32>
    %14 = arith.select %11, %13, %12 : vector<32x128xi1>, vector<32x128xf32>
    %c0_7 = arith.constant 0 : index
    %c0_8 = arith.constant 0 : index
    %15 = vector.load %arg7[%c0_7, %c0_8] : memref<96x256xf32, #tpu.memory_space<vmem>>, vector<32x128xf32>
    tpu.vector_store %arg7[%c0_7, %c0_8], %9 {strides = array<i32>} : memref<96x256xf32, #tpu.memory_space<vmem>>, vector<32x128xf32>,
    %c32 = arith.constant 32 : index
    %c0_9 = arith.constant 0 : index
    %16 = vector.load %arg7[%c32, %c0_9] : memref<96x256xf32, #tpu.memory_space<vmem>>, vector<32x128xf32>
    tpu.vector_store %arg7[%c32, %c0_9], %4 {strides = array<i32>} : memref<96x256xf32, #tpu.memory_space<vmem>>, vector<32x128xf32>,
    %c64 = arith.constant 64 : index
    %c0_10 = arith.constant 0 : index
    %17 = vector.load %arg7[%c64, %c0_10] : memref<96x256xf32, #tpu.memory_space<vmem>>, vector<32x128xf32>
    tpu.vector_store %arg7[%c64, %c0_10], %14 {strides = array<i32>} : memref<96x256xf32, #tpu.memory_space<vmem>>, vector<32x128xf32>,
    %c1 = arith.constant 1 : index
    %c0_11 = arith.constant 0 : index
    %c0_12 = arith.constant 0 : index
    %18 = vector.load %arg1[%c1, %c0_11, %c0_12] : memref<2x32x128xf32, #tpu.memory_space<vmem>>, vector<1x32x128xf32>
    %19 = vector.shape_cast %18 : vector<1x32x128xf32> to vector<32x128xf32>
    %c0_i32_13 = arith.constant 0 : i32
    %20 = vector.broadcast %c0_i32_13 : i32 to vector<32x128xi32>
    %21 = arith.cmpi eq, %0, %20 : vector<32x128xi32>
    %c1_i32_14 = arith.constant 1 : i32
    %22 = tpu.dynamic_rotate %19 by %c1_i32_14 dim 1 : vector<32x128xf32>, i32 -> vector<32x128xf32>
    %cst_15 = arith.constant 0.000000e+00 : f32
    %23 = vector.broadcast %cst_15 : f32 to vector<32x128xf32>
    %24 = arith.select %21, %23, %22 : vector<32x128xi1>, vector<32x128xf32>
    %c127_i32_16 = arith.constant 127 : i32
    %25 = vector.broadcast %c127_i32_16 : i32 to vector<32x128xi32>
    %26 = arith.cmpi eq, %0, %25 : vector<32x128xi32>
    %c127_i32_17 = arith.constant 127 : i32
    %27 = tpu.dynamic_rotate %19 by %c127_i32_17 dim 1 : vector<32x128xf32>, i32 -> vector<32x128xf32>
    %cst_18 = arith.constant 0.000000e+00 : f32
    %28 = vector.broadcast %cst_18 : f32 to vector<32x128xf32>
    %29 = arith.select %26, %28, %27 : vector<32x128xi1>, vector<32x128xf32>
    %c0_19 = arith.constant 0 : index
    %c128 = arith.constant 128 : index
    %30 = vector.load %arg7[%c0_19, %c128] : memref<96x256xf32, #tpu.memory_space<vmem>>, vector<32x128xf32>
    tpu.vector_store %arg7[%c0_19, %c128], %24 {strides = array<i32>} : memref<96x256xf32, #tpu.memory_space<vmem>>, vector<32x128xf32>,
    %c32_20 = arith.constant 32 : index
    %c128_21 = arith.constant 128 : index
    %31 = vector.load %arg7[%c32_20, %c128_21] : memref<96x256xf32, #tpu.memory_space<vmem>>, vector<32x128xf32>
    tpu.vector_store %arg7[%c32_20, %c128_21], %19 {strides = array<i32>} : memref<96x256xf32, #tpu.memory_space<vmem>>, vector<32x128xf32>,
    %c64_22 = arith.constant 64 : index
    %c128_23 = arith.constant 128 : index
    %32 = vector.load %arg7[%c64_22, %c128_23] : memref<96x256xf32, #tpu.memory_space<vmem>>, vector<32x128xf32>
    tpu.vector_store %arg7[%c64_22, %c128_23], %29 {strides = array<i32>} : memref<96x256xf32, #tpu.memory_space<vmem>>, vector<32x128xf32>,
    %c0_24 = arith.constant 0 : index
    %c0_25 = arith.constant 0 : index
    %33 = vector.load %arg7[%c0_24, %c0_25] : memref<96x256xf32, #tpu.memory_space<vmem>>, vector<96x256xf32>
    %34 = vector.extract_strided_slice %33 {offsets = [32, 0], sizes = [32, 256], strides = [1, 1]} : vector<96x256xf32> to vector<32x256xf32>
    %c0_26 = arith.constant 0 : index
    %c0_27 = arith.constant 0 : index
    %35 = vector.load %arg2[%c0_26, %c0_27] : memref<64x96xf32, #tpu.memory_space<vmem>>, vector<64x96xf32>
    %cst_28 = arith.constant dense<0.000000e+00> : vector<64x256xf32>
    %36 = tpu.matmul %35, %33, %cst_28 {dimension_numbers = #tpu.dot_dimension_numbers<[1], [0], [0], [1], [0, 0, 1, 1], [], []>} : vector<64x96xf32>, vector<96x256xf32>, vector<64x256xf32> -> vector<64x256xf32>
    %c0_29 = arith.constant 0 : index
    %c0_30 = arith.constant 0 : index
    %37 = vector.load %arg3[%c0_29, %c0_30] : memref<64x1xf32, #tpu.memory_space<vmem>>, vector<64x1xf32>
    %38 = vector.broadcast %37 : vector<64x1xf32> to vector<64x256xf32>
    %39 = arith.addf %36, %38 : vector<64x256xf32>
    %40 = vector.extract_strided_slice %39 {offsets = [0, 0], sizes = [32, 256], strides = [1, 1]} : vector<64x256xf32> to vector<32x256xf32>
    %41 = vector.extract_strided_slice %39 {offsets = [32, 0], sizes = [32, 256], strides = [1, 1]} : vector<64x256xf32> to vector<32x256xf32>
    %c0_31 = arith.constant 0 : index
    %c0_32 = arith.constant 0 : index
    %42 = vector.load %arg4[%c0_31, %c0_32] : memref<128x32xf32, #tpu.memory_space<vmem>>, vector<128x32xf32>
    %cst_33 = arith.constant dense<0.000000e+00> : vector<128x256xf32>
    %43 = tpu.matmul %42, %34, %cst_33 {dimension_numbers = #tpu.dot_dimension_numbers<[1], [0], [0], [1], [0, 0, 1, 1], [], []>} : vector<128x32xf32>, vector<32x256xf32>, vector<128x256xf32> -> vector<128x256xf32>
    %c0_34 = arith.constant 0 : index
    %c0_35 = arith.constant 0 : index
    %44 = vector.load %arg5[%c0_34, %c0_35] : memref<32x1xf32, #tpu.memory_space<vmem>>, vector<32x1xf32>
    %45 = vector.extract_strided_slice %40 {offsets = [0, 0], sizes = [32, 128], strides = [1, 1]} : vector<32x256xf32> to vector<32x128xf32>
    %46 = vector.extract_strided_slice %41 {offsets = [0, 0], sizes = [32, 128], strides = [1, 1]} : vector<32x256xf32> to vector<32x128xf32>
    %47 = vector.extract_strided_slice %43 {offsets = [0, 0], sizes = [128, 128], strides = [1, 1]} : vector<128x256xf32> to vector<128x128xf32>
    %48 = vector.extract_strided_slice %34 {offsets = [0, 0], sizes = [32, 128], strides = [1, 1]} : vector<32x256xf32> to vector<32x128xf32>
    %49 = vector.extract_strided_slice %46 {offsets = [0, 0], sizes = [8, 128], strides = [1, 1]} : vector<32x128xf32> to vector<8x128xf32>
    %c0_36 = arith.constant 0 : index
    %c0_37 = arith.constant 0 : index
    %50 = vector.load %arg8[%c0_36, %c0_37] : memref<32x512xf32, #tpu.memory_space<vmem>>, vector<8x128xf32>
    tpu.vector_store %arg8[%c0_36, %c0_37], %49 {strides = array<i32>} : memref<32x512xf32, #tpu.memory_space<vmem>>, vector<8x128xf32>,
    %51 = vector.extract_strided_slice %46 {offsets = [8, 0], sizes = [8, 128], strides = [1, 1]} : vector<32x128xf32> to vector<8x128xf32>
    %c8 = arith.constant 8 : index
    %c128_38 = arith.constant 128 : index
    %52 = vector.load %arg8[%c8, %c128_38] : memref<32x512xf32, #tpu.memory_space<vmem>>, vector<8x128xf32>
    tpu.vector_store %arg8[%c8, %c128_38], %51 {strides = array<i32>} : memref<32x512xf32, #tpu.memory_space<vmem>>, vector<8x128xf32>,
    %53 = vector.extract_strided_slice %46 {offsets = [16, 0], sizes = [8, 128], strides = [1, 1]} : vector<32x128xf32> to vector<8x128xf32>
    %c16 = arith.constant 16 : index
    %c256 = arith.constant 256 : index
    %54 = vector.load %arg8[%c16, %c256] : memref<32x512xf32, #tpu.memory_space<vmem>>, vector<8x128xf32>
    tpu.vector_store %arg8[%c16, %c256], %53 {strides = array<i32>} : memref<32x512xf32, #tpu.memory_space<vmem>>, vector<8x128xf32>,
    %55 = vector.extract_strided_slice %46 {offsets = [24, 0], sizes = [8, 128], strides = [1, 1]} : vector<32x128xf32> to vector<8x128xf32>
    %c24 = arith.constant 24 : index
    %c384 = arith.constant 384 : index
    %56 = vector.load %arg8[%c24, %c384] : memref<32x512xf32, #tpu.memory_space<vmem>>, vector<8x128xf32>
    tpu.vector_store %arg8[%c24, %c384], %55 {strides = array<i32>} : memref<32x512xf32, #tpu.memory_space<vmem>>, vector<8x128xf32>,
    %c0_39 = arith.constant 0 : index
    %c0_40 = arith.constant 0 : index
    %57 = vector.load %arg8[%c0_39, %c0_40] : memref<32x512xf32, #tpu.memory_space<vmem>>, vector<32x512xf32>
    %cst_41 = arith.constant dense<0.000000e+00> : vector<512x128xf32>
    %58 = tpu.matmul %57, %45, %cst_41 {dimension_numbers = #tpu.dot_dimension_numbers<[0], [0], [1], [1], [0, 1, 1, 1], [], []>} : vector<32x512xf32>, vector<32x128xf32>, vector<512x128xf32> -> vector<512x128xf32>
    %59 = vector.extract_strided_slice %58 {offsets = [0, 0], sizes = [128, 128], strides = [1, 1]} : vector<512x128xf32> to vector<128x128xf32>
    %cst_42 = arith.constant dense<0xFF800000> : vector<128xf32>
    %60 = vector.multi_reduction <maximumf>, %59, %cst_42 [0] : vector<128x128xf32> to vector<128xf32>
    %61 = vector.shape_cast %60 : vector<128xf32> to vector<1x128xf32>
    %62 = vector.broadcast %61 : vector<1x128xf32> to vector<128x128xf32>
    %63 = arith.subf %59, %62 : vector<128x128xf32>
    %64 = math.exp %63 : vector<128x128xf32>
    %cst_43 = arith.constant dense<0.000000e+00> : vector<128xf32>
    %65 = vector.multi_reduction <add>, %64, %cst_43 [0] : vector<128x128xf32> to vector<128xf32>
    %66 = vector.shape_cast %65 : vector<128xf32> to vector<1x128xf32>
    %67 = tpu.reciprocal %66 {approx = true} : vector<1x128xf32> -> vector<1x128xf32>
    %68 = vector.broadcast %67 : vector<1x128xf32> to vector<128x128xf32>
    %69 = arith.mulf %64, %68 : vector<128x128xf32>
    %70 = vector.extract_strided_slice %58 {offsets = [128, 0], sizes = [128, 128], strides = [1, 1]} : vector<512x128xf32> to vector<128x128xf32>
    %cst_44 = arith.constant dense<0xFF800000> : vector<128xf32>
    %71 = vector.multi_reduction <maximumf>, %70, %cst_44 [0] : vector<128x128xf32> to vector<128xf32>
    %72 = vector.shape_cast %71 : vector<128xf32> to vector<1x128xf32>
    %73 = vector.broadcast %72 : vector<1x128xf32> to vector<128x128xf32>
    %74 = arith.subf %70, %73 : vector<128x128xf32>
    %75 = math.exp %74 : vector<128x128xf32>
    %cst_45 = arith.constant dense<0.000000e+00> : vector<128xf32>
    %76 = vector.multi_reduction <add>, %75, %cst_45 [0] : vector<128x128xf32> to vector<128xf32>
    %77 = vector.shape_cast %76 : vector<128xf32> to vector<1x128xf32>
    %78 = tpu.reciprocal %77 {approx = true} : vector<1x128xf32> -> vector<1x128xf32>
    %79 = vector.broadcast %78 : vector<1x128xf32> to vector<128x128xf32>
    %80 = arith.mulf %75, %79 : vector<128x128xf32>
    %81 = vector.extract_strided_slice %58 {offsets = [256, 0], sizes = [128, 128], strides = [1, 1]} : vector<512x128xf32> to vector<128x128xf32>
    %cst_46 = arith.constant dense<0xFF800000> : vector<128xf32>
    %82 = vector.multi_reduction <maximumf>, %81, %cst_46 [0] : vector<128x128xf32> to vector<128xf32>
    %83 = vector.shape_cast %82 : vector<128xf32> to vector<1x128xf32>
    %84 = vector.broadcast %83 : vector<1x128xf32> to vector<128x128xf32>
    %85 = arith.subf %81, %84 : vector<128x128xf32>
    %86 = math.exp %85 : vector<128x128xf32>
    %cst_47 = arith.constant dense<0.000000e+00> : vector<128xf32>
    %87 = vector.multi_reduction <add>, %86, %cst_47 [0] : vector<128x128xf32> to vector<128xf32>
    %88 = vector.shape_cast %87 : vector<128xf32> to vector<1x128xf32>
    %89 = tpu.reciprocal %88 {approx = true} : vector<1x128xf32> -> vector<1x128xf32>
    %90 = vector.broadcast %89 : vector<1x128xf32> to vector<128x128xf32>
    %91 = arith.mulf %86, %90 : vector<128x128xf32>
    %92 = vector.extract_strided_slice %58 {offsets = [384, 0], sizes = [128, 128], strides = [1, 1]} : vector<512x128xf32> to vector<128x128xf32>
    %cst_48 = arith.constant dense<0xFF800000> : vector<128xf32>
    %93 = vector.multi_reduction <maximumf>, %92, %cst_48 [0] : vector<128x128xf32> to vector<128xf32>
    %94 = vector.shape_cast %93 : vector<128xf32> to vector<1x128xf32>
    %95 = vector.broadcast %94 : vector<1x128xf32> to vector<128x128xf32>
    %96 = arith.subf %92, %95 : vector<128x128xf32>
    %97 = math.exp %96 : vector<128x128xf32>
    %cst_49 = arith.constant dense<0.000000e+00> : vector<128xf32>
    %98 = vector.multi_reduction <add>, %97, %cst_49 [0] : vector<128x128xf32> to vector<128xf32>
    %99 = vector.shape_cast %98 : vector<128xf32> to vector<1x128xf32>
    %100 = tpu.reciprocal %99 {approx = true} : vector<1x128xf32> -> vector<1x128xf32>
    %101 = vector.broadcast %100 : vector<1x128xf32> to vector<128x128xf32>
    %102 = arith.mulf %97, %101 : vector<128x128xf32>
    %103 = tpu.concatenate %69, %80, %91, %102 in 0 : vector<128x128xf32>, vector<128x128xf32>, vector<128x128xf32>, vector<128x128xf32> -> vector<512x128xf32>
    %104 = vector.extract_strided_slice %47 {offsets = [0, 0], sizes = [32, 128], strides = [1, 1]} : vector<128x128xf32> to vector<32x128xf32>
    %105 = vector.extract_strided_slice %47 {offsets = [32, 0], sizes = [32, 128], strides = [1, 1]} : vector<128x128xf32> to vector<32x128xf32>
    %106 = vector.extract_strided_slice %47 {offsets = [64, 0], sizes = [32, 128], strides = [1, 1]} : vector<128x128xf32> to vector<32x128xf32>
    %107 = vector.extract_strided_slice %47 {offsets = [96, 0], sizes = [32, 128], strides = [1, 1]} : vector<128x128xf32> to vector<32x128xf32>
    %108 = tpu.concatenate %104, %105, %106, %107 in 1 : vector<32x128xf32>, vector<32x128xf32>, vector<32x128xf32>, vector<32x128xf32> -> vector<32x512xf32>
    %cst_50 = arith.constant dense<0.000000e+00> : vector<32x128xf32>
    %109 = tpu.matmul %108, %103, %cst_50 {dimension_numbers = #tpu.dot_dimension_numbers<[1], [0], [0], [1], [0, 0, 1, 1], [], []>} : vector<32x512xf32>, vector<512x128xf32>, vector<32x128xf32> -> vector<32x128xf32>
    %110 = vector.broadcast %44 : vector<32x1xf32> to vector<32x128xf32>
    %111 = arith.addf %109, %110 : vector<32x128xf32>
    %cst_51 = arith.constant 0.000000e+00 : f32
    %112 = vector.broadcast %cst_51 : f32 to vector<32x128xf32>
    %113 = arith.maximumf %111, %112 : vector<32x128xf32>
    %114 = arith.addf %113, %48 : vector<32x128xf32>
    %c0_52 = arith.constant 0 : index
    %c0_53 = arith.constant 0 : index
    %c0_54 = arith.constant 0 : index
    %115 = vector.load %arg6[%c0_52, %c0_53, %c0_54] : memref<2x32x128xf32, #tpu.memory_space<vmem>>, vector<1x32x128xf32>
    %116 = vector.shape_cast %115 : vector<1x32x128xf32> to vector<32x128xf32>
    %117 = vector.shape_cast %114 : vector<32x128xf32> to vector<1x32x128xf32>
    tpu.vector_store %arg6[%c0_52, %c0_53, %c0_54], %117 {strides = array<i32>} : memref<2x32x128xf32, #tpu.memory_space<vmem>>, vector<1x32x128xf32>,
    %118 = vector.extract_strided_slice %40 {offsets = [0, 128], sizes = [32, 128], strides = [1, 1]} : vector<32x256xf32> to vector<32x128xf32>
    %119 = vector.extract_strided_slice %41 {offsets = [0, 128], sizes = [32, 128], strides = [1, 1]} : vector<32x256xf32> to vector<32x128xf32>
    %120 = vector.extract_strided_slice %43 {offsets = [0, 128], sizes = [128, 128], strides = [1, 1]} : vector<128x256xf32> to vector<128x128xf32>
    %121 = vector.extract_strided_slice %34 {offsets = [0, 128], sizes = [32, 128], strides = [1, 1]} : vector<32x256xf32> to vector<32x128xf32>
    %122 = vector.extract_strided_slice %119 {offsets = [0, 0], sizes = [8, 128], strides = [1, 1]} : vector<32x128xf32> to vector<8x128xf32>
    %c0_55 = arith.constant 0 : index
    %c0_56 = arith.constant 0 : index
    %123 = vector.load %arg8[%c0_55, %c0_56] : memref<32x512xf32, #tpu.memory_space<vmem>>, vector<8x128xf32>
    tpu.vector_store %arg8[%c0_55, %c0_56], %122 {strides = array<i32>} : memref<32x512xf32, #tpu.memory_space<vmem>>, vector<8x128xf32>,
    %124 = vector.extract_strided_slice %119 {offsets = [8, 0], sizes = [8, 128], strides = [1, 1]} : vector<32x128xf32> to vector<8x128xf32>
    %c8_57 = arith.constant 8 : index
    %c128_58 = arith.constant 128 : index
    %125 = vector.load %arg8[%c8_57, %c128_58] : memref<32x512xf32, #tpu.memory_space<vmem>>, vector<8x128xf32>
    tpu.vector_store %arg8[%c8_57, %c128_58], %124 {strides = array<i32>} : memref<32x512xf32, #tpu.memory_space<vmem>>, vector<8x128xf32>,
    %126 = vector.extract_strided_slice %119 {offsets = [16, 0], sizes = [8, 128], strides = [1, 1]} : vector<32x128xf32> to vector<8x128xf32>
    %c16_59 = arith.constant 16 : index
    %c256_60 = arith.constant 256 : index
    %127 = vector.load %arg8[%c16_59, %c256_60] : memref<32x512xf32, #tpu.memory_space<vmem>>, vector<8x128xf32>
    tpu.vector_store %arg8[%c16_59, %c256_60], %126 {strides = array<i32>} : memref<32x512xf32, #tpu.memory_space<vmem>>, vector<8x128xf32>,
    %128 = vector.extract_strided_slice %119 {offsets = [24, 0], sizes = [8, 128], strides = [1, 1]} : vector<32x128xf32> to vector<8x128xf32>
    %c24_61 = arith.constant 24 : index
    %c384_62 = arith.constant 384 : index
    %129 = vector.load %arg8[%c24_61, %c384_62] : memref<32x512xf32, #tpu.memory_space<vmem>>, vector<8x128xf32>
    tpu.vector_store %arg8[%c24_61, %c384_62], %128 {strides = array<i32>} : memref<32x512xf32, #tpu.memory_space<vmem>>, vector<8x128xf32>,
    %c0_63 = arith.constant 0 : index
    %c0_64 = arith.constant 0 : index
    %130 = vector.load %arg8[%c0_63, %c0_64] : memref<32x512xf32, #tpu.memory_space<vmem>>, vector<32x512xf32>
    %cst_65 = arith.constant dense<0.000000e+00> : vector<512x128xf32>
    %131 = tpu.matmul %130, %118, %cst_65 {dimension_numbers = #tpu.dot_dimension_numbers<[0], [0], [1], [1], [0, 1, 1, 1], [], []>} : vector<32x512xf32>, vector<32x128xf32>, vector<512x128xf32> -> vector<512x128xf32>
    %132 = vector.extract_strided_slice %131 {offsets = [0, 0], sizes = [128, 128], strides = [1, 1]} : vector<512x128xf32> to vector<128x128xf32>
    %cst_66 = arith.constant dense<0xFF800000> : vector<128xf32>
    %133 = vector.multi_reduction <maximumf>, %132, %cst_66 [0] : vector<128x128xf32> to vector<128xf32>
    %134 = vector.shape_cast %133 : vector<128xf32> to vector<1x128xf32>
    %135 = vector.broadcast %134 : vector<1x128xf32> to vector<128x128xf32>
    %136 = arith.subf %132, %135 : vector<128x128xf32>
    %137 = math.exp %136 : vector<128x128xf32>
    %cst_67 = arith.constant dense<0.000000e+00> : vector<128xf32>
    %138 = vector.multi_reduction <add>, %137, %cst_67 [0] : vector<128x128xf32> to vector<128xf32>
    %139 = vector.shape_cast %138 : vector<128xf32> to vector<1x128xf32>
    %140 = tpu.reciprocal %139 {approx = true} : vector<1x128xf32> -> vector<1x128xf32>
    %141 = vector.broadcast %140 : vector<1x128xf32> to vector<128x128xf32>
    %142 = arith.mulf %137, %141 : vector<128x128xf32>
    %143 = vector.extract_strided_slice %131 {offsets = [128, 0], sizes = [128, 128], strides = [1, 1]} : vector<512x128xf32> to vector<128x128xf32>
    %cst_68 = arith.constant dense<0xFF800000> : vector<128xf32>
    %144 = vector.multi_reduction <maximumf>, %143, %cst_68 [0] : vector<128x128xf32> to vector<128xf32>
    %145 = vector.shape_cast %144 : vector<128xf32> to vector<1x128xf32>
    %146 = vector.broadcast %145 : vector<1x128xf32> to vector<128x128xf32>
    %147 = arith.subf %143, %146 : vector<128x128xf32>
    %148 = math.exp %147 : vector<128x128xf32>
    %cst_69 = arith.constant dense<0.000000e+00> : vector<128xf32>
    %149 = vector.multi_reduction <add>, %148, %cst_69 [0] : vector<128x128xf32> to vector<128xf32>
    %150 = vector.shape_cast %149 : vector<128xf32> to vector<1x128xf32>
    %151 = tpu.reciprocal %150 {approx = true} : vector<1x128xf32> -> vector<1x128xf32>
    %152 = vector.broadcast %151 : vector<1x128xf32> to vector<128x128xf32>
    %153 = arith.mulf %148, %152 : vector<128x128xf32>
    %154 = vector.extract_strided_slice %131 {offsets = [256, 0], sizes = [128, 128], strides = [1, 1]} : vector<512x128xf32> to vector<128x128xf32>
    %cst_70 = arith.constant dense<0xFF800000> : vector<128xf32>
    %155 = vector.multi_reduction <maximumf>, %154, %cst_70 [0] : vector<128x128xf32> to vector<128xf32>
    %156 = vector.shape_cast %155 : vector<128xf32> to vector<1x128xf32>
    %157 = vector.broadcast %156 : vector<1x128xf32> to vector<128x128xf32>
    %158 = arith.subf %154, %157 : vector<128x128xf32>
    %159 = math.exp %158 : vector<128x128xf32>
    %cst_71 = arith.constant dense<0.000000e+00> : vector<128xf32>
    %160 = vector.multi_reduction <add>, %159, %cst_71 [0] : vector<128x128xf32> to vector<128xf32>
    %161 = vector.shape_cast %160 : vector<128xf32> to vector<1x128xf32>
    %162 = tpu.reciprocal %161 {approx = true} : vector<1x128xf32> -> vector<1x128xf32>
    %163 = vector.broadcast %162 : vector<1x128xf32> to vector<128x128xf32>
    %164 = arith.mulf %159, %163 : vector<128x128xf32>
    %165 = vector.extract_strided_slice %131 {offsets = [384, 0], sizes = [128, 128], strides = [1, 1]} : vector<512x128xf32> to vector<128x128xf32>
    %cst_72 = arith.constant dense<0xFF800000> : vector<128xf32>
    %166 = vector.multi_reduction <maximumf>, %165, %cst_72 [0] : vector<128x128xf32> to vector<128xf32>
    %167 = vector.shape_cast %166 : vector<128xf32> to vector<1x128xf32>
    %168 = vector.broadcast %167 : vector<1x128xf32> to vector<128x128xf32>
    %169 = arith.subf %165, %168 : vector<128x128xf32>
    %170 = math.exp %169 : vector<128x128xf32>
    %cst_73 = arith.constant dense<0.000000e+00> : vector<128xf32>
    %171 = vector.multi_reduction <add>, %170, %cst_73 [0] : vector<128x128xf32> to vector<128xf32>
    %172 = vector.shape_cast %171 : vector<128xf32> to vector<1x128xf32>
    %173 = tpu.reciprocal %172 {approx = true} : vector<1x128xf32> -> vector<1x128xf32>
    %174 = vector.broadcast %173 : vector<1x128xf32> to vector<128x128xf32>
    %175 = arith.mulf %170, %174 : vector<128x128xf32>
    %176 = tpu.concatenate %142, %153, %164, %175 in 0 : vector<128x128xf32>, vector<128x128xf32>, vector<128x128xf32>, vector<128x128xf32> -> vector<512x128xf32>
    %177 = vector.extract_strided_slice %120 {offsets = [0, 0], sizes = [32, 128], strides = [1, 1]} : vector<128x128xf32> to vector<32x128xf32>
    %178 = vector.extract_strided_slice %120 {offsets = [32, 0], sizes = [32, 128], strides = [1, 1]} : vector<128x128xf32> to vector<32x128xf32>
    %179 = vector.extract_strided_slice %120 {offsets = [64, 0], sizes = [32, 128], strides = [1, 1]} : vector<128x128xf32> to vector<32x128xf32>
    %180 = vector.extract_strided_slice %120 {offsets = [96, 0], sizes = [32, 128], strides = [1, 1]} : vector<128x128xf32> to vector<32x128xf32>
    %181 = tpu.concatenate %177, %178, %179, %180 in 1 : vector<32x128xf32>, vector<32x128xf32>, vector<32x128xf32>, vector<32x128xf32> -> vector<32x512xf32>
    %cst_74 = arith.constant dense<0.000000e+00> : vector<32x128xf32>
    %182 = tpu.matmul %181, %176, %cst_74 {dimension_numbers = #tpu.dot_dimension_numbers<[1], [0], [0], [1], [0, 0, 1, 1], [], []>} : vector<32x512xf32>, vector<512x128xf32>, vector<32x128xf32> -> vector<32x128xf32>
    %183 = vector.broadcast %44 : vector<32x1xf32> to vector<32x128xf32>
    %184 = arith.addf %182, %183 : vector<32x128xf32>
    %cst_75 = arith.constant 0.000000e+00 : f32
    %185 = vector.broadcast %cst_75 : f32 to vector<32x128xf32>
    %186 = arith.maximumf %184, %185 : vector<32x128xf32>
    %187 = arith.addf %186, %121 : vector<32x128xf32>
    %c1_76 = arith.constant 1 : index
    %c0_77 = arith.constant 0 : index
    %c0_78 = arith.constant 0 : index
    %188 = vector.load %arg6[%c1_76, %c0_77, %c0_78] : memref<2x32x128xf32, #tpu.memory_space<vmem>>, vector<1x32x128xf32>
    %189 = vector.shape_cast %188 : vector<1x32x128xf32> to vector<32x128xf32>
    %190 = vector.shape_cast %187 : vector<32x128xf32> to vector<1x32x128xf32>
    tpu.vector_store %arg6[%c1_76, %c0_77, %c0_78], %190 {strides = array<i32>} : memref<2x32x128xf32, #tpu.memory_space<vmem>>, vector<1x32x128xf32>,
    return
  }
  func.func @transform_0(%arg0: i32) -> (i32, i32, i32) {
    %c0_i32 = arith.constant 0 : i32
    %c0_i32_0 = arith.constant 0 : i32
    %c0_i32_1 = arith.constant 0 : i32
    %c0_i32_2 = arith.constant 0 : i32
    return %c0_i32, %c0_i32_0, %c0_i32_1 : i32, i32, i32
  }
  func.func @transform_1(%arg0: i32) -> (i32, i32) {
    %c0_i32 = arith.constant 0 : i32
    %c0_i32_0 = arith.constant 0 : i32
    %c0_i32_1 = arith.constant 0 : i32
    return %c0_i32, %c0_i32_0 : i32, i32
  }
  func.func @transform_2(%arg0: i32) -> (i32, i32) {
    %c0_i32 = arith.constant 0 : i32
    %c0_i32_0 = arith.constant 0 : i32
    %c0_i32_1 = arith.constant 0 : i32
    return %c0_i32, %c0_i32_0 : i32, i32
  }
  func.func @transform_3(%arg0: i32) -> (i32, i32) {
    %c0_i32 = arith.constant 0 : i32
    %c0_i32_0 = arith.constant 0 : i32
    %c0_i32_1 = arith.constant 0 : i32
    return %c0_i32, %c0_i32_0 : i32, i32
  }
  func.func @transform_4(%arg0: i32) -> (i32, i32) {
    %c0_i32 = arith.constant 0 : i32
    %c0_i32_0 = arith.constant 0 : i32
    %c0_i32_1 = arith.constant 0 : i32
    return %c0_i32, %c0_i32_0 : i32, i32
  }
  func.func @transform_5(%arg0: i32) -> (i32, i32, i32) {
    %c0_i32 = arith.constant 0 : i32
    %c0_i32_0 = arith.constant 0 : i32
    %c0_i32_1 = arith.constant 0 : i32
    %c0_i32_2 = arith.constant 0 : i32
    return %c0_i32, %c0_i32_0, %c0_i32_1 : i32, i32, i32
  }
}

</mosaic_0001>

<bundles_post_ra>
// kernel: tpu_custom_call.1
= control target key start
LH: loop header
LB: loop body
LE: loop exit
PB: predicated region body
PF: predicated region fallthrough
CT: control target
= control target key end

     0   :  { %s3299_s22 = smov 127   ;;  %s5187_s0 = inlined_call_operand.vmem [shape: f32[2,32,128], index: 0, kind: input, shape index: {}]   ;;  %s5188_s1 = inlined_call_operand.vmem [shape: f32[64,96], index: 1, kind: input, shape index: {}]   ;;  %s5189_s2 = inlined_call_operand.vmem [shape: f32[64,1], index: 2, kind: input, shape index: {}]   ;;  %s5190_s3 = inlined_call_operand.vmem [shape: f32[128,32], index: 3, kind: input, shape index: {}]   ;;  %s5191_s4 = inlined_call_operand.vmem [shape: f32[32,1], index: 4, kind: input, shape index: {}]   ;;  %s5192_s5 = inlined_call_operand.hbm [shape: f32[2,32,128], index: 5, kind: output, shape index: {}]  }
   0x1   :  { %v42_v0 = vld [vmem:[%s5187_s0 + $0x18] sm:$0xff]  ;;  %v40_v1 = vld [vmem:[%s5187_s0 + $0x8] sm:$0xff] }
   0x2   :  { %63 = vrot.lane.b32.xlu0 %v42_v0, %s3299_s22  ;;  %59 = vrot.lane.b32.xlu1 %v40_v1, %s3299_s22 }
   0x3   :  { %10 = vsyncpa [#allocation5], 0  ;;  %s3300_s23 = smov 1   ;;  %2969 = vmatpush.msra.mxu3 %v42_v0  ;;  %v41_v2 = vld [vmem:[%s5187_s0 + $0x10] sm:$0xff]  ;;  %386 = vmatpush.msra.mxu2 %v42_v0  ;;  %v39_v3 = vld [vmem:[%s5187_s0] sm:$0xff]  ;;  %v21_v4 = vlaneseq  ;;  %v3301_v7 = vmov 0  }
   0x4   :  { %50 = vrot.lane.b32.xlu2 %v42_v0, %s3300_s23  ;;  %v156_v6 = vld [vmem:[%s5189_s2 + $0x10] sm:$0xff]  ;;  %2992 = vset.pattern.permute.xlu1 %v3301_v7  ;;  %v154_v10 = vld [vmem:[%s5189_s2] sm:$0xff]  ;;  %vm202_vm2 = vcmask 785408   ;;  %v157_v19 = vld [vmem:[%s5189_s2 + $0x18] sm:$0xff]  ;;  %vm325_vm3 = vcmask 261120   ;;  %v5193_v35 = vmov 0.0  }
   0x5   :  { %2970 = vmatpush.msra.mxu3 %v41_v2  ;;  %387 = vmatpush.msra.mxu2 %v41_v2  ;;  %v3356_v5 = vand.u32 127, %v21_v4  ;;  %v3383_v17 = vld [vmem:[%s5188_s1] sm:$0xff]  ;;  %v3398_v20 = vld [vmem:[%s5188_s1 + $0x8] sm:$0xff]  ;;  %v3411_v23 = vld [vmem:[%s5188_s1 + $0x10] sm:$0xff]  ;;  %s3303_s20 = smov [#allocation4]   ;;  %s2745_s26 = sshll.u32 %s5192_s5, 4  ;;  %s2746_s26 = int_to_ptr.hbm [resolvable:$true] %s2745_s26 }
   0x6   :  { %2991 = vset.pattern.permute.xlu0 %v3301_v7  ;;  %2990 = vset.pattern.permute.xlu2 %v3301_v7  ;;  %v158_v18 = vld [vmem:[%s5189_s2 + $0x20] sm:$0xff]  ;;  %v155_v21 = vld [vmem:[%s5189_s2 + $0x8] sm:$0xff]  ;;  %v160_v24 = vld [vmem:[%s5189_s2 + $0x30] sm:$0xff]  ;;  %s2743_s21 = sshll.u32 %s3303_s20, 4  ;;  %s2744_s21 = int_to_ptr.vmem [resolvable:$true] %s2743_s21 }
   0x7   :  { %2971 = vmatpush.msra.mxu3 %v40_v1  ;;  %388 = vmatpush.msra.mxu2 %v40_v1  ;;  %vm2981_vm0 = vcmp.ne.s32.totalorder %v3356_v5, 127  ;;  %vm2982_vm1 = vcmp.ne.s32.totalorder %v3356_v5, 0  ;;  %v159_v22 = vld [vmem:[%s5189_s2 + $0x28] sm:$0xff]  ;;  %v3421_v25 = vld [vmem:[%s5188_s1 + $0x18] sm:$0xff]  ;;  %v3428_v26 = vld [vmem:[%s5188_s1 + $0x20] sm:$0xff] }
   0x8   :  { %v3435_v27 = vld [vmem:[%s5188_s1 + $0x28] sm:$0xff]  ;;  %v3442_v28 = vld [vmem:[%s5188_s1 + $0x30] sm:$0xff]  ;;  %v3449_v29 = vld [vmem:[%s5187_s0 + $0x38] sm:$0xff] }
   0x9   :  { %2972 = vmatpush.msra.mxu3 %v39_v3  ;;  %389 = vmatpush.msra.mxu2 %v39_v3  ;;  %v3454_v30 = vld [vmem:[%s5187_s0 + $0x30] sm:$0xff]  ;;  %v3461_v31 = vld [vmem:[%s5187_s0 + $0x28] sm:$0xff]  ;;  %v3467_v32 = vld [vmem:[%s5187_s0 + $0x20] sm:$0xff] }
   0xa   :  { %61 = vrot.lane.b32.xlu0 %v41_v2, %s3299_s22  ;;  %57 = vrot.lane.b32.xlu1 %v39_v3, %s3299_s22  ;;  %v3472_v33 = vld [vmem:[%s5190_s3 + $0x60] sm:$0xff]  ;;  %v3487_v40 = vld [vmem:[%s5188_s1 + $0x38] sm:$0xff] }
   0xb   :  { %451 = vmatpush.msrb.mxu3 %v3449_v29  ;;  %v3511_v57 = vld [vmem:[%s5190_s3 + $0x68] sm:$0xff]  ;;  %v3518_v58 = vld [vmem:[%s5190_s3 + $0x70] sm:$0xff]  ;;  %v3525_v59 = vld [vmem:[%s5190_s3 + $0x78] sm:$0xff] }
   0xc   :  { %48 = vrot.lane.b32.xlu2 %v41_v2, %s3300_s23  ;;  %2789 = vmatmul.msk.f32.vlgmr.msra.gmra.mxu3 %vm325_vm3, %v3472_v33  ;;  %v309_v61 = vld [vmem:[%s5190_s3] sm:$0xff]  ;;  %v310_v63 = vld [vmem:[%s5190_s3 + $0x8] sm:$0xff] }
   0xd   :  { %452 = vmatpush.msrb.mxu3 %v3454_v30  ;;  %2777 = vmatmul.msk.f32.vlgmr.msra.gmra.mxu2 %vm325_vm3, %v309_v61 }
   0xf   :  { %453 = vmatpush.msrb.mxu3 %v3461_v31 }
  0x11   :  { %454 = vmatpush.msrb.mxu3 %v3467_v32 }
  0x12   :  { %46 = vrot.lane.b32.xlu0 %v40_v1, %s3300_s23  ;;  %44 = vrot.lane.b32.xlu1 %v39_v3, %s3300_s23 }
  0x14   :  { %184 = vperm.xlu2 %2990, %v158_v18   ;;  %2790 = vmatmul.msk.f32.gmra.mxu3 %vm325_vm3, %v3511_v57 }
  0x15   :  { %2778 = vmatmul.msk.f32.gmra.mxu2 %vm325_vm3, %v310_v63 }
  0x1a   :  { %174 = vperm.xlu1 %2992, %v156_v6   ;;  %179 = vperm.xlu0 %2991, %v157_v19  }
  0x1c   :  { %169 = vperm.xlu2 %2990, %v155_v21   ;;  %2791 = vmatmul.msk.f32.gmra.mxu3 %vm325_vm3, %v3518_v58 }
  0x22   :  { %164 = vperm.xlu1 %2992, %v154_v10   ;;  %189 = vperm.xlu0 %2991, %v159_v22   ;;  %v316_v22 = vld [vmem:[%s5190_s3 + $0x38] sm:$0xff] }
  0x24   :  { %2792 = vmatmul.msk.f32.gmra.mxu3 %vm325_vm3, %v3525_v59 }
  0x2a   :  { %194 = vperm.xlu0 %2991, %v160_v24  }
  0x2c   :  { %2793 = vmatmul.msk.f32.vlgmr.msrb.gmra.mxu3 %vm325_vm3, %v309_v61  ;;  %v320_v61 = vld [vmem:[%s5190_s3 + $0x58] sm:$0xff] }
  0x34   :  { %2794 = vmatmul.msk.f32.gmra.mxu3 %vm325_vm3, %v310_v63 }
  0x4c   :  { %592 = vxpose.xlu0.b32.start [1/3] (short) %v5193_v35, 128 }
  0x54   :  { %593 = vxpose.xlu0.b32.cont [2/3] (short) %v5193_v35, 128 }
  0x57   :  { %560 = vxpose.xlu1.b32.start [1/2] (short) %v5193_v35, 128 }
  0x5e   :  { %v51_v13 = vpop.permute.xlu2 %50 }
  0x66   :  { %v49_v14 = vpop.permute.xlu2 %48 }
  0x6e   :  { %v3480_v37 = vpop.permute.xlu2 %184 }
  0x74   :  { %v64_v8 = vpop.permute.xlu0 %63  ;;  %v60_v9 = vpop.permute.xlu1 %59 }
  0x75   :  { %2938 = vmatpush.msk.msra.mxu0 %vm2981_vm0, %v64_v8  ;;  %v313_v8 = vld [vmem:[%s5190_s3 + $0x20] sm:$0xff] }
  0x76   :  { %v3494_v44 = vpop.permute.xlu2 %169 }
  0x7c   :  { %v62_v11 = vpop.permute.xlu0 %61  ;;  %v58_v12 = vpop.permute.xlu1 %57 }
  0x7d   :  { %2940 = vmatpush.msk.msra.mxu0 %vm2981_vm0, %v62_v11 }
  0x7f   :  { %2942 = vmatpush.msk.msra.mxu0 %vm2981_vm0, %v60_v9 }
  0x81   :  { %2944 = vmatpush.msk.msra.mxu0 %vm2981_vm0, %v58_v12  ;;  %v314_v12 = vld [vmem:[%s5190_s3 + $0x28] sm:$0xff] }
  0x83   :  { %235 = vmatpush.msra.mxu0 %v42_v0 }
  0x84   :  { %v47_v15 = vpop.permute.xlu0 %46  ;;  %v45_v16 = vpop.permute.xlu1 %44 }
  0x85   :  { %236 = vmatpush.msra.mxu0 %v41_v2 }
  0x87   :  { %237 = vmatpush.msra.mxu0 %v40_v1  ;;  %v311_v1 = vld [vmem:[%s5190_s3 + $0x10] sm:$0xff] }
  0x88   :  { %2795 = vmatmul.msk.f32.gmra.mxu3 %vm325_vm3, %v311_v1  ;;  %2779 = vmatmul.msk.f32.gmra.mxu2 %vm325_vm3, %v311_v1 }
  0x89   :  { %238 = vmatpush.msra.mxu0 %v39_v3  ;;  %v312_v3 = vld [vmem:[%s5190_s3 + $0x18] sm:$0xff] }
  0x8b   :  { %2946 = vmatpush.msk.msra.mxu0 %vm2982_vm1, %v51_v13 }
  0x8c   :  { %v3482_v39 = vpop.permute.xlu1 %174  ;;  %v3491_v41 = vpop.permute.xlu0 %179 }
  0x8d   :  { %2948 = vmatpush.msk.msra.mxu0 %vm2982_vm1, %v49_v14 }
  0x8f   :  { %2950 = vmatpush.msk.msra.mxu0 %vm2982_vm1, %v47_v15 }
  0x90   :  { %2796 = vmatmul.msk.f32.gmra.mxu3 %vm325_vm3, %v312_v3  ;;  %2780 = vmatmul.msk.f32.gmra.mxu2 %vm325_vm3, %v312_v3 }
  0x91   :  { %2952 = vmatpush.msk.msra.mxu0 %vm2982_vm1, %v45_v16  ;;  %v315_v16 = vld [vmem:[%s5190_s3 + $0x30] sm:$0xff] }
  0x92   :  { %2761 = vmatmul.msk.f32.vlgmr.msra.gmra.mxu0 %vm202_vm2, %v3383_v17 }
  0x94   :  { %v3497_v46 = vpop.permute.xlu1 %164  ;;  %v3502_v51 = vpop.permute.xlu0 %189 }
  0x98   :  { %2797 = vmatmul.msk.f32.gmra.mxu3 %vm325_vm3, %v313_v8  ;;  %2781 = vmatmul.msk.f32.gmra.mxu2 %vm325_vm3, %v313_v8 }
  0x9a   :  { %2762 = vmatmul.msk.f32.gmra.mxu0 %vm202_vm2, %v3398_v20 }
  0x9c   :  { %v3505_v54 = vpop.permute.xlu0 %194 }
  0xa0   :  { %2798 = vmatmul.msk.f32.gmra.mxu3 %vm325_vm3, %v314_v12  ;;  %2782 = vmatmul.msk.f32.gmra.mxu2 %vm325_vm3, %v314_v12 }
  0xa2   :  { %2763 = vmatmul.msk.f32.gmra.mxu0 %vm202_vm2, %v3411_v23 }
  0xa8   :  { %2799 = vmatmul.msk.f32.gmra.mxu3 %vm325_vm3, %v315_v16  ;;  %2783 = vmatmul.msk.f32.gmra.mxu2 %vm325_vm3, %v315_v16 }
  0xaa   :  { %2764 = vmatmul.msk.f32.gmra.mxu0 %vm202_vm2, %v3421_v25 }
  0xb0   :  { %2800 = vmatmul.msk.f32.gmra.mxu3 %vm325_vm3, %v316_v22  ;;  %2784 = vmatmul.msk.f32.gmra.mxu2 %vm325_vm3, %v316_v22 }
  0xb2   :  { %2765 = vmatmul.msk.f32.gmra.mxu0 %vm202_vm2, %v3428_v26 }
  0xba   :  { %2766 = vmatmul.msk.f32.gmra.mxu0 %vm202_vm2, %v3435_v27 }
  0xc2   :  { %2767 = vmatmul.msk.f32.gmra.mxu0 %vm202_vm2, %v3442_v28 }
  0xca   :  { %2768 = vmatmul.msk.f32.gmra.mxu0 %vm202_vm2, %v3487_v40 }
 0x10f   :  { %v244_v34 = vpop.f32.mrf.mxu0 }
 0x110   :  { %v245_v48 = vadd.f32 %v244_v34, %v3497_v46 }
 0x117   :  { %v247_v36 = vpop.f32.mrf.mxu0 }
 0x118   :  { %v248_v47 = vadd.f32 %v247_v36, %v3494_v44 }
 0x11f   :  { %v250_v38 = vpop.f32.mrf.mxu0 }
 0x120   :  { %v251_v45 = vadd.f32 %v250_v38, %v3482_v39  ;;  %v317_v38 = vld [vmem:[%s5190_s3 + $0x40] sm:$0xff] }
 0x121   :  { %2801 = vmatmul.msk.f32.gmra.mxu3 %vm325_vm3, %v317_v38  ;;  %2785 = vmatmul.msk.f32.gmra.mxu2 %vm325_vm3, %v317_v38 }
 0x127   :  { %v253_v42 = vpop.f32.mrf.mxu0 }
 0x128   :  { %v254_v43 = vadd.f32 %v253_v42, %v3491_v41 }
 0x12a   :  { %860 = vmatpush.msrb.mxu0 %v254_v43  ;;  %2973 = vmatpush.msra.mxu3 %v254_v43 }
 0x12c   :  { %861 = vmatpush.msrb.mxu0 %v251_v45  ;;  %2974 = vmatpush.msra.mxu3 %v251_v45 }
 0x12e   :  { %862 = vmatpush.msrb.mxu0 %v248_v47  ;;  %2975 = vmatpush.msra.mxu3 %v248_v47  ;;  %v318_v47 = vld [vmem:[%s5190_s3 + $0x48] sm:$0xff] }
 0x12f   :  { %v256_v49 = vpop.f32.mrf.mxu0  ;;  %2802 = vmatmul.msk.f32.gmra.mxu3 %vm325_vm3, %v318_v47  ;;  %2786 = vmatmul.msk.f32.gmra.mxu2 %vm325_vm3, %v318_v47 }
 0x130   :  { %v257_v50 = vadd.f32 %v256_v49, %v3480_v37  ;;  %863 = vmatpush.msrb.mxu0 %v245_v48  ;;  %2976 = vmatpush.msra.mxu3 %v245_v48 }
 0x132   :  { %528 = vxpose.xlu2.b32.start.end [1/1] (short) %v257_v50, 128 }
 0x137   :  { %v259_v52 = vpop.f32.mrf.mxu0 }
 0x138   :  { %v260_v53 = vadd.f32 %v259_v52, %v3502_v51  ;;  %v319_v52 = vld [vmem:[%s5190_s3 + $0x50] sm:$0xff]  ;;  %s3305_s3 = smov 8  }
 0x139   :  { %2803 = vmatmul.msk.f32.gmra.mxu3 %vm325_vm3, %v319_v52  ;;  %2787 = vmatmul.msk.f32.gmra.mxu2 %vm325_vm3, %v319_v52 }
 0x13a   :  { %561 = vxpose.xlu1.b32.end [2/2] (short) %v260_v53, 128  ;;  %v161_v53 = vld [vmem:[%s5189_s2 + $0x38] sm:$0xff]  ;;  %s3304_s2 = smov 128  }
 0x13f   :  { %v262_v55 = vpop.f32.mrf.mxu0 }
 0x140   :  { %v263_v56 = vadd.f32 %v262_v55, %v3505_v54 }
 0x141   :  { %2804 = vmatmul.msk.f32.gmra.mxu3 %vm325_vm3, %v320_v61  ;;  %2788 = vmatmul.msk.f32.gmra.mxu2 %vm325_vm3, %v320_v61 }
 0x142   :  { %594 = vxpose.xlu0.b32.end [3/3] (short) %v263_v56, 128 }
 0x149   :  { %2805 = vmatmul.msk.f32.gmra.mxu3 %vm325_vm3, %v3472_v33  ;;  %v265_v33 = vpop.f32.mrf.mxu0 }
 0x151   :  { %2806 = vmatmul.msk.f32.gmra.mxu3 %vm325_vm3, %v3511_v57 }
 0x159   :  { %2807 = vmatmul.msk.f32.gmra.mxu3 %vm325_vm3, %v3518_v58 }
 0x161   :  { %2808 = vmatmul.msk.f32.gmra.mxu3 %vm325_vm3, %v3525_v59 }
 0x1cb   :  { %v544_v60 = vpop.trf.xlu2 }
 0x1cc   :  { %2809 = vmatmul.msk.f32.vlgmr.msrb.gmra.mxu0 %vm325_vm3, %v544_v60 }
 0x1d3   :  { %v545_v62 = vpop.trf.xlu2 }
 0x1d4   :  { %2810 = vmatmul.msk.f32.gmra.mxu0 %vm325_vm3, %v545_v62 }
 0x1d6   :  { %v3551_v4 = vpop.trf.xlu1  ;;  %v3553_v6 = vpop.trf.xlu0 }
 0x1db   :  { %v546_v0 = vpop.trf.xlu2 }
 0x1dc   :  { %2811 = vmatmul.msk.f32.gmra.mxu0 %vm325_vm3, %v546_v0 }
 0x1de   :  { %v3563_v9 = vpop.trf.xlu1  ;;  %v3565_v10 = vpop.trf.xlu0 }
 0x1e3   :  { %v547_v2 = vpop.trf.xlu2 }
 0x1e4   :  { %2812 = vmatmul.msk.f32.gmra.mxu0 %vm325_vm3, %v547_v2 }
 0x1e6   :  { %v3573_v13 = vpop.trf.xlu1  ;;  %v3575_v14 = vpop.trf.xlu0 }
 0x1eb   :  { %v548_v7 = vpop.trf.xlu2 }
 0x1ec   :  { %2813 = vmatmul.msk.f32.gmra.mxu0 %vm325_vm3, %v548_v7 }
 0x1ee   :  { %v3583_v18 = vpop.trf.xlu1  ;;  %v3585_v19 = vpop.trf.xlu0 }
 0x1f3   :  { %v549_v11 = vpop.trf.xlu2 }
 0x1f4   :  { %2814 = vmatmul.msk.f32.gmra.mxu0 %vm325_vm3, %v549_v11 }
 0x1f6   :  { %v3595_v24 = vpop.trf.xlu1  ;;  %v3597_v34 = vpop.trf.xlu0 }
 0x1fb   :  { %v550_v15 = vpop.trf.xlu2 }
 0x1fc   :  { %2815 = vmatmul.msk.f32.gmra.mxu0 %vm325_vm3, %v550_v15 }
 0x1fe   :  { %v3607_v42 = vpop.trf.xlu1  ;;  %v3609_v43 = vpop.trf.xlu0 }
 0x203   :  { %v551_v21 = vpop.trf.xlu2 }
 0x204   :  { %2816 = vmatmul.msk.f32.gmra.mxu0 %vm325_vm3, %v551_v21  ;;  %102 = vrot.lane.b32.xlu1 %v3454_v30, %s3299_s22 }
 0x206   :  { %v3623_v48 = vpop.trf.xlu1  ;;  %v3625_v49 = vpop.trf.xlu0 }
 0x20b   :  { %v552_v36 = vpop.trf.xlu2 }
 0x20c   :  { %2817 = vmatmul.msk.f32.gmra.mxu0 %vm325_vm3, %v552_v36  ;;  %92 = vrot.lane.b32.xlu1 %v3449_v29, %s3300_s23 }
 0x20e   :  { %v3638_v55 = vpop.trf.xlu1  ;;  %v3640_v56 = vpop.trf.xlu0 }
 0x213   :  { %v553_v45 = vpop.trf.xlu2  ;;  %104 = vrot.lane.b32.xlu2 %v3449_v29, %s3299_s22 }
 0x214   :  { %2818 = vmatmul.msk.f32.gmra.mxu0 %vm325_vm3, %v553_v45  ;;  %88 = vrot.lane.b32.xlu1 %v3461_v31, %s3300_s23 }
 0x216   :  { %v3650_v62 = vpop.trf.xlu1  ;;  %v3652_v63 = vpop.trf.xlu0 }
 0x218   :  { %100 = vrot.lane.b32.xlu0 %v3461_v31, %s3299_s22 }
 0x21b   :  { %v554_v50 = vpop.trf.xlu2  ;;  %98 = vrot.lane.b32.xlu2 %v3467_v32, %s3299_s22 }
 0x21c   :  { %2819 = vmatmul.msk.f32.gmra.mxu0 %vm325_vm3, %v554_v50 }
 0x21e   :  { %v3659_v1 = vpop.trf.xlu1  ;;  %v3661_v2 = vpop.trf.xlu0 }
 0x220   :  { %199 = vperm.xlu0 %2991, %v161_v53  }
 0x223   :  { %v555_v60 = vpop.trf.xlu2  ;;  %90 = vrot.lane.b32.xlu2 %v3454_v30, %s3300_s23 }
 0x224   :  { %2820 = vmatmul.msk.f32.gmra.mxu0 %vm325_vm3, %v555_v60 }
 0x226   :  { %v3666_v7 = vpop.trf.xlu1  ;;  %v3668_v8 = vpop.trf.xlu0 }
 0x22b   :  { %v556_v0 = vpop.trf.xlu2  ;;  %86 = vrot.lane.b32.xlu2 %v3467_v32, %s3300_s23 }
 0x22c   :  { %2821 = vmatmul.msk.f32.gmra.mxu0 %vm325_vm3, %v556_v0 }
 0x22e   :  { %v3675_v15 = vpop.trf.xlu1  ;;  %v619_v16 = vpop.trf.xlu0 }
 0x22f   :  { %2852 = vmatmul.msk.f32.vlgmr.msra.gmra.mxu3 %vm325_vm3, %v619_v16 }
 0x233   :  { %v557_v3 = vpop.trf.xlu2 }
 0x234   :  { %2822 = vmatmul.msk.f32.gmra.mxu0 %vm325_vm3, %v557_v3 }
 0x236   :  { %v3685_v58 = vpop.trf.xlu1  ;;  %v620_v21 = vpop.trf.xlu0 }
 0x237   :  { %2853 = vmatmul.msk.f32.gmra.mxu3 %vm325_vm3, %v620_v21 }
 0x23b   :  { %v558_v11 = vpop.trf.xlu2 }
 0x23c   :  { %2823 = vmatmul.msk.f32.gmra.mxu0 %vm325_vm3, %v558_v11 }
 0x23e   :  { %v589_v59 = vpop.trf.xlu1  ;;  %v621_v36 = vpop.trf.xlu0 }
 0x23f   :  { %2854 = vmatmul.msk.f32.gmra.mxu3 %vm325_vm3, %v621_v36 }
 0x242   :  { %624 = vxpose.xlu0.b32.start [1/4] (short) %v5193_v35, 128 }
 0x243   :  { %v559_v12 = vpop.trf.xlu2 }
 0x244   :  { %2824 = vmatmul.msk.f32.gmra.mxu0 %vm325_vm3, %v559_v12 }
 0x246   :  { %v590_v45 = vpop.trf.xlu1  ;;  %v622_v47 = vpop.trf.xlu0 }
 0x247   :  { %2855 = vmatmul.msk.f32.gmra.mxu3 %vm325_vm3, %v622_v47 }
 0x249   :  { %v3679_v57 = vpop.f32.mrf.mxu0 }
 0x24a   :  { %625 = vxpose.xlu0.b32.cont [2/4] (short) %v5193_v35, 128 }
 0x24c   :  { %2825 = vmatmul.msk.f32.gmra.mxu0 %vm325_vm3, %v3551_v4 }
 0x24e   :  { %v3709_v50 = vpop.trf.xlu1  ;;  %v623_v52 = vpop.trf.xlu0 }
 0x251   :  { %v3687_v22 = vpop.f32.mrf.mxu0  ;;  %1717 = vxpose.xlu2.b32.start [1/3] (short) %v5193_v35, 128 }
 0x252   :  { %626 = vxpose.xlu0.b32.cont [3/4] (short) %v5193_v35, 128 }
 0x254   :  { %2826 = vmatmul.msk.f32.gmra.mxu0 %vm325_vm3, %v3563_v9 }
 0x259   :  { %v3694_v38 = vpop.f32.mrf.mxu0  ;;  %1718 = vxpose.xlu2.b32.cont [2/3] (short) %v5193_v35, 128 }
 0x25c   :  { %2827 = vmatmul.msk.f32.gmra.mxu0 %vm325_vm3, %v3573_v13  ;;  %v3711_v13 = vpop.f32.mrf.mxu3  ;;  %2856 = vmatmul.msk.f32.gmra.mxu3 %vm325_vm3, %v623_v52 }
 0x261   :  { %v3700_v4 = vpop.f32.mrf.mxu0 }
 0x264   :  { %2828 = vmatmul.msk.f32.gmra.mxu0 %vm325_vm3, %v3583_v18 }
 0x269   :  { %v3705_v9 = vpop.f32.mrf.mxu0 }
 0x26c   :  { %2829 = vmatmul.msk.f32.gmra.mxu0 %vm325_vm3, %v3595_v24 }
 0x26d   :  { %v105_v53 = vpop.permute.xlu2 %104 }
 0x26e   :  { %2954 = vmatpush.msk.msra.mxu1 %vm2981_vm0, %v105_v53 }
 0x271   :  { %v3716_v60 = vpop.f32.mrf.mxu0 }
 0x274   :  { %2830 = vmatmul.msk.f32.gmra.mxu0 %vm325_vm3, %v3607_v42 }
 0x275   :  { %v99_v0 = vpop.permute.xlu2 %98 }
 0x276   :  { %v103_v18 = vpop.permute.xlu1 %102 }
 0x277   :  { %2956 = vmatpush.msk.msra.mxu1 %vm2981_vm0, %v103_v18 }
 0x279   :  { %v3722_v24 = vpop.f32.mrf.mxu0 }
 0x27c   :  { %2831 = vmatmul.msk.f32.gmra.mxu0 %vm325_vm3, %v3623_v48 }
 0x27d   :  { %v91_v48 = vpop.permute.xlu2 %90 }
 0x27e   :  { %v93_v42 = vpop.permute.xlu1 %92 }
 0x281   :  { %v3726_v61 = vpop.f32.mrf.mxu0 }
 0x284   :  { %2832 = vmatmul.msk.f32.gmra.mxu0 %vm325_vm3, %v3638_v55 }
 0x289   :  { %v3730_v3 = vpop.f32.mrf.mxu0 }
 0x28a   :  { %v101_v11 = vpop.permute.xlu0 %100 }
 0x28b   :  { %2958 = vmatpush.msk.msra.mxu1 %vm2981_vm0, %v101_v11 }
 0x28c   :  { %2833 = vmatmul.msk.f32.gmra.mxu0 %vm325_vm3, %v3650_v62  ;;  %v87_v62 = vpop.permute.xlu2 %86 }
 0x28d   :  { %2960 = vmatpush.msk.msra.mxu1 %vm2981_vm0, %v99_v0 }
 0x28f   :  { %276 = vmatpush.msra.mxu1 %v3449_v29  ;;  %v89_v29 = vpop.permute.xlu1 %88 }
 0x291   :  { %277 = vmatpush.msra.mxu1 %v3454_v30  ;;  %v3740_v55 = vpop.f32.mrf.mxu0 }
 0x292   :  { %v3742_v12 = vpop.permute.xlu0 %199 }
 0x293   :  { %v266_v16 = vadd.f32 %v265_v33, %v3742_v12  ;;  %278 = vmatpush.msra.mxu1 %v3461_v31  ;;  %v1059_v33 = vmax.f32 %v3694_v38, %v3722_v24 }
 0x294   :  { %2834 = vmatmul.msk.f32.gmra.mxu0 %vm325_vm3, %v3659_v1  ;;  %v3777_v1 = vpop.f32.mrf.mxu3 }
 0x295   :  { %627 = vxpose.xlu0.b32.end [4/4] (short) %v266_v16, 128  ;;  %279 = vmatpush.msra.mxu1 %v3467_v32 }
 0x297   :  { %2962 = vmatpush.msk.msra.mxu1 %vm2982_vm1, %v93_v42 }
 0x299   :  { %2964 = vmatpush.msk.msra.mxu1 %vm2982_vm1, %v91_v48  ;;  %v3753_v30 = vpop.f32.mrf.mxu0 }
 0x29a   :  { %v1063_v21 = vmax.f32 %v1059_v33, %v3753_v30 }
 0x29b   :  { %2966 = vmatpush.msk.msra.mxu1 %vm2982_vm1, %v89_v29 }
 0x29c   :  { %2835 = vmatmul.msk.f32.gmra.mxu0 %vm325_vm3, %v3666_v7  ;;  %v3787_v7 = vpop.f32.mrf.mxu3 }
 0x29d   :  { %2968 = vmatpush.msk.msra.mxu1 %vm2982_vm1, %v87_v62 }
 0x29e   :  { %2769 = vmatmul.msk.f32.vlgmr.msra.gmra.mxu1 %vm202_vm2, %v3383_v17 }
 0x2a1   :  { %v3763_v31 = vpop.f32.mrf.mxu0 }
 0x2a4   :  { %2836 = vmatmul.msk.f32.gmra.mxu0 %vm325_vm3, %v3675_v15  ;;  %v1060_v15 = vmax.f32 %v3700_v4, %v3726_v61  ;;  %v3811_v11 = vpop.f32.mrf.mxu3 }
 0x2a6   :  { %2770 = vmatmul.msk.f32.gmra.mxu1 %vm202_vm2, %v3398_v20  ;;  %v1058_v20 = vmax.f32 %v3687_v22, %v3716_v60 }
 0x2a9   :  { %v3769_v32 = vpop.f32.mrf.mxu0 }
 0x2ac   :  { %2837 = vmatmul.msk.f32.gmra.mxu0 %vm325_vm3, %v3685_v58 }
 0x2ae   :  { %2771 = vmatmul.msk.f32.gmra.mxu1 %vm202_vm2, %v3411_v23  ;;  %v1057_v23 = vmax.f32 %v3679_v57, %v3705_v9 }
 0x2b0   :  { %v1061_v58 = vmax.f32 %v1057_v23, %v3730_v3  ;;  %v3821_v23 = vpop.f32.mrf.mxu3 }
 0x2b1   :  { %v3775_v5 = vpop.f32.mrf.mxu0 }
 0x2b2   :  { %v1065_v47 = vmax.f32 %v1061_v58, %v3769_v32 }
 0x2b4   :  { %2838 = vmatmul.msk.f32.gmra.mxu0 %vm325_vm3, %v589_v59  ;;  %v1064_v59 = vmax.f32 %v1060_v15, %v3763_v31 }
 0x2b6   :  { %2772 = vmatmul.msk.f32.gmra.mxu1 %vm202_vm2, %v3421_v25  ;;  %v1062_v25 = vmax.f32 %v1058_v20, %v3740_v55 }
 0x2b8   :  { %v1066_v36 = vmax.f32 %v1062_v25, %v3775_v5 }
 0x2b9   :  { %v3782_v17 = vpop.f32.mrf.mxu0 }
 0x2ba   :  { %v1067_v52 = vmax.f32 %v1063_v21, %v3782_v17  ;;  %v1069_v18 = vmax.f32 %v1065_v47, %v1066_v36 }
 0x2bc   :  { %2839 = vmatmul.msk.f32.gmra.mxu0 %vm325_vm3, %v590_v45 }
 0x2be   :  { %2773 = vmatmul.msk.f32.gmra.mxu1 %vm202_vm2, %v3428_v26 }
 0x2c1   :  { %v3802_v45 = vpop.f32.mrf.mxu0 }
 0x2c2   :  { %v1068_v53 = vmax.f32 %v1064_v59, %v3802_v45 }
 0x2c4   :  { %v1070_v0 = vmax.f32 %v1067_v52, %v1068_v53  ;;  %2840 = vmatmul.msk.f32.gmra.mxu0 %vm325_vm3, %v3709_v50 }
 0x2c6   :  { %v1071_v26 = vmax.f32 %v1069_v18, %v1070_v0  ;;  %2774 = vmatmul.msk.f32.gmra.mxu1 %vm202_vm2, %v3435_v27 }
 0x2c8   :  { %v1072_v42 = vrot.slane %v1071_v26, 4 }
 0x2c9   :  { %v3813_v48 = vpop.f32.mrf.mxu0 }
 0x2ca   :  { %v1073_v16 = vmax.f32 %v1071_v26, %v1072_v42 }
 0x2cc   :  { %v1074_v29 = vrot.slane %v1073_v16, 2  ;;  %2841 = vmatmul.msk.f32.gmra.mxu0 %vm325_vm3, %v3553_v6 }
 0x2ce   :  { %v1075_v62 = vmax.f32 %v1073_v16, %v1074_v29  ;;  %2775 = vmatmul.msk.f32.gmra.mxu1 %vm202_vm2, %v3442_v28 }
 0x2d0   :  { %v1076_v20 = vrot.slane %v1075_v62, 1 }
 0x2d1   :  { %v3819_v50 = vpop.f32.mrf.mxu0 }
 0x2d2   :  { %v3823_v27 = vmax.f32 %v1075_v62, %v1076_v20 }
 0x2d4   :  { %v1078_v33 = vsub.f32 %v3679_v57, %v3823_v27  ;;  %v1079_v15 = vsub.f32 %v3687_v22, %v3823_v27  ;;  %2842 = vmatmul.msk.f32.gmra.mxu0 %vm325_vm3, %v3565_v10  ;;  %v1080_v6 = vsub.f32 %v3694_v38, %v3823_v27  ;;  %v1081_v28 = vsub.f32 %v3700_v4, %v3823_v27  ;;  %v3843_v38 = vpop.f32.mrf.mxu3 }
 0x2d5   :  { %v1082_v57 = vsub.f32 %v3705_v9, %v3823_v27  ;;  %v1083_v10 = vsub.f32 %v3716_v60, %v3823_v27  ;;  %v1085_v9 = vsub.f32 %v3726_v61, %v3823_v27  ;;  %v1086_v52 = vsub.f32 %v3730_v3, %v3823_v27 }
 0x2d6   :  { %2776 = vmatmul.msk.f32.gmra.mxu1 %vm202_vm2, %v3487_v40  ;;  %v1094_v25 = vmul.f32 1.442695, %v1078_v33  ;;  %v1096_v58 = vmul.f32 1.442695, %v1079_v15  ;;  %v1098_v21 = vmul.f32 1.442695, %v1080_v6  ;;  %v1084_v40 = vsub.f32 %v3722_v24, %v3823_v27 }
 0x2d7   :  { %v1100_v22 = vmul.f32 1.442695, %v1081_v28  ;;  %v1102_v4 = vmul.f32 1.442695, %v1082_v57  ;;  %v1104_v36 = vmul.f32 1.442695, %v1083_v10  ;;  %v1087_v61 = vsub.f32 %v3740_v55, %v3823_v27 }
 0x2d8   :  { %2993 = vpow2.f32 %v1094_v25  ;;  %v1106_v53 = vmul.f32 1.442695, %v1084_v40  ;;  %v1108_v0 = vmul.f32 1.442695, %v1085_v9  ;;  %v1088_v42 = vsub.f32 %v3753_v30, %v3823_v27 }
 0x2d9   :  { %v3839_v59 = vpop.f32.mrf.mxu0  ;;  %2995 = vpow2.f32 %v1096_v58  ;;  %v1110_v16 = vmul.f32 1.442695, %v1086_v52  ;;  %v1089_v55 = vsub.f32 %v3763_v31, %v3823_v27  ;;  %v1112_v33 = vmul.f32 1.442695, %v1087_v61 }
 0x2da   :  { %2997 = vpow2.f32 %v1098_v21  ;;  %v1090_v30 = vsub.f32 %v3769_v32, %v3823_v27  ;;  %v1114_v6 = vmul.f32 1.442695, %v1088_v42  ;;  %v1091_v31 = vsub.f32 %v3775_v5, %v3823_v27 }
 0x2db   :  { %2999 = vpow2.f32 %v1100_v22  ;;  %v1116_v57 = vmul.f32 1.442695, %v1089_v55  ;;  %v1092_v32 = vsub.f32 %v3782_v17, %v3823_v27  ;;  %v1093_v5 = vsub.f32 %v3802_v45, %v3823_v27 }
 0x2dc   :  { %2843 = vmatmul.msk.f32.gmra.mxu0 %vm325_vm3, %v3575_v14  ;;  %3001 = vpow2.f32 %v1102_v4  ;;  %v3872_v29 = vpop.f32.mrf.mxu3  ;;  %v1118_v22 = vmul.f32 1.442695, %v1090_v30  ;;  %v1120_v9 = vmul.f32 1.442695, %v1091_v31 }
 0x2dd   :  { %3003 = vpow2.f32 %v1104_v36 }
 0x2de   :  { %v3851_v47 = vpop.eup %2993  ;;  %3005 = vpow2.f32 %v1106_v53  ;;  %v1122_v53 = vmul.f32 1.442695, %v1092_v32 }
 0x2df   :  { %v3853_v60 = vpop.eup %2995  ;;  %3007 = vpow2.f32 %v1108_v0  ;;  %v1124_v0 = vmul.f32 1.442695, %v1093_v5 }
 0x2e0   :  { %v1126_v24 = vadd.f32 %v3853_v60, %v3851_v47  ;;  %v3861_v18 = vpop.eup %2997  ;;  %3009 = vpow2.f32 %v1110_v16 }
 0x2e1   :  { %v3857_v14 = vpop.f32.mrf.mxu0  ;;  %v3868_v3 = vpop.eup %2999  ;;  %3011 = vpow2.f32 %v1112_v33 }
 0x2e2   :  { %v1127_v26 = vadd.f32 %v3861_v18, %v1126_v24  ;;  %v3875_v20 = vpop.eup %3001  ;;  %3013 = vpow2.f32 %v1114_v6 }
 0x2e3   :  { %v3880_v15 = vpop.eup %3003  ;;  %3015 = vpow2.f32 %v1116_v57 }
 0x2e4   :  { %2844 = vmatmul.msk.f32.gmra.mxu0 %vm325_vm3, %v3585_v19  ;;  %v1128_v62 = vadd.f32 %v3868_v3, %v1127_v26  ;;  %v3887_v58 = vpop.eup %3005  ;;  %v3903_v36 = vpop.f32.mrf.mxu3  ;;  %3017 = vpow2.f32 %v1118_v22 }
 0x2e5   :  { %v3894_v10 = vpop.eup %3007  ;;  %3019 = vpow2.f32 %v1120_v9 }
 0x2e6   :  { %v1129_v19 = vadd.f32 %v3875_v20, %v1128_v62  ;;  %v3899_v4 = vpop.eup %3009  ;;  %3021 = vpow2.f32 %v1122_v53 }
 0x2e7   :  { %v3906_v52 = vpop.eup %3011  ;;  %3023 = vpow2.f32 %v1124_v0 }
 0x2e8   :  { %v1130_v25 = vadd.f32 %v3880_v15, %v1129_v19  ;;  %v3014_v61 = vpop.eup %3013 }
 0x2e9   :  { %v3884_v28 = vpop.f32.mrf.mxu0  ;;  %v3016_v45 = vpop.eup %3015 }
 0x2ea   :  { %v1131_v21 = vadd.f32 %v3887_v58, %v1130_v25  ;;  %v3018_v42 = vpop.eup %3017 }
 0x2eb   :  { %v3020_v62 = vpop.eup %3019 }
 0x2ec   :  { %2845 = vmatmul.msk.f32.gmra.mxu0 %vm325_vm3, %v3597_v34  ;;  %v1132_v40 = vadd.f32 %v3894_v10, %v1131_v21  ;;  %v3915_v33 = vpop.f32.mrf.mxu3  ;;  %v3022_v30 = vpop.eup %3021 }
 0x2ed   :  { %5201 = vst [vmem:[#allocation7_spill] sm:$0xff] %v3915_v33  ;;  %v3024_v25 = vpop.eup %3023 }
 0x2ee   :  { %v1133_v34 = vadd.f32 %v3899_v4, %v1132_v40 }
 0x2f0   :  { %v1134_v24 = vadd.f32 %v3906_v52, %v1133_v34 }
 0x2f1   :  { %v3908_v17 = vpop.f32.mrf.mxu0 }
 0x2f2   :  { %v1135_v26 = vadd.f32 %v3014_v61, %v1134_v24 }
 0x2f4   :  { %2846 = vmatmul.msk.f32.gmra.mxu0 %vm325_vm3, %v3609_v43  ;;  %v1136_v27 = vadd.f32 %v3016_v45, %v1135_v26  ;;  %v3921_v32 = vpop.f32.mrf.mxu3 }
 0x2f5   :  { %5202 = vst [vmem:[#allocation8_spill] sm:$0xff] %v3921_v32 }
 0x2f6   :  { %v1137_v16 = vadd.f32 %v3018_v42, %v1136_v27 }
 0x2f8   :  { %v1138_v19 = vadd.f32 %v3020_v62, %v1137_v16 }
 0x2f9   :  { %v3913_v55 = vpop.f32.mrf.mxu0 }
 0x2fa   :  { %v1139_v6 = vadd.f32 %v3022_v30, %v1138_v19 }
 0x2fc   :  { %2847 = vmatmul.msk.f32.gmra.mxu0 %vm325_vm3, %v3625_v49  ;;  %v1140_v31 = vadd.f32 %v3024_v25, %v1139_v6  ;;  %v3929_v49 = vpop.f32.mrf.mxu3 }
 0x2fd   :  { %5203 = vst [vmem:[#allocation9_spill] sm:$0xff] %v3929_v49 }
 0x2fe   :  { %v1141_v43 = vrot.slane %v1140_v31, 4 }
 0x300   :  { %v1142_v21 = vadd.f32 %v1141_v43, %v1140_v31 }
 0x301   :  { %v3919_v57 = vpop.f32.mrf.mxu0 }
 0x302   :  { %v1143_v22 = vrot.slane %v1142_v21, 2 }
 0x304   :  { %2848 = vmatmul.msk.f32.gmra.mxu0 %vm325_vm3, %v3640_v56  ;;  %v1144_v40 = vadd.f32 %v1143_v22, %v1142_v21 }
 0x306   :  { %v1145_v5 = vrot.slane %v1144_v40, 1 }
 0x308   :  { %v1146_v34 = vadd.f32 %v1145_v5, %v1144_v40  ;;  %v391_v5 = vpop.f32.mrf.mxu2 }
 0x309   :  { %v3925_v9 = vpop.f32.mrf.mxu0 }
 0x30a   :  { %3025 = vrcp.f32 %v1146_v34 }
 0x30c   :  { %2849 = vmatmul.msk.f32.gmra.mxu0 %vm325_vm3, %v3652_v63 }
 0x310   :  { %v3026_v24 = vpop.eup %3025 }
 0x311   :  { %v3931_v53 = vpop.f32.mrf.mxu0  ;;  %v1163_v0 = vmul.f32 %v3026_v24, %v3024_v25  ;;  %v1160_v26 = vmul.f32 %v3026_v24, %v3018_v42  ;;  %v1159_v56 = vmul.f32 %v3026_v24, %v3016_v45  ;;  %v1162_v27 = vmul.f32 %v3026_v24, %v3022_v30  ;;  %v3941_v25 = vpop.f32.mrf.mxu3 }
 0x312   :  { %v1153_v16 = vmul.f32 %v3026_v24, %v3880_v15  ;;  %v1152_v19 = vmul.f32 %v3026_v24, %v3875_v20  ;;  %v1151_v6 = vmul.f32 %v3026_v24, %v3868_v3  ;;  %v1150_v63 = vmul.f32 %v3026_v24, %v3861_v18  ;;  %5204 = vst [vmem:[#allocation10_spill] sm:$0xff] %v3941_v25 }
 0x313   :  { %1505 = vmatpush.msrb.mxu1 %v1163_v0  ;;  %v1149_v31 = vmul.f32 %v3026_v24, %v3853_v60  ;;  %v1148_v43 = vmul.f32 %v3026_v24, %v3851_v47  ;;  %v1161_v42 = vmul.f32 %v3026_v24, %v3020_v62  ;;  %v1158_v3 = vmul.f32 %v3026_v24, %v3014_v61 }
 0x314   :  { %2850 = vmatmul.msk.f32.gmra.mxu0 %vm325_vm3, %v3661_v2  ;;  %v1157_v60 = vmul.f32 %v3026_v24, %v3906_v52  ;;  %v1156_v47 = vmul.f32 %v3026_v24, %v3899_v4  ;;  %v1155_v62 = vmul.f32 %v3026_v24, %v3894_v10 }
 0x315   :  { %1506 = vmatpush.msrb.mxu1 %v1162_v27  ;;  %v1164_v27 = vmax.f32 %v3813_v48, %v3884_v28 }
 0x317   :  { %1507 = vmatpush.msrb.mxu1 %v1161_v42 }
 0x319   :  { %v3943_v2 = vpop.f32.mrf.mxu0  ;;  %1508 = vmatpush.msrb.mxu1 %v1160_v26  ;;  %v3953_v15 = vpop.f32.mrf.mxu3  ;;  %v1165_v26 = vmax.f32 %v3819_v50, %v3908_v17 }
 0x31a   :  { %5205 = vst [vmem:[#allocation11_spill] sm:$0xff] %v3953_v15 }
 0x31b   :  { %v3945_v45 = vpop.f32.mrf.mxu1  ;;  %1509 = vmatpush.msrb.mxu1 %v1159_v56 }
 0x31c   :  { %2851 = vmatmul.msk.f32.gmra.mxu0 %vm325_vm3, %v3668_v8  ;;  %v1154_v8 = vmul.f32 %v3026_v24, %v3887_v58 }
 0x31d   :  { %1510 = vmatpush.msrb.mxu1 %v1158_v3  ;;  %v394_v3 = vpop.f32.mrf.mxu2 }
 0x31f   :  { %1511 = vmatpush.msrb.mxu1 %v1157_v60 }
 0x321   :  { %v640_v18 = vpop.trf.xlu0  ;;  %v3951_v20 = vpop.f32.mrf.mxu0  ;;  %1512 = vmatpush.msrb.mxu1 %v1156_v47 }
 0x322   :  { %2857 = vmatmul.msk.f32.gmra.mxu3 %vm325_vm3, %v640_v18  ;;  %v3965_v21 = vpop.f32.mrf.mxu3 }
 0x323   :  { %v3957_v30 = vpop.f32.mrf.mxu1  ;;  %1513 = vmatpush.msrb.mxu1 %v1155_v62  ;;  %5206 = vst [vmem:[#allocation12_spill] sm:$0xff] %v3965_v21 }
 0x325   :  { %1514 = vmatpush.msrb.mxu1 %v1154_v8 }
 0x327   :  { %1515 = vmatpush.msrb.mxu1 %v1153_v16  ;;  %v1166_v16 = vmax.f32 %v3839_v59, %v3913_v55 }
 0x329   :  { %v641_v52 = vpop.trf.xlu0  ;;  %v3960_v61 = vpop.f32.mrf.mxu0  ;;  %1516 = vmatpush.msrb.mxu1 %v1152_v19  ;;  %v1167_v19 = vmax.f32 %v3857_v14, %v3919_v57 }
 0x32a   :  { %2858 = vmatmul.msk.f32.gmra.mxu3 %vm325_vm3, %v641_v52  ;;  %v3972_v40 = vpop.f32.mrf.mxu3 }
 0x32b   :  { %v3963_v4 = vpop.f32.mrf.mxu1  ;;  %1517 = vmatpush.msrb.mxu1 %v1151_v6  ;;  %5207 = vst [vmem:[#allocation13_spill] sm:$0xff] %v3972_v40  ;;  %v1169_v6 = vmax.f32 %v1165_v26, %v3931_v53  ;;  %v397_v26 = vpop.f32.mrf.mxu2 }
 0x32d   :  { %1518 = vmatpush.msrb.mxu1 %v1150_v63 }
 0x32f   :  { %1519 = vmatpush.msrb.mxu1 %v1149_v31  ;;  %v1168_v31 = vmax.f32 %v1164_v27, %v3925_v9 }
 0x331   :  { %v642_v10 = vpop.trf.xlu0  ;;  %v3967_v22 = vpop.f32.mrf.mxu0  ;;  %1520 = vmatpush.msrb.mxu1 %v1148_v43  ;;  %v1170_v43 = vmax.f32 %v1166_v16, %v3943_v2  ;;  %v1172_v18 = vmax.f32 %v1168_v31, %v3960_v61 }
 0x332   :  { %2859 = vmatmul.msk.f32.gmra.mxu3 %vm325_vm3, %v642_v10  ;;  %1521 = vmatmul.f32.vlgmr.msrb.gmra.mxu1 %v391_v5  ;;  %v3987_v63 = vpop.f32.mrf.mxu3  ;;  %v1173_v42 = vmax.f32 %v1169_v6, %v3967_v22 }
 0x333   :  { %v3970_v58 = vpop.f32.mrf.mxu1  ;;  %5208 = vst [vmem:[#allocation14_spill] sm:$0xff] %v3987_v63 }
 0x334   :  { %v1176_v10 = vmax.f32 %v1172_v18, %v1173_v42 }
 0x339   :  { %v643_v34 = vpop.trf.xlu0  ;;  %v3974_v24 = vpop.f32.mrf.mxu0 }
 0x33a   :  { %2860 = vmatmul.msk.f32.gmra.mxu3 %vm325_vm3, %v643_v34  ;;  %1524 = vmatmul.f32.gmra.mxu1 %v394_v3  ;;  %v1174_v62 = vmax.f32 %v1170_v43, %v3974_v24  ;;  %v4003_v16 = vpop.f32.mrf.mxu3  ;;  %v400_v3 = vpop.f32.mrf.mxu2 }
 0x33b   :  { %v297_v0 = vpop.f32.mrf.mxu1  ;;  %5209 = vst [vmem:[#allocation15_spill] sm:$0xff] %v4003_v16 }
 0x33c   :  { %v298_v56 = vadd.f32 %v297_v0, %v3480_v37  ;;  %v1171_v37 = vmax.f32 %v1167_v19, %v3951_v20 }
 0x33e   :  { %1653 = vxpose.xlu1.b32.start.end [1/1] (short) %v298_v56, 128 }
 0x341   :  { %v644_v60 = vpop.trf.xlu0  ;;  %v3993_v47 = vpop.f32.mrf.mxu0 }
 0x342   :  { %v1175_v8 = vmax.f32 %v1171_v37, %v3993_v47  ;;  %2861 = vmatmul.msk.f32.gmra.mxu3 %vm325_vm3, %v644_v60  ;;  %1527 = vmatmul.f32.gmra.mxu1 %v397_v26 }
 0x343   :  { %v3999_v52 = vpop.f32.mrf.mxu1 }
 0x344   :  { %v1177_v5 = vmax.f32 %v1174_v62, %v1175_v8  ;;  %v4012_v8 = vpop.f32.mrf.mxu3 }
 0x345   :  { %5210 = vst [vmem:[#allocation16_spill] sm:$0xff] %v4012_v8 }
 0x346   :  { %v1178_v34 = vmax.f32 %v1176_v10, %v1177_v5 }
 0x348   :  { %v1179_v0 = vrot.slane %v1178_v34, 4 }
 0x349   :  { %v645_v56 = vpop.trf.xlu0  ;;  %v4001_v27 = vpop.f32.mrf.mxu0 }
 0x34a   :  { %v1180_v19 = vmax.f32 %v1178_v34, %v1179_v0  ;;  %2862 = vmatmul.msk.f32.gmra.mxu3 %vm325_vm3, %v645_v56  ;;  %1530 = vmatmul.f32.gmra.mxu1 %v400_v3 }
 0x34b   :  { %v303_v6 = vpop.f32.mrf.mxu1 }
 0x34c   :  { %v1181_v31 = vrot.slane %v1180_v19, 2  ;;  %v304_v43 = vadd.f32 %v303_v6, %v3505_v54 }
 0x34e   :  { %v1182_v37 = vmax.f32 %v1180_v19, %v1181_v31  ;;  %1719 = vxpose.xlu2.b32.end [3/3] (short) %v304_v43, 128  ;;  %v4031_v43 = vpop.f32.mrf.mxu3 }
 0x34f   :  { %5211 = vst [vmem:[#allocation17_spill] sm:$0xff] %v4031_v43 }
 0x350   :  { %v1183_v42 = vrot.slane %v1182_v37, 1 }
 0x351   :  { %v646_v60 = vpop.trf.xlu0  ;;  %v4007_v18 = vpop.f32.mrf.mxu0 }
 0x352   :  { %v4009_v62 = vmax.f32 %v1182_v37, %v1183_v42  ;;  %2863 = vmatmul.msk.f32.gmra.mxu3 %vm325_vm3, %v646_v60 }
 0x354   :  { %v1185_v10 = vsub.f32 %v3813_v48, %v4009_v62  ;;  %v1186_v54 = vsub.f32 %v3819_v50, %v4009_v62  ;;  %v1187_v5 = vsub.f32 %v3839_v59, %v4009_v62  ;;  %v1188_v34 = vsub.f32 %v3857_v14, %v4009_v62 }
 0x355   :  { %v1189_v56 = vsub.f32 %v3884_v28, %v4009_v62  ;;  %v1190_v48 = vsub.f32 %v3908_v17, %v4009_v62  ;;  %v1191_v59 = vsub.f32 %v3913_v55, %v4009_v62  ;;  %v1192_v28 = vsub.f32 %v3919_v57, %v4009_v62  ;;  %v504_v17 = vld [vmem:[%s5191_s4] sm:$0xff] }
 0x356   :  { %v1201_v0 = vmul.f32 1.442695, %v1185_v10  ;;  %v1203_v26 = vmul.f32 1.442695, %v1186_v54  ;;  %v1205_v19 = vmul.f32 1.442695, %v1187_v5  ;;  %v1193_v55 = vsub.f32 %v3925_v9, %v4009_v62 }
 0x357   :  { %v1207_v50 = vmul.f32 1.442695, %v1188_v34  ;;  %v1209_v14 = vmul.f32 1.442695, %v1189_v56  ;;  %v1211_v37 = vmul.f32 1.442695, %v1190_v48  ;;  %v1194_v34 = vsub.f32 %v3931_v53, %v4009_v62 }
 0x358   :  { %3027 = vpow2.f32 %v1201_v0  ;;  %v1213_v60 = vmul.f32 1.442695, %v1191_v59  ;;  %v1215_v0 = vmul.f32 1.442695, %v1192_v28  ;;  %v1195_v56 = vsub.f32 %v3943_v2, %v4009_v62  ;;  %v4063_v59 = vpop.f32.mrf.mxu3  ;;  %v507_v28 = vld [vmem:[%s5191_s4 + $0x18] sm:$0xff] }
 0x359   :  { %v647_v6 = vpop.trf.xlu0  ;;  %v4024_v31 = vpop.f32.mrf.mxu0  ;;  %3029 = vpow2.f32 %v1203_v26  ;;  %v1219_v53 = vmul.f32 1.442695, %v1194_v34  ;;  %5212 = vst [vmem:[#allocation18_spill] sm:$0xff] %v4063_v59 }
 0x35a   :  { %2864 = vmatmul.msk.f32.gmra.mxu3 %vm325_vm3, %v647_v6  ;;  %3031 = vpow2.f32 %v1205_v19  ;;  %v1217_v19 = vmul.f32 1.442695, %v1193_v55 }
 0x35b   :  { %3033 = vpow2.f32 %v1207_v50  ;;  %v1196_v50 = vsub.f32 %v3951_v20, %v4009_v62 }
 0x35c   :  { %3035 = vpow2.f32 %v1209_v14 }
 0x35d   :  { %3037 = vpow2.f32 %v1211_v37  ;;  %v1197_v37 = vsub.f32 %v3960_v61, %v4009_v62  ;;  %v1223_v34 = vmul.f32 1.442695, %v1196_v50 }
 0x35e   :  { %v4035_v42 = vpop.eup %3027  ;;  %3039 = vpow2.f32 %v1213_v60 }
 0x35f   :  { %v4040_v3 = vpop.eup %3029  ;;  %3041 = vpow2.f32 %v1215_v0 }
 0x360   :  { %v1233_v57 = vadd.f32 %v4040_v3, %v4035_v42  ;;  %v4049_v5 = vpop.eup %3031  ;;  %3043 = vpow2.f32 %v1217_v19 }
 0x361   :  { %v648_v10 = vpop.trf.xlu0  ;;  %v4044_v54 = vpop.f32.mrf.mxu0  ;;  %3045 = vpow2.f32 %v1219_v53 }
 0x362   :  { %2865 = vmatmul.msk.f32.gmra.mxu3 %vm325_vm3, %v648_v10  ;;  %v1234_v9 = vadd.f32 %v4049_v5, %v1233_v57  ;;  %v4054_v26 = vpop.eup %3033  ;;  %v1198_v57 = vsub.f32 %v3967_v22, %v4009_v62 }
 0x363   :  { %1487 = vperm.xlu0 %2991, %v504_v17   ;;  %v4059_v48 = vpop.eup %3035  ;;  %v1221_v17 = vmul.f32 1.442695, %v1195_v56  ;;  %v1225_v56 = vmul.f32 1.442695, %v1197_v37 }
 0x364   :  { %v1235_v6 = vadd.f32 %v4054_v26, %v1234_v9  ;;  %v4069_v2 = vpop.eup %3037  ;;  %v1199_v9 = vsub.f32 %v3974_v24, %v4009_v62  ;;  %v1227_v22 = vmul.f32 1.442695, %v1198_v57  ;;  %v4096_v24 = vpop.f32.mrf.mxu3 }
 0x365   :  { %v4077_v10 = vpop.eup %3039  ;;  %3047 = vpow2.f32 %v1221_v17 }
 0x366   :  { %v1236_v14 = vadd.f32 %v4059_v48, %v1235_v6  ;;  %v4082_v61 = vpop.eup %3041  ;;  %3049 = vpow2.f32 %v1223_v34 }
 0x367   :  { %v4087_v6 = vpop.eup %3043  ;;  %3051 = vpow2.f32 %v1225_v56 }
 0x368   :  { %v1237_v20 = vadd.f32 %v4069_v2, %v1236_v14  ;;  %v1200_v14 = vsub.f32 %v3993_v47, %v4009_v62  ;;  %v4092_v53 = vpop.eup %3045  ;;  %3053 = vpow2.f32 %v1227_v22 }
 0x369   :  { %v649_v55 = vpop.trf.xlu0  ;;  %v4073_v60 = vpop.f32.mrf.mxu0 }
 0x36a   :  { %2866 = vmatmul.msk.f32.gmra.mxu3 %vm325_vm3, %v649_v55  ;;  %v1238_v0 = vadd.f32 %v4077_v10, %v1237_v20  ;;  %v1231_v47 = vmul.f32 1.442695, %v1200_v14 }
 0x36b   :  { %1502 = vperm.xlu0 %2991, %v507_v28   ;;  %v1229_v28 = vmul.f32 1.442695, %v1199_v9  ;;  %v3048_v17 = vpop.eup %3047 }
 0x36c   :  { %v1239_v19 = vadd.f32 %v4082_v61, %v1238_v0  ;;  %v3050_v57 = vpop.eup %3049  ;;  %v4103_v43 = vpop.f32.mrf.mxu3 }
 0x36d   :  { %3055 = vpow2.f32 %v1229_v28  ;;  %v3052_v0 = vpop.eup %3051 }
 0x36e   :  { %v1240_v50 = vadd.f32 %v4087_v6, %v1239_v19  ;;  %3057 = vpow2.f32 %v1231_v47  ;;  %v3054_v9 = vpop.eup %3053 }
 0x370   :  { %v1241_v37 = vadd.f32 %v4092_v53, %v1240_v50 }
 0x371   :  { %v650_v55 = vpop.trf.xlu0  ;;  %v4094_v20 = vpop.f32.mrf.mxu0 }
 0x372   :  { %2867 = vmatmul.msk.f32.gmra.mxu3 %vm325_vm3, %v650_v55  ;;  %v1242_v62 = vadd.f32 %v3048_v17, %v1241_v37 }
 0x373   :  { %v3056_v50 = vpop.eup %3055 }
 0x374   :  { %v1243_v34 = vadd.f32 %v3050_v57, %v1242_v62  ;;  %v3058_v22 = vpop.eup %3057 }
 0x376   :  { %v1244_v56 = vadd.f32 %v3052_v0, %v1243_v34  ;;  %v4108_v34 = vpop.f32.mrf.mxu3 }
 0x378   :  { %v1245_v59 = vadd.f32 %v3054_v9, %v1244_v56 }
 0x379   :  { %v651_v19 = vpop.trf.xlu0  ;;  %v4100_v35 = vpop.f32.mrf.mxu0 }
 0x37a   :  { %2868 = vmatmul.msk.f32.gmra.mxu3 %vm325_vm3, %v651_v19  ;;  %v1246_v55 = vadd.f32 %v3056_v50, %v1245_v59 }
 0x37c   :  { %v1247_v14 = vadd.f32 %v3058_v22, %v1246_v55 }
 0x37e   :  { %v1248_v37 = vrot.slane %v1247_v14, 4  ;;  %v4113_v59 = vpop.f32.mrf.mxu3 }
 0x380   :  { %v1249_v62 = vadd.f32 %v1248_v37, %v1247_v14 }
 0x381   :  { %v652_v8 = vpop.trf.xlu0  ;;  %v4105_v28 = vpop.f32.mrf.mxu0 }
 0x382   :  { %2869 = vmatmul.msk.f32.gmra.mxu3 %vm325_vm3, %v652_v8  ;;  %v1250_v47 = vrot.slane %v1249_v62, 2 }
 0x384   :  { %v1251_v63 = vadd.f32 %v1250_v47, %v1249_v62  ;;  %v1272_v62 = vmax.f32 %v4007_v18, %v4094_v20  ;;  %v1274_v47 = vmax.f32 %v4044_v54, %v4105_v28 }
 0x386   :  { %v1252_v56 = vrot.slane %v1251_v63, 1 }
 0x388   :  { %v1253_v40 = vadd.f32 %v1252_v56, %v1251_v63 }
 0x389   :  { %v653_v16 = vpop.trf.xlu0  ;;  %v4110_v19 = vpop.f32.mrf.mxu0 }
 0x38a   :  { %2870 = vmatmul.msk.f32.gmra.mxu3 %vm325_vm3, %v653_v16  ;;  %3059 = vrcp.f32 %v1253_v40  ;;  %v1271_v40 = vmax.f32 %v4001_v27, %v4073_v60 }
 0x390   :  { %v3060_v14 = vpop.eup %3059 }
 0x391   :  { %v654_v55 = vpop.trf.xlu0  ;;  %v4115_v21 = vpop.f32.mrf.mxu0  ;;  %v1270_v8 = vmul.f32 %v3060_v14, %v3058_v22  ;;  %v1267_v37 = vmul.f32 %v3060_v14, %v3052_v0  ;;  %v1266_v63 = vmul.f32 %v3060_v14, %v3050_v57  ;;  %v1265_v56 = vmul.f32 %v3060_v14, %v3048_v17 }
 0x392   :  { %2871 = vmatmul.msk.f32.gmra.mxu3 %vm325_vm3, %v654_v55  ;;  %v1269_v16 = vmul.f32 %v3060_v14, %v3056_v50  ;;  %v1260_v15 = vmul.f32 %v3060_v14, %v4069_v2  ;;  %v1276_v25 = vmax.f32 %v1272_v62, %v4115_v21  ;;  %v1259_v22 = vmul.f32 %v3060_v14, %v4059_v48 }
 0x393   :  { %1534 = vmatpush.msra.mxu1 %v1270_v8  ;;  %v1258_v0 = vmul.f32 %v3060_v14, %v4054_v26  ;;  %v1257_v55 = vmul.f32 %v3060_v14, %v4049_v5  ;;  %v1268_v49 = vmul.f32 %v3060_v14, %v3054_v9  ;;  %v1256_v57 = vmul.f32 %v3060_v14, %v4040_v3  ;;  %v4140_v3 = vpop.f32.mrf.mxu3 }
 0x394   :  { %v1255_v17 = vmul.f32 %v3060_v14, %v4035_v42  ;;  %v1273_v8 = vmax.f32 %v4024_v31, %v4100_v35  ;;  %v1278_v50 = vmax.f32 %v1274_v47, %v4096_v24  ;;  %v1275_v2 = vmax.f32 %v1271_v40, %v4110_v19 }
 0x395   :  { %1535 = vmatpush.msra.mxu1 %v1269_v16  ;;  %v1280_v26 = vmax.f32 %v1276_v25, %v4108_v34  ;;  %v1264_v16 = vmul.f32 %v3060_v14, %v4092_v53  ;;  %v403_v53 = vpop.f32.mrf.mxu2 }
 0x396   :  { %v1282_v42 = vmax.f32 %v1278_v50, %v4140_v3  ;;  %v1279_v9 = vmax.f32 %v1275_v2, %v4103_v43  ;;  %v1261_v50 = vmul.f32 %v3060_v14, %v4077_v10 }
 0x397   :  { %1536 = vmatpush.msra.mxu1 %v1268_v49 }
 0x398   :  { %v1283_v49 = vmax.f32 %v1279_v9, %v1280_v26 }
 0x399   :  { %v655_v62 = vpop.trf.xlu0  ;;  %v4135_v48 = vpop.f32.mrf.mxu0  ;;  %1537 = vmatpush.msra.mxu1 %v1267_v37  ;;  %v1262_v37 = vmul.f32 %v3060_v14, %v4082_v61 }
 0x39a   :  { %v1277_v5 = vmax.f32 %v1273_v8, %v4135_v48  ;;  %2872 = vmatmul.msk.f32.gmra.mxu3 %vm325_vm3, %v655_v62  ;;  %v1263_v8 = vmul.f32 %v3060_v14, %v4087_v6 }
 0x39b   :  { %1538 = vmatpush.msra.mxu1 %v1266_v63 }
 0x39c   :  { %v1281_v47 = vmax.f32 %v1277_v5, %v4113_v59 }
 0x39d   :  { %1539 = vmatpush.msra.mxu1 %v1265_v56 }
 0x39e   :  { %v1284_v40 = vmax.f32 %v1281_v47, %v1282_v42 }
 0x39f   :  { %1540 = vmatpush.msra.mxu1 %v1264_v16 }
 0x3a0   :  { %v1285_v25 = vmax.f32 %v1283_v49, %v1284_v40 }
 0x3a1   :  { %1541 = vmatpush.msra.mxu1 %v1263_v8 }
 0x3a2   :  { %v1286_v62 = vrot.slane %v1285_v25, 4 }
 0x3a3   :  { %1542 = vmatpush.msra.mxu1 %v1262_v37 }
 0x3a4   :  { %v1287_v32 = vmax.f32 %v1285_v25, %v1286_v62  ;;  %v5213_v25 = vmov 0.0  }
 0x3a5   :  { %v4149_v2 = vpop.f32.mrf.mxu3  ;;  %1543 = vmatpush.msra.mxu1 %v1261_v50 }
 0x3a6   :  { %v1288_v63 = vrot.slane %v1287_v32, 2 }
 0x3a7   :  { %1544 = vmatpush.msra.mxu1 %v1260_v15 }
 0x3a8   :  { %v1289_v26 = vmax.f32 %v1287_v32, %v1288_v63 }
 0x3a9   :  { %1545 = vmatpush.msra.mxu1 %v1259_v22 }
 0x3aa   :  { %v1290_v56 = vrot.slane %v1289_v26, 1 }
 0x3ab   :  { %1546 = vmatpush.msra.mxu1 %v1258_v0 }
 0x3ac   :  { %v4151_v5 = vmax.f32 %v1289_v26, %v1290_v56 }
 0x3ad   :  { %v4153_v6 = vpop.f32.mrf.mxu3  ;;  %1547 = vmatpush.msra.mxu1 %v1257_v55  ;;  %v406_v55 = vpop.f32.mrf.mxu2 }
 0x3ae   :  { %v1292_v61 = vsub.f32 %v4001_v27, %v4151_v5  ;;  %v1293_v10 = vsub.f32 %v4007_v18, %v4151_v5  ;;  %v1294_v14 = vsub.f32 %v4024_v31, %v4151_v5  ;;  %v1295_v32 = vsub.f32 %v4044_v54, %v4151_v5 }
 0x3af   :  { %1548 = vmatpush.msra.mxu1 %v1256_v57  ;;  %v1296_v22 = vsub.f32 %v4073_v60, %v4151_v5  ;;  %v4167_v27 = vadd.f32 %v3970_v58, %v3491_v41  ;;  %v1297_v18 = vsub.f32 %v4094_v20, %v4151_v5  ;;  %v4173_v54 = vadd.f32 %v3963_v4, %v3482_v39 }
 0x3b0   :  { %v1308_v15 = vmul.f32 1.442695, %v1292_v61  ;;  %v1310_v0 = vmul.f32 1.442695, %v1293_v10  ;;  %v1312_v42 = vmul.f32 1.442695, %v1294_v14  ;;  %v1298_v41 = vsub.f32 %v4100_v35, %v4151_v5 }
 0x3b1   :  { %1549 = vmatpush.msra.mxu1 %v1255_v17  ;;  %v1314_v31 = vmul.f32 1.442695, %v1295_v32  ;;  %v1316_v58 = vmul.f32 1.442695, %v1296_v22  ;;  %v4182_v20 = vadd.f32 %v3957_v30, %v3494_v44  ;;  %v1299_v39 = vsub.f32 %v4105_v28, %v4151_v5 }
 0x3b2   :  { %3061 = vpow2.f32 %v1308_v15  ;;  %1550 = vmatmul.f32.vlgmr.msra.gmra.mxu1 %v403_v53  ;;  %v1318_v4 = vmul.f32 1.442695, %v1297_v18  ;;  %v4191_v17 = vadd.f32 %v3945_v45, %v3497_v46  ;;  %v1300_v44 = vsub.f32 %v4110_v19, %v4151_v5 }
 0x3b3   :  { %3063 = vpow2.f32 %v1310_v0  ;;  %1985 = vmatpush.msrb.mxu1 %v4167_v27  ;;  %v1320_v30 = vmul.f32 1.442695, %v1298_v41  ;;  %v1301_v46 = vsub.f32 %v4115_v21, %v4151_v5  ;;  %v1322_v45 = vmul.f32 1.442695, %v1299_v39 }
 0x3b4   :  { %3065 = vpow2.f32 %v1312_v42  ;;  %v1302_v40 = vsub.f32 %v4135_v48, %v4151_v5  ;;  %v1324_v16 = vmul.f32 1.442695, %v1300_v44  ;;  %v1303_v37 = vsub.f32 %v4096_v24, %v4151_v5 }
 0x3b5   :  { %v4176_v60 = vpop.f32.mrf.mxu3  ;;  %1986 = vmatpush.msrb.mxu1 %v4173_v54  ;;  %3067 = vpow2.f32 %v1314_v31  ;;  %v409_v8 = vpop.f32.mrf.mxu2  ;;  %v1326_v50 = vmul.f32 1.442695, %v1301_v46  ;;  %v1304_v48 = vsub.f32 %v4103_v43, %v4151_v5  ;;  %v301_v10 = vadd.f32 %v3999_v52, %v3502_v51 }
 0x3b6   :  { %3069 = vpow2.f32 %v1316_v58  ;;  %v1328_v56 = vmul.f32 1.442695, %v1302_v40  ;;  %v1305_v24 = vsub.f32 %v4108_v34, %v4151_v5  ;;  %v1330_v14 = vmul.f32 1.442695, %v1303_v37 }
 0x3b7   :  { %1987 = vmatpush.msrb.mxu1 %v4182_v20  ;;  %3071 = vpow2.f32 %v1318_v4  ;;  %v1306_v22 = vsub.f32 %v4113_v59, %v4151_v5  ;;  %v1332_v0 = vmul.f32 1.442695, %v1304_v48  ;;  %v1307_v42 = vsub.f32 %v4140_v3, %v4151_v5 }
 0x3b8   :  { %v4187_v57 = vpop.eup %3061  ;;  %3073 = vpow2.f32 %v1320_v30  ;;  %v1334_v34 = vmul.f32 1.442695, %v1305_v24 }
 0x3b9   :  { %v4194_v35 = vpop.eup %3063  ;;  %1988 = vmatpush.msrb.mxu1 %v4191_v17  ;;  %3075 = vpow2.f32 %v1322_v45  ;;  %v1336_v59 = vmul.f32 1.442695, %v1306_v22  ;;  %v1338_v39 = vmul.f32 1.442695, %v1307_v42 }
 0x3ba   :  { %v1340_v28 = vadd.f32 %v4194_v35, %v4187_v57  ;;  %v4201_v9 = vpop.eup %3065  ;;  %1553 = vmatmul.f32.gmra.mxu1 %v406_v55  ;;  %3077 = vpow2.f32 %v1324_v16 }
 0x3bb   :  { %v4208_v19 = vpop.eup %3067  ;;  %3079 = vpow2.f32 %v1326_v50 }
 0x3bc   :  { %v1341_v47 = vadd.f32 %v4201_v9, %v1340_v28  ;;  %v4215_v62 = vpop.eup %3069  ;;  %3081 = vpow2.f32 %v1328_v56  ;;  %v306_v28 = vpop.f32.mrf.mxu1 }
 0x3bd   :  { %v4206_v49 = vpop.f32.mrf.mxu3  ;;  %v4220_v26 = vpop.eup %3071  ;;  %3083 = vpow2.f32 %v1330_v14  ;;  %v307_v16 = vadd.f32 %v306_v28, %v3742_v12 }
 0x3be   :  { %1749 = vxpose.xlu2.b32.start [1/4] (short) %v5213_v25, 128  ;;  %1685 = vxpose.xlu1.b32.start [1/2] (short) %v5213_v25, 128  ;;  %v1342_v21 = vadd.f32 %v4208_v19, %v1341_v47  ;;  %v4225_v61 = vpop.eup %3073  ;;  %v412_v31 = vpop.f32.mrf.mxu2  ;;  %3085 = vpow2.f32 %v1332_v0 }
 0x3bf   :  { %v4234_v43 = vpop.eup %3075  ;;  %3087 = vpow2.f32 %v1334_v34 }
 0x3c0   :  { %v1343_v63 = vadd.f32 %v4215_v62, %v1342_v21  ;;  %v4240_v52 = vpop.eup %3077  ;;  %3089 = vpow2.f32 %v1336_v59 }
 0x3c1   :  { %v4245_v55 = vpop.eup %3079  ;;  %3091 = vpow2.f32 %v1338_v39 }
 0x3c2   :  { %v1344_v53 = vadd.f32 %v4220_v26, %v1343_v63  ;;  %1556 = vmatmul.f32.gmra.mxu1 %v409_v8  ;;  %v3082_v58 = vpop.eup %3081 }
 0x3c3   :  { %v3084_v30 = vpop.eup %3083 }
 0x3c4   :  { %v1345_v32 = vadd.f32 %v4225_v61, %v1344_v53  ;;  %v3086_v5 = vpop.eup %3085 }
 0x3c5   :  { %v4232_v15 = vpop.f32.mrf.mxu3  ;;  %v3088_v45 = vpop.eup %3087 }
 0x3c6   :  { %1750 = vxpose.xlu2.b32.cont [2/4] (short) %v5213_v25, 128  ;;  %1686 = vxpose.xlu1.b32.end [2/2] (short) %v301_v10, 128  ;;  %v1346_v51 = vadd.f32 %v4234_v43, %v1345_v32  ;;  %v3090_v40 = vpop.eup %3089 }
 0x3c7   :  { %v3092_v37 = vpop.eup %3091 }
 0x3c8   :  { %v1347_v18 = vadd.f32 %v4240_v52, %v1346_v51 }
 0x3ca   :  { %v1348_v41 = vadd.f32 %v4245_v55, %v1347_v18  ;;  %1559 = vmatmul.f32.gmra.mxu1 %v412_v31 }
 0x3cc   :  { %v1349_v4 = vadd.f32 %v3082_v58, %v1348_v41 }
 0x3cd   :  { %v4248_v44 = vpop.f32.mrf.mxu3 }
 0x3ce   :  { %1751 = vxpose.xlu2.b32.cont [3/4] (short) %v5213_v25, 128  ;;  %v1350_v3 = vadd.f32 %v3084_v30, %v1349_v4 }
 0x3d0   :  { %v1351_v46 = vadd.f32 %v3086_v5, %v1350_v3 }
 0x3d2   :  { %v1352_v47 = vadd.f32 %v3088_v45, %v1351_v46 }
 0x3d4   :  { %v1353_v21 = vadd.f32 %v3090_v40, %v1352_v47 }
 0x3d5   :  { %v4252_v8 = vpop.f32.mrf.mxu3 }
 0x3d6   :  { %1752 = vxpose.xlu2.b32.end [4/4] (short) %v307_v16, 128  ;;  %v1354_v50 = vadd.f32 %v3092_v37, %v1353_v21 }
 0x3d7   :  { %v4256_v10 = vpop.trf.xlu2 }
 0x3d8   :  { %v1355_v63 = vrot.slane %v1354_v50, 4 }
 0x3da   :  { %v1356_v48 = vadd.f32 %v1355_v63, %v1354_v50  ;;  %v1378_v50 = vmax.f32 %v4149_v2, %v4232_v15  ;;  %v1379_v63 = vmax.f32 %v4153_v6, %v4248_v44 }
 0x3dc   :  { %v1357_v25 = vrot.slane %v1356_v48, 2 }
 0x3dd   :  { %v4254_v56 = vpop.f32.mrf.mxu3 }
 0x3de   :  { %v1358_v53 = vadd.f32 %v1357_v25, %v1356_v48 }
 0x3df   :  { %v4261_v0 = vpop.trf.xlu2 }
 0x3e0   :  { %v1359_v24 = vrot.slane %v1358_v53, 1 }
 0x3e2   :  { %v1669_v14 = vpop.trf.xlu1  ;;  %v1360_v32 = vadd.f32 %v1359_v24, %v1358_v53  ;;  %v4303_v53 = vpop.f32.mrf.mxu1  ;;  %v1381_v24 = vmax.f32 %v4206_v49, %v4254_v56 }
 0x3e3   :  { %2873 = vmatmul.msk.f32.vlgmr.msrb.gmra.mxu1 %vm325_vm3, %v1669_v14 }
 0x3e4   :  { %3093 = vrcp.f32 %v1360_v32 }
 0x3e5   :  { %v4259_v12 = vpop.f32.mrf.mxu3 }
 0x3ea   :  { %v1670_v22 = vpop.trf.xlu1  ;;  %v3094_v51 = vpop.eup %3093 }
 0x3eb   :  { %2874 = vmatmul.msk.f32.gmra.mxu1 %vm325_vm3, %v1670_v22  ;;  %v1377_v34 = vmul.f32 %v3094_v51, %v3092_v37  ;;  %v1376_v18 = vmul.f32 %v3094_v51, %v3090_v40  ;;  %v1367_v31 = vmul.f32 %v3094_v51, %v4220_v26  ;;  %v1366_v59 = vmul.f32 %v3094_v51, %v4215_v62  ;;  %v4273_v26 = vpop.trf.xlu2 }
 0x3ec   :  { %v1365_v41 = vmul.f32 %v3094_v51, %v4208_v19  ;;  %v1364_v39 = vmul.f32 %v3094_v51, %v4201_v9  ;;  %v1363_v4 = vmul.f32 %v3094_v51, %v4194_v35  ;;  %v1375_v3 = vmul.f32 %v3094_v51, %v3088_v45 }
 0x3ed   :  { %v4264_v42 = vpop.f32.mrf.mxu3  ;;  %1563 = vmatpush.msrb.mxu2 %v1377_v34  ;;  %v1362_v28 = vmul.f32 %v3094_v51, %v4187_v57  ;;  %v1374_v47 = vmul.f32 %v3094_v51, %v3086_v5  ;;  %v1373_v40 = vmul.f32 %v3094_v51, %v3084_v30  ;;  %v1372_v19 = vmul.f32 %v3094_v51, %v3082_v58 }
 0x3ee   :  { %v1371_v35 = vmul.f32 %v3094_v51, %v4245_v55  ;;  %v1370_v57 = vmul.f32 %v3094_v51, %v4240_v52  ;;  %v1369_v5 = vmul.f32 %v3094_v51, %v4234_v43  ;;  %v1368_v30 = vmul.f32 %v3094_v51, %v4225_v61  ;;  %v415_v55 = vpop.f32.mrf.mxu2 }
 0x3ef   :  { %1564 = vmatpush.msrb.mxu2 %v1376_v18  ;;  %v1383_v14 = vmax.f32 %v1379_v63, %v4264_v42 }
 0x3f1   :  { %1565 = vmatpush.msrb.mxu2 %v1375_v3 }
 0x3f2   :  { %v1671_v46 = vpop.trf.xlu1 }
 0x3f3   :  { %2875 = vmatmul.msk.f32.gmra.mxu1 %vm325_vm3, %v1671_v46  ;;  %1566 = vmatpush.msrb.mxu2 %v1374_v47  ;;  %v4284_v16 = vpop.trf.xlu2 }
 0x3f5   :  { %v4275_v62 = vpop.f32.mrf.mxu3  ;;  %1567 = vmatpush.msrb.mxu2 %v1373_v40 }
 0x3f6   :  { %v418_v37 = vpop.f32.mrf.mxu2 }
 0x3f7   :  { %1568 = vmatpush.msrb.mxu2 %v1372_v19 }
 0x3f9   :  { %1569 = vmatpush.msrb.mxu2 %v1371_v35 }
 0x3fa   :  { %v1672_v9 = vpop.trf.xlu1 }
 0x3fb   :  { %2876 = vmatmul.msk.f32.gmra.mxu1 %vm325_vm3, %v1672_v9  ;;  %1570 = vmatpush.msrb.mxu2 %v1370_v57  ;;  %v4289_v21 = vpop.trf.xlu2 }
 0x3fd   :  { %v4281_v45 = vpop.f32.mrf.mxu3  ;;  %1571 = vmatpush.msrb.mxu2 %v1369_v5 }
 0x3fe   :  { %v421_v32 = vpop.f32.mrf.mxu2  ;;  %v1385_v51 = vmax.f32 %v1381_v24, %v4281_v45 }
 0x3ff   :  { %1572 = vmatpush.msrb.mxu2 %v1368_v30 }
 0x401   :  { %1573 = vmatpush.msrb.mxu2 %v1367_v31 }
 0x402   :  { %v1673_v58 = vpop.trf.xlu1 }
 0x403   :  { %2877 = vmatmul.msk.f32.gmra.mxu1 %vm325_vm3, %v1673_v58  ;;  %1574 = vmatpush.msrb.mxu2 %v1366_v59  ;;  %v4301_v25 = vpop.trf.xlu2 }
 0x405   :  { %v4287_v52 = vpop.f32.mrf.mxu3  ;;  %1575 = vmatpush.msrb.mxu2 %v1365_v41  ;;  %v4323_v41 = vpop.f32.mrf.mxu1 }
 0x406   :  { %v424_v46 = vpop.f32.mrf.mxu2 }
 0x407   :  { %1576 = vmatpush.msrb.mxu2 %v1364_v39 }
 0x409   :  { %1577 = vmatpush.msrb.mxu2 %v1363_v4 }
 0x40a   :  { %v1674_v43 = vpop.trf.xlu1 }
 0x40b   :  { %2878 = vmatmul.msk.f32.gmra.mxu1 %vm325_vm3, %v1674_v43  ;;  %1578 = vmatpush.msrb.mxu2 %v1362_v28  ;;  %v4319_v31 = vpop.trf.xlu2 }
 0x40c   :  { %1579 = vmatmul.f32.vlgmr.msrb.gmra.mxu2 %v415_v55 }
 0x40d   :  { %v4292_v61 = vpop.f32.mrf.mxu3  ;;  %2977 = vmatpush.msra.mxu2 %v4167_v27  ;;  %v1380_v27 = vmax.f32 %v4176_v60, %v4252_v8  ;;  %v4331_v57 = vpop.f32.mrf.mxu1 }
 0x40e   :  { %v1387_v18 = vmax.f32 %v1383_v14, %v4292_v61 }
 0x40f   :  { %2978 = vmatpush.msra.mxu2 %v4173_v54  ;;  %v1384_v22 = vmax.f32 %v1380_v27, %v4275_v62 }
 0x411   :  { %2979 = vmatpush.msra.mxu2 %v4182_v20  ;;  %v1382_v20 = vmax.f32 %v1378_v50, %v4259_v12 }
 0x412   :  { %v1675_v48 = vpop.trf.xlu1 }
 0x413   :  { %2879 = vmatmul.msk.f32.gmra.mxu1 %vm325_vm3, %v1675_v48  ;;  %2980 = vmatpush.msra.mxu2 %v4191_v17  ;;  %v1386_v34 = vmax.f32 %v1382_v20, %v4287_v52  ;;  %v4328_v19 = vpop.trf.xlu2 }
 0x414   :  { %1582 = vmatmul.f32.gmra.mxu2 %v418_v37 }
 0x415   :  { %v4309_v54 = vpop.f32.mrf.mxu3  ;;  %v1390_v4 = vmax.f32 %v1386_v34, %v1387_v18  ;;  %v4346_v27 = vpop.f32.mrf.mxu1 }
 0x416   :  { %v1388_v59 = vmax.f32 %v1384_v22, %v4309_v54 }
 0x41a   :  { %v1676_v17 = vpop.trf.xlu1 }
 0x41b   :  { %2880 = vmatmul.msk.f32.gmra.mxu1 %vm325_vm3, %v1676_v17  ;;  %v4333_v55 = vpop.trf.xlu2 }
 0x41c   :  { %1585 = vmatmul.f32.gmra.mxu2 %v421_v32 }
 0x41d   :  { %v4325_v39 = vpop.f32.mrf.mxu3 }
 0x41e   :  { %v1389_v3 = vmax.f32 %v1385_v51, %v4325_v39 }
 0x420   :  { %v1391_v28 = vmax.f32 %v1388_v59, %v1389_v3 }
 0x422   :  { %v1392_v47 = vmax.f32 %v1390_v4, %v1391_v28  ;;  %v1677_v40 = vpop.trf.xlu1 }
 0x423   :  { %2881 = vmatmul.msk.f32.gmra.mxu1 %vm325_vm3, %v1677_v40  ;;  %v4350_v14 = vpop.trf.xlu2 }
 0x424   :  { %v1393_v35 = vrot.slane %v1392_v47, 4  ;;  %1588 = vmatmul.f32.gmra.mxu2 %v424_v46 }
 0x426   :  { %v1394_v9 = vmax.f32 %v1392_v47, %v1393_v35 }
 0x428   :  { %v1395_v5 = vrot.slane %v1394_v9, 2 }
 0x42a   :  { %v1396_v30 = vmax.f32 %v1394_v9, %v1395_v5  ;;  %v1678_v58 = vpop.trf.xlu1 }
 0x42b   :  { %2882 = vmatmul.msk.f32.gmra.mxu1 %vm325_vm3, %v1678_v58 }
 0x42c   :  { %v1397_v43 = vrot.slane %v1396_v30, 1  ;;  %2908 = vmatmul.msk.f32.vlgmr.msra.gmra.mxu2 %vm325_vm3, %v4284_v16 }
 0x42e   :  { %v4338_v37 = vmax.f32 %v1396_v30, %v1397_v43 }
 0x42f   :  { %v4363_v18 = vpop.f32.mrf.mxu1 }
 0x430   :  { %v1399_v50 = vsub.f32 %v4149_v2, %v4338_v37  ;;  %v1400_v63 = vsub.f32 %v4153_v6, %v4338_v37  ;;  %v1401_v48 = vsub.f32 %v4176_v60, %v4338_v37  ;;  %v1402_v24 = vsub.f32 %v4206_v49, %v4338_v37 }
 0x431   :  { %v1403_v16 = vsub.f32 %v4232_v15, %v4338_v37  ;;  %v1404_v6 = vsub.f32 %v4248_v44, %v4338_v37  ;;  %v1405_v49 = vsub.f32 %v4252_v8, %v4338_v37  ;;  %v1406_v15 = vsub.f32 %v4254_v56, %v4338_v37  ;;  %v4365_v44 = vpop.trf.xlu2 }
 0x432   :  { %v1679_v20 = vpop.trf.xlu1  ;;  %v1415_v2 = vmul.f32 1.442695, %v1399_v50  ;;  %v1417_v32 = vmul.f32 1.442695, %v1400_v63  ;;  %v1419_v22 = vmul.f32 1.442695, %v1401_v48  ;;  %v1408_v56 = vsub.f32 %v4264_v42, %v4338_v37 }
 0x433   :  { %2883 = vmatmul.msk.f32.gmra.mxu1 %vm325_vm3, %v1679_v20  ;;  %v1421_v60 = vmul.f32 1.442695, %v1402_v24  ;;  %v1423_v51 = vmul.f32 1.442695, %v1403_v16  ;;  %v1425_v34 = vmul.f32 1.442695, %v1404_v6  ;;  %v1409_v47 = vsub.f32 %v4275_v62, %v4338_v37 }
 0x434   :  { %2909 = vmatmul.msk.f32.gmra.mxu2 %vm325_vm3, %v4289_v21  ;;  %3095 = vpow2.f32 %v1415_v2  ;;  %v1407_v21 = vsub.f32 %v4259_v12, %v4338_v37  ;;  %v1427_v59 = vmul.f32 1.442695, %v1405_v49  ;;  %v1429_v3 = vmul.f32 1.442695, %v1406_v15 }
 0x435   :  { %3097 = vpow2.f32 %v1417_v32  ;;  %v1410_v9 = vsub.f32 %v4281_v45, %v4338_v37  ;;  %v1411_v43 = vsub.f32 %v4287_v52, %v4338_v37  ;;  %v1435_v62 = vmul.f32 1.442695, %v1409_v47 }
 0x436   :  { %3099 = vpow2.f32 %v1419_v22  ;;  %v1431_v40 = vmul.f32 1.442695, %v1407_v21  ;;  %v1412_v24 = vsub.f32 %v4292_v61, %v4338_v37  ;;  %v1413_v2 = vsub.f32 %v4309_v54, %v4338_v37 }
 0x437   :  { %3101 = vpow2.f32 %v1421_v60  ;;  %v4400_v48 = vpop.f32.mrf.mxu1  ;;  %v1437_v20 = vmul.f32 1.442695, %v1410_v9  ;;  %v1439_v32 = vmul.f32 1.442695, %v1411_v43  ;;  %v1414_v61 = vsub.f32 %v4325_v39, %v4338_v37 }
 0x438   :  { %3103 = vpow2.f32 %v1423_v51  ;;  %v1441_v60 = vmul.f32 1.442695, %v1412_v24  ;;  %v1443_v15 = vmul.f32 1.442695, %v1413_v2 }
 0x439   :  { %3105 = vpow2.f32 %v1425_v34  ;;  %v4397_v50 = vpop.trf.xlu2 }
 0x43a   :  { %v1680_v17 = vpop.trf.xlu1  ;;  %v4370_v8 = vpop.eup %3095  ;;  %3107 = vpow2.f32 %v1427_v59 }
 0x43b   :  { %2884 = vmatmul.msk.f32.gmra.mxu1 %vm325_vm3, %v1680_v17  ;;  %v4372_v4 = vpop.eup %3097  ;;  %3109 = vpow2.f32 %v1429_v3  ;;  %v1445_v17 = vmul.f32 1.442695, %v1414_v61 }
 0x43c   :  { %2910 = vmatmul.msk.f32.gmra.mxu2 %vm325_vm3, %v4301_v25  ;;  %v4378_v28 = vpop.eup %3099  ;;  %v1447_v12 = vadd.f32 %v4372_v4, %v4370_v8  ;;  %v1433_v25 = vmul.f32 1.442695, %v1408_v56  ;;  %3111 = vpow2.f32 %v1431_v40 }
 0x43d   :  { %v4382_v46 = vpop.eup %3101 }
 0x43e   :  { %v1448_v35 = vadd.f32 %v4378_v28, %v1447_v12  ;;  %v4387_v42 = vpop.eup %3103  ;;  %3113 = vpow2.f32 %v1433_v25 }
 0x43f   :  { %v4392_v58 = vpop.eup %3105  ;;  %3115 = vpow2.f32 %v1435_v62  ;;  %v4426_v21 = vpop.f32.mrf.mxu1 }
 0x440   :  { %v1449_v5 = vadd.f32 %v4382_v46, %v1448_v35  ;;  %v4402_v45 = vpop.eup %3107  ;;  %3117 = vpow2.f32 %v1437_v20 }
 0x441   :  { %v4409_v16 = vpop.eup %3109  ;;  %3119 = vpow2.f32 %v1439_v32  ;;  %v1745_v39 = vpop.trf.xlu2 }
 0x442   :  { %v1681_v30 = vpop.trf.xlu1  ;;  %v1450_v63 = vadd.f32 %v4387_v42, %v1449_v5  ;;  %v4414_v6 = vpop.eup %3111  ;;  %3121 = vpow2.f32 %v1441_v60 }
 0x443   :  { %2885 = vmatmul.msk.f32.gmra.mxu1 %vm325_vm3, %v1681_v30  ;;  %3123 = vpow2.f32 %v1443_v15 }
 0x444   :  { %2911 = vmatmul.msk.f32.gmra.mxu2 %vm325_vm3, %v4319_v31  ;;  %v1451_v52 = vadd.f32 %v4392_v58, %v1450_v63  ;;  %v4419_v51 = vpop.eup %3113  ;;  %3125 = vpow2.f32 %v1445_v17 }
 0x445   :  { %v3116_v34 = vpop.eup %3115 }
 0x446   :  { %v1452_v22 = vadd.f32 %v4402_v45, %v1451_v52  ;;  %v3118_v59 = vpop.eup %3117 }
 0x447   :  { %v3120_v3 = vpop.eup %3119  ;;  %v4431_v43 = vpop.f32.mrf.mxu1 }
 0x448   :  { %v1453_v31 = vadd.f32 %v4409_v16, %v1452_v22  ;;  %v3122_v40 = vpop.eup %3121 }
 0x449   :  { %v3124_v9 = vpop.eup %3123  ;;  %v1746_v5 = vpop.trf.xlu2 }
 0x44a   :  { %v1682_v49 = vpop.trf.xlu1  ;;  %v1454_v54 = vadd.f32 %v4414_v6, %v1453_v31  ;;  %v3126_v25 = vpop.eup %3125 }
 0x44b   :  { %2886 = vmatmul.msk.f32.gmra.mxu1 %vm325_vm3, %v1682_v49 }
 0x44c   :  { %2912 = vmatmul.msk.f32.gmra.mxu2 %vm325_vm3, %v4328_v19  ;;  %v1455_v37 = vadd.f32 %v4419_v51, %v1454_v54 }
 0x44e   :  { %v1456_v56 = vadd.f32 %v3116_v34, %v1455_v37 }
 0x450   :  { %v1457_v12 = vadd.f32 %v3118_v59, %v1456_v56 }
 0x451   :  { %v1747_v32 = vpop.trf.xlu2 }
 0x452   :  { %v1683_v47 = vpop.trf.xlu1  ;;  %v1458_v35 = vadd.f32 %v3120_v3, %v1457_v12 }
 0x453   :  { %2887 = vmatmul.msk.f32.gmra.mxu1 %vm325_vm3, %v1683_v47 }
 0x454   :  { %2913 = vmatmul.msk.f32.gmra.mxu2 %vm325_vm3, %v4333_v55  ;;  %v1459_v19 = vadd.f32 %v3122_v40, %v1458_v35 }
 0x456   :  { %v1460_v30 = vadd.f32 %v3124_v9, %v1459_v19 }
 0x458   :  { %v1461_v62 = vadd.f32 %v3126_v25, %v1460_v30 }
 0x45a   :  { %v1684_v63 = vpop.trf.xlu1  ;;  %v1462_v24 = vrot.slane %v1461_v62, 4 }
 0x45b   :  { %2888 = vmatmul.msk.f32.gmra.mxu1 %vm325_vm3, %v1684_v63 }
 0x45c   :  { %2914 = vmatmul.msk.f32.gmra.mxu2 %vm325_vm3, %v4350_v14  ;;  %v1463_v20 = vadd.f32 %v1462_v24, %v1461_v62  ;;  %v1748_v14 = vpop.trf.xlu2 }
 0x45e   :  { %v1464_v52 = vrot.slane %v1463_v20, 2 }
 0x460   :  { %v4436_v2 = vpop.f32.mrf.mxu1  ;;  %v1465_v55 = vadd.f32 %v1464_v52, %v1463_v20 }
 0x462   :  { %v1701_v22 = vpop.trf.xlu1  ;;  %v1466_v61 = vrot.slane %v1465_v55, 1 }
 0x463   :  { %2889 = vmatmul.msk.f32.gmra.mxu1 %vm325_vm3, %v1701_v22 }
 0x464   :  { %2915 = vmatmul.msk.f32.gmra.mxu2 %vm325_vm3, %v4365_v44  ;;  %v1467_v60 = vadd.f32 %v1466_v61, %v1465_v55 }
 0x466   :  { %3127 = vrcp.f32 %v1467_v60 }
 0x468   :  { %v4441_v31 = vpop.f32.mrf.mxu1 }
 0x46a   :  { %v1702_v49 = vpop.trf.xlu1 }
 0x46b   :  { %2890 = vmatmul.msk.f32.gmra.mxu1 %vm325_vm3, %v1702_v49 }
 0x46c   :  { %2916 = vmatmul.msk.f32.gmra.mxu2 %vm325_vm3, %v4397_v50  ;;  %v3128_v15 = vpop.eup %3127 }
 0x46d   :  { %v1484_v54 = vmul.f32 %v3128_v15, %v3126_v25  ;;  %v1483_v17 = vmul.f32 %v3128_v15, %v3124_v9  ;;  %v1481_v37 = vmul.f32 %v3128_v15, %v3120_v3  ;;  %v1480_v12 = vmul.f32 %v3128_v15, %v3118_v59 }
 0x46e   :  { %v1479_v47 = vmul.f32 %v3128_v15, %v3116_v34  ;;  %v1482_v44 = vmul.f32 %v3128_v15, %v3122_v40  ;;  %v1474_v35 = vmul.f32 %v3128_v15, %v4392_v58  ;;  %v1473_v19 = vmul.f32 %v3128_v15, %v4387_v42  ;;  %v1765_v34 = vpop.trf.xlu2 }
 0x46f   :  { %1592 = vmatpush.msrb.mxu3 %v1484_v54  ;;  %v1472_v62 = vmul.f32 %v3128_v15, %v4382_v46  ;;  %v1471_v63 = vmul.f32 %v3128_v15, %v4378_v28  ;;  %v1470_v50 = vmul.f32 %v3128_v15, %v4372_v4  ;;  %v1469_v9 = vmul.f32 %v3128_v15, %v4370_v8 }
 0x470   :  { %v4446_v56 = vpop.f32.mrf.mxu1  ;;  %v1478_v42 = vmul.f32 %v3128_v15, %v4419_v51  ;;  %v1477_v4 = vmul.f32 %v3128_v15, %v4414_v6  ;;  %v1476_v8 = vmul.f32 %v3128_v15, %v4409_v16  ;;  %v1475_v28 = vmul.f32 %v3128_v15, %v4402_v45  ;;  %v505_v45 = vld [vmem:[%s5191_s4 + $0x8] sm:$0xff] }
 0x471   :  { %1593 = vmatpush.msrb.mxu3 %v1483_v17 }
 0x472   :  { %v1703_v30 = vpop.trf.xlu1 }
 0x473   :  { %2891 = vmatmul.msk.f32.gmra.mxu1 %vm325_vm3, %v1703_v30  ;;  %1594 = vmatpush.msrb.mxu3 %v1482_v44 }
 0x474   :  { %2917 = vmatmul.msk.f32.gmra.mxu2 %vm325_vm3, %v1745_v39 }
 0x475   :  { %1595 = vmatpush.msrb.mxu3 %v1481_v37 }
 0x476   :  { %v1766_v39 = vpop.trf.xlu2 }
 0x477   :  { %1596 = vmatpush.msrb.mxu3 %v1480_v12 }
 0x478   :  { %v4456_v58 = vpop.f32.mrf.mxu1 }
 0x479   :  { %1597 = vmatpush.msrb.mxu3 %v1479_v47 }
 0x47a   :  { %v1704_v46 = vpop.trf.xlu1 }
 0x47b   :  { %2892 = vmatmul.msk.f32.gmra.mxu1 %vm325_vm3, %v1704_v46  ;;  %1598 = vmatpush.msrb.mxu3 %v1478_v42 }
 0x47c   :  { %2918 = vmatmul.msk.f32.gmra.mxu2 %vm325_vm3, %v1746_v5 }
 0x47d   :  { %1599 = vmatpush.msrb.mxu3 %v1477_v4 }
 0x47e   :  { %v1767_v51 = vpop.trf.xlu2 }
 0x47f   :  { %1600 = vmatpush.msrb.mxu3 %v1476_v8 }
 0x480   :  { %v4464_v59 = vpop.f32.mrf.mxu1 }
 0x481   :  { %1601 = vmatpush.msrb.mxu3 %v1475_v28  ;;  %v2182_v28 = vmax.f32 %v4436_v2, %v4464_v59 }
 0x482   :  { %v1705_v3 = vpop.trf.xlu1 }
 0x483   :  { %2893 = vmatmul.msk.f32.gmra.mxu1 %vm325_vm3, %v1705_v3  ;;  %1602 = vmatpush.msrb.mxu3 %v1474_v35 }
 0x484   :  { %2919 = vmatmul.msk.f32.gmra.mxu2 %vm325_vm3, %v1747_v32 }
 0x485   :  { %1603 = vmatpush.msrb.mxu3 %v1473_v19 }
 0x486   :  { %v1768_v24 = vpop.trf.xlu2 }
 0x487   :  { %1604 = vmatpush.msrb.mxu3 %v1472_v62 }
 0x488   :  { %v4468_v6 = vpop.f32.mrf.mxu1 }
 0x489   :  { %1605 = vmatpush.msrb.mxu3 %v1471_v63  ;;  %v2183_v8 = vmax.f32 %v4441_v31, %v4468_v6 }
 0x48a   :  { %v1706_v16 = vpop.trf.xlu1 }
 0x48b   :  { %2894 = vmatmul.msk.f32.gmra.mxu1 %vm325_vm3, %v1706_v16  ;;  %1606 = vmatpush.msrb.mxu3 %v1470_v50 }
 0x48c   :  { %2920 = vmatmul.msk.f32.gmra.mxu2 %vm325_vm3, %v1748_v14 }
 0x48d   :  { %1607 = vmatpush.msrb.mxu3 %v1469_v9 }
 0x48e   :  { %1608 = vmatmul.f32.vlgmr.msrb.gmra.mxu3 %v3711_v13  ;;  %v506_v13 = vld [vmem:[%s5191_s4 + $0x10] sm:$0xff]  ;;  %v1769_v55 = vpop.trf.xlu2 }
 0x48f   :  { %v4476_v40 = vpop.f32.mrf.mxu2 }
 0x490   :  { %1492 = vperm.xlu1 %2992, %v505_v45   ;;  %v4478_v25 = vpop.f32.mrf.mxu1 }
 0x492   :  { %v1707_v5 = vpop.trf.xlu1 }
 0x493   :  { %2895 = vmatmul.msk.f32.gmra.mxu1 %vm325_vm3, %v1707_v5 }
 0x494   :  { %2921 = vmatmul.msk.f32.gmra.mxu2 %vm325_vm3, %v1765_v34 }
 0x496   :  { %1611 = vmatmul.f32.gmra.mxu3 %v3777_v1  ;;  %v1770_v60 = vpop.trf.xlu2 }
 0x497   :  { %v4483_v20 = vpop.f32.mrf.mxu2 }
 0x498   :  { %v4485_v52 = vpop.f32.mrf.mxu1 }
 0x499   :  { %v2185_v3 = vmax.f32 %v4456_v58, %v4485_v52 }
 0x49a   :  { %v1708_v32 = vpop.trf.xlu1 }
 0x49b   :  { %2896 = vmatmul.msk.f32.gmra.mxu1 %vm325_vm3, %v1708_v32 }
 0x49c   :  { %2922 = vmatmul.msk.f32.gmra.mxu2 %vm325_vm3, %v1766_v39  ;;  %v2184_v39 = vmax.f32 %v4446_v56, %v4478_v25 }
 0x49e   :  { %1614 = vmatmul.f32.gmra.mxu3 %v3787_v7  ;;  %v1771_v17 = vpop.trf.xlu2 }
 0x49f   :  { %1497 = vperm.xlu2 %2990, %v506_v13   ;;  %v4493_v22 = vpop.f32.mrf.mxu2 }
 0x4a0   :  { %v4495_v1 = vpop.f32.mrf.mxu1 }
 0x4a1   :  { %v2186_v16 = vmax.f32 %v2182_v28, %v4495_v1 }
 0x4a2   :  { %v1709_v61 = vpop.trf.xlu1 }
 0x4a3   :  { %2897 = vmatmul.msk.f32.gmra.mxu1 %vm325_vm3, %v1709_v61 }
 0x4a4   :  { %2923 = vmatmul.msk.f32.gmra.mxu2 %vm325_vm3, %v1767_v51 }
 0x4a6   :  { %1617 = vmatmul.f32.gmra.mxu3 %v3811_v11  ;;  %v1772_v44 = vpop.trf.xlu2 }
 0x4a7   :  { %v4500_v49 = vpop.f32.mrf.mxu2 }
 0x4a8   :  { %v4502_v14 = vpop.f32.mrf.mxu1 }
 0x4a9   :  { %v2187_v51 = vmax.f32 %v2183_v8, %v4502_v14 }
 0x4aa   :  { %v1710_v15 = vpop.trf.xlu1 }
 0x4ab   :  { %2898 = vmatmul.msk.f32.gmra.mxu1 %vm325_vm3, %v1710_v15 }
 0x4ac   :  { %2924 = vmatmul.msk.f32.gmra.mxu2 %vm325_vm3, %v1768_v24 }
 0x4ae   :  { %v1773_v62 = vpop.trf.xlu2 }
 0x4af   :  { %v4506_v7 = vpop.f32.mrf.mxu2 }
 0x4b0   :  { %v4508_v54 = vpop.f32.mrf.mxu1 }
 0x4b1   :  { %v2188_v45 = vmax.f32 %v2184_v39, %v4508_v54 }
 0x4b2   :  { %v1711_v37 = vpop.trf.xlu1 }
 0x4b3   :  { %2899 = vmatmul.msk.f32.gmra.mxu1 %vm325_vm3, %v1711_v37 }
 0x4b4   :  { %2925 = vmatmul.msk.f32.gmra.mxu2 %vm325_vm3, %v1769_v55 }
 0x4b6   :  { %v1774_v34 = vpop.trf.xlu2 }
 0x4b7   :  { %v4512_v11 = vpop.f32.mrf.mxu2 }
 0x4b8   :  { %v4514_v12 = vpop.f32.mrf.mxu1 }
 0x4b9   :  { %v2189_v5 = vmax.f32 %v2185_v3, %v4514_v12 }
 0x4ba   :  { %v1712_v47 = vpop.trf.xlu1 }
 0x4bb   :  { %2900 = vmatmul.msk.f32.gmra.mxu1 %vm325_vm3, %v1712_v47 }
 0x4bc   :  { %2926 = vmatmul.msk.f32.gmra.mxu2 %vm325_vm3, %v1770_v60 }
 0x4be   :  { %v1775_v61 = vpop.trf.xlu2 }
 0x4bf   :  { %v4518_v35 = vpop.f32.mrf.mxu2 }
 0x4c0   :  { %v4520_v19 = vpop.f32.mrf.mxu1 }
 0x4c1   :  { %v2190_v55 = vmax.f32 %v2186_v16, %v4520_v19 }
 0x4c2   :  { %v1713_v30 = vpop.trf.xlu1 }
 0x4c3   :  { %2901 = vmatmul.msk.f32.gmra.mxu1 %vm325_vm3, %v1713_v30 }
 0x4c4   :  { %2927 = vmatmul.msk.f32.gmra.mxu2 %vm325_vm3, %v1771_v17 }
 0x4c6   :  { %v1776_v8 = vpop.trf.xlu2 }
 0x4c7   :  { %v4524_v63 = vpop.f32.mrf.mxu2 }
 0x4c8   :  { %v4526_v50 = vpop.f32.mrf.mxu1 }
 0x4c9   :  { %v2191_v24 = vmax.f32 %v2187_v51, %v4526_v50 }
 0x4ca   :  { %v1714_v9 = vpop.trf.xlu1 }
 0x4cb   :  { %2902 = vmatmul.msk.f32.gmra.mxu1 %vm325_vm3, %v1714_v9  ;;  %v2194_v37 = vmax.f32 %v2190_v55, %v2191_v24 }
 0x4cc   :  { %2928 = vmatmul.msk.f32.gmra.mxu2 %vm325_vm3, %v1772_v44 }
 0x4ce   :  { %v1777_v24 = vpop.trf.xlu2 }
 0x4cf   :  { %v4530_v42 = vpop.f32.mrf.mxu2 }
 0x4d0   :  { %v4532_v46 = vpop.f32.mrf.mxu1 }
 0x4d1   :  { %v2192_v60 = vmax.f32 %v2188_v45, %v4532_v46 }
 0x4d2   :  { %v1715_v4 = vpop.trf.xlu1 }
 0x4d3   :  { %2903 = vmatmul.msk.f32.gmra.mxu1 %vm325_vm3, %v1715_v4 }
 0x4d4   :  { %2929 = vmatmul.msk.f32.gmra.mxu2 %vm325_vm3, %v1773_v62 }
 0x4d7   :  { %v4549_v32 = vpop.f32.mrf.mxu2 }
 0x4d8   :  { %v4551_v13 = vpop.f32.mrf.mxu1 }
 0x4d9   :  { %v2193_v15 = vmax.f32 %v2189_v5, %v4551_v13 }
 0x4da   :  { %v1716_v17 = vpop.trf.xlu1 }
 0x4db   :  { %v2195_v47 = vmax.f32 %v2192_v60, %v2193_v15  ;;  %2904 = vmatmul.msk.f32.gmra.mxu1 %vm325_vm3, %v1716_v17 }
 0x4dc   :  { %2930 = vmatmul.msk.f32.gmra.mxu2 %vm325_vm3, %v1774_v34 }
 0x4dd   :  { %v2196_v44 = vmax.f32 %v2194_v37, %v2195_v47 }
 0x4df   :  { %v2197_v30 = vrot.slane %v2196_v44, 4  ;;  %v4558_v62 = vpop.f32.mrf.mxu2 }
 0x4e0   :  { %v4560_v9 = vpop.f32.mrf.mxu1 }
 0x4e1   :  { %v2198_v4 = vmax.f32 %v2196_v44, %v2197_v30 }
 0x4e3   :  { %v2199_v28 = vrot.slane %v2198_v4, 2  ;;  %2905 = vmatmul.msk.f32.gmra.mxu1 %vm325_vm3, %v4256_v10 }
 0x4e4   :  { %2931 = vmatmul.msk.f32.gmra.mxu2 %vm325_vm3, %v1775_v61 }
 0x4e5   :  { %v2200_v39 = vmax.f32 %v2198_v4, %v2199_v28 }
 0x4e7   :  { %v2201_v3 = vrot.slane %v2200_v39, 1  ;;  %v4565_v51 = vpop.f32.mrf.mxu2 }
 0x4e8   :  { %v4567_v16 = vpop.f32.mrf.mxu1 }
 0x4e9   :  { %v4569_v34 = vmax.f32 %v2200_v39, %v2201_v3 }
 0x4eb   :  { %v2203_v45 = vsub.f32 %v4436_v2, %v4569_v34  ;;  %v2204_v5 = vsub.f32 %v4441_v31, %v4569_v34  ;;  %2906 = vmatmul.msk.f32.gmra.mxu1 %vm325_vm3, %v4261_v0  ;;  %v2205_v10 = vsub.f32 %v4446_v56, %v4569_v34  ;;  %v2206_v55 = vsub.f32 %v4456_v58, %v4569_v34 }
 0x4ec   :  { %2932 = vmatmul.msk.f32.gmra.mxu2 %vm325_vm3, %v1776_v8  ;;  %v2207_v2 = vsub.f32 %v4464_v59, %v4569_v34  ;;  %v2208_v0 = vsub.f32 %v4468_v6, %v4569_v34  ;;  %v2209_v58 = vsub.f32 %v4478_v25, %v4569_v34  ;;  %v2210_v59 = vsub.f32 %v4485_v52, %v4569_v34  ;;  %v1778_v6 = vpop.trf.xlu2 }
 0x4ed   :  { %v2219_v61 = vmul.f32 1.442695, %v2203_v45  ;;  %v2221_v60 = vmul.f32 1.442695, %v2204_v5  ;;  %v2223_v15 = vmul.f32 1.442695, %v2205_v10  ;;  %v2212_v39 = vsub.f32 %v4502_v14, %v4569_v34 }
 0x4ee   :  { %v2225_v56 = vmul.f32 1.442695, %v2206_v55  ;;  %v2227_v37 = vmul.f32 1.442695, %v2207_v2  ;;  %v2229_v47 = vmul.f32 1.442695, %v2208_v0  ;;  %v2214_v14 = vsub.f32 %v4514_v12, %v4569_v34 }
 0x4ef   :  { %v4584_v17 = vpop.f32.mrf.mxu2  ;;  %3129 = vpow2.f32 %v2219_v61  ;;  %v2231_v4 = vmul.f32 1.442695, %v2209_v58  ;;  %v2233_v3 = vmul.f32 1.442695, %v2210_v59  ;;  %v2237_v61 = vmul.f32 1.442695, %v2212_v39 }
 0x4f0   :  { %v4586_v31 = vpop.f32.mrf.mxu1  ;;  %3131 = vpow2.f32 %v2221_v60  ;;  %v2216_v12 = vsub.f32 %v4526_v50, %v4569_v34  ;;  %v2241_v59 = vmul.f32 1.442695, %v2214_v14  ;;  %v2218_v50 = vsub.f32 %v4551_v13, %v4569_v34 }
 0x4f1   :  { %3133 = vpow2.f32 %v2223_v15 }
 0x4f2   :  { %3135 = vpow2.f32 %v2225_v56 }
 0x4f3   :  { %2907 = vmatmul.msk.f32.gmra.mxu1 %vm325_vm3, %v4273_v26  ;;  %v2211_v26 = vsub.f32 %v4495_v1, %v4569_v34  ;;  %3137 = vpow2.f32 %v2227_v37  ;;  %v2213_v1 = vsub.f32 %v4508_v54, %v4569_v34  ;;  %v2215_v54 = vsub.f32 %v4520_v19, %v4569_v34 }
 0x4f4   :  { %2933 = vmatmul.msk.f32.gmra.mxu2 %vm325_vm3, %v1777_v24  ;;  %3139 = vpow2.f32 %v2229_v47  ;;  %v1779_v47 = vpop.trf.xlu2  ;;  %v2217_v19 = vsub.f32 %v4532_v46, %v4569_v34 }
 0x4f5   :  { %v4597_v44 = vpop.eup %3129  ;;  %3141 = vpow2.f32 %v2231_v4  ;;  %v2235_v10 = vmul.f32 1.442695, %v2211_v26  ;;  %v2239_v15 = vmul.f32 1.442695, %v2213_v1  ;;  %v2243_v4 = vmul.f32 1.442695, %v2215_v54  ;;  %v4659_v54 = vpop.permute.xlu0 %1487 }
 0x4f6   :  { %v4599_v30 = vpop.eup %3131  ;;  %3143 = vpow2.f32 %v2233_v3  ;;  %v2245_v3 = vmul.f32 1.442695, %v2216_v12  ;;  %5215 = vst [vmem:[#allocation20_spill] sm:$0xff] %v4659_v54 }
 0x4f7   :  { %v4603_v25 = vpop.f32.mrf.mxu2  ;;  %v2251_v28 = vadd.f32 %v4599_v30, %v4597_v44  ;;  %v4609_v52 = vpop.eup %3133  ;;  %3145 = vpow2.f32 %v2235_v10  ;;  %v2247_v10 = vmul.f32 1.442695, %v2217_v19 }
 0x4f8   :  { %v4605_v8 = vpop.f32.mrf.mxu1  ;;  %v4614_v5 = vpop.eup %3135  ;;  %3147 = vpow2.f32 %v2237_v61 }
 0x4f9   :  { %v2252_v45 = vadd.f32 %v4609_v52, %v2251_v28  ;;  %v4620_v55 = vpop.eup %3137  ;;  %3149 = vpow2.f32 %v2239_v15 }
 0x4fa   :  { %v4625_v2 = vpop.eup %3139  ;;  %3151 = vpow2.f32 %v2241_v59  ;;  %v1523_v59 = vadd.f32 %v4303_v53, %v4659_v54 }
 0x4fb   :  { %v2253_v24 = vadd.f32 %v4614_v5, %v2252_v45  ;;  %v4634_v37 = vpop.eup %3141  ;;  %3153 = vpow2.f32 %v2243_v4 }
 0x4fc   :  { %2934 = vmatmul.msk.f32.gmra.mxu2 %vm325_vm3, %v1778_v6  ;;  %v4639_v26 = vpop.eup %3143  ;;  %3155 = vpow2.f32 %v2245_v3  ;;  %v1780_v15 = vpop.trf.xlu2  ;;  %v1552_v4 = vadd.f32 %v4363_v18, %v1523_v59 }
 0x4fd   :  { %v2254_v60 = vadd.f32 %v4620_v55, %v2253_v24  ;;  %v4645_v39 = vpop.eup %3145  ;;  %3157 = vpow2.f32 %v2247_v10 }
 0x4fe   :  { %v4650_v1 = vpop.eup %3147  ;;  %v1581_v10 = vadd.f32 %v4476_v40, %v1552_v4 }
 0x4ff   :  { %v4629_v0 = vpop.f32.mrf.mxu2  ;;  %v2255_v58 = vadd.f32 %v4625_v2, %v2254_v60  ;;  %v4657_v61 = vpop.eup %3149  ;;  %v2249_v60 = vmul.f32 1.442695, %v2218_v50 }
 0x500   :  { %v4631_v56 = vpop.f32.mrf.mxu1  ;;  %v4662_v34 = vpop.eup %3151 }
 0x501   :  { %v2256_v6 = vadd.f32 %v4634_v37, %v2255_v58  ;;  %v3154_v12 = vpop.eup %3153  ;;  %3159 = vpow2.f32 %v2249_v60 }
 0x502   :  { %v4670_v19 = vpop.eup %3155 }
 0x503   :  { %v2257_v28 = vadd.f32 %v4639_v26, %v2256_v6  ;;  %v4668_v6 = vpop.permute.xlu1 %1492 }
 0x504   :  { %2935 = vmatmul.msk.f32.gmra.mxu2 %vm325_vm3, %v1779_v47  ;;  %5216 = vst [vmem:[#allocation21_spill] sm:$0xff] %v4668_v6  ;;  %v1526_v53 = vadd.f32 %v4323_v41, %v4668_v6  ;;  %v4682_v33 = vpop.permute.xlu2 %1497 }
 0x505   :  { %v2258_v45 = vadd.f32 %v4645_v39, %v2257_v28  ;;  %5218 = vst [vmem:[#allocation23_spill] sm:$0xff] %v4682_v33 }
 0x506   :  { %v1555_v54 = vadd.f32 %v4400_v48, %v1526_v53 }
 0x507   :  { %v4652_v46 = vpop.f32.mrf.mxu2  ;;  %v2259_v14 = vadd.f32 %v4650_v1, %v2258_v45  ;;  %v3158_v45 = vpop.eup %3157 }
 0x508   :  { %5214 = vst [vmem:[#allocation19_spill] sm:$0xff] %v4652_v46  ;;  %v4654_v24 = vpop.f32.mrf.mxu1  ;;  %v1584_v48 = vadd.f32 %v4483_v20, %v1555_v54  ;;  %v4703_v54 = vpop.permute.xlu0 %1502 }
 0x509   :  { %v2260_v13 = vadd.f32 %v4657_v61, %v2259_v14  ;;  %5219 = vst [vmem:[#allocation24_spill] sm:$0xff] %v4703_v54 }
 0x50b   :  { %v2261_v58 = vadd.f32 %v4662_v34, %v2260_v13  ;;  %v3160_v13 = vpop.eup %3159 }
 0x50c   :  { %2936 = vmatmul.msk.f32.gmra.mxu2 %vm325_vm3, %v1780_v15 }
 0x50d   :  { %v2262_v47 = vadd.f32 %v3154_v12, %v2261_v58 }
 0x50f   :  { %v4673_v28 = vpop.f32.mrf.mxu2  ;;  %v2263_v3 = vadd.f32 %v4670_v19, %v2262_v47  ;;  %v3265_v47 = vld [vmem:[%s5187_s0] sm:$0xff] }
 0x510   :  { %5217 = vst [vmem:[#allocation22_spill] sm:$0xff] %v4673_v28  ;;  %v4675_v50 = vpop.f32.mrf.mxu1 }
 0x511   :  { %v2264_v14 = vadd.f32 %v3158_v45, %v2263_v3  ;;  %v1609_v60 = vpop.f32.mrf.mxu3  ;;  %v1529_v3 = vadd.f32 %v4331_v57, %v4682_v33 }
 0x512   :  { %v1610_v15 = vadd.f32 %v1609_v60, %v1581_v10 }
 0x513   :  { %v2265_v58 = vadd.f32 %v3160_v13, %v2264_v14 }
 0x514   :  { %v1621_v18 = vmax.f32 %v1610_v15, 0.0  ;;  %v1558_v15 = vadd.f32 %v4426_v21, %v1529_v3 }
 0x515   :  { %v2266_v59 = vrot.slane %v2265_v58, 4 }
 0x516   :  { %v1625_v28 = vadd.f32 %v3265_v47, %v1621_v18  ;;  %v3266_v18 = vld [vmem:[%s5187_s0 + $0x8] sm:$0xff]  ;;  %v1587_v20 = vadd.f32 %v4493_v22, %v1558_v15 }
 0x517   :  { %v4687_v40 = vpop.f32.mrf.mxu2  ;;  %v2267_v41 = vadd.f32 %v2266_v59, %v2265_v58 }
 0x518   :  { %v4689_v4 = vpop.f32.mrf.mxu1  ;;  %1629 = vst [vmem:[#allocation4] sm:$0xff] %v1625_v28 }
 0x519   :  { %v2268_v10 = vrot.slane %v2267_v41, 2  ;;  %v1612_v53 = vpop.f32.mrf.mxu3 }
 0x51a   :  { %v1613_v14 = vadd.f32 %v1612_v53, %v1584_v48 }
 0x51b   :  { %v2269_v60 = vadd.f32 %v2268_v10, %v2267_v41  ;;  %v1532_v41 = vadd.f32 %v4346_v27, %v4703_v54 }
 0x51c   :  { %v1622_v6 = vmax.f32 %v1613_v14, 0.0 }
 0x51d   :  { %v2270_v46 = vrot.slane %v2269_v60, 1  ;;  %v1561_v48 = vadd.f32 %v4431_v43, %v1532_v41 }
 0x51e   :  { %v1626_v47 = vadd.f32 %v3266_v18, %v1622_v6  ;;  %v3267_v6 = vld [vmem:[%s5187_s0 + $0x10] sm:$0xff] }
 0x51f   :  { %v4698_v58 = vpop.f32.mrf.mxu2  ;;  %v2271_v57 = vadd.f32 %v2270_v46, %v2269_v60  ;;  %v1590_v14 = vadd.f32 %v4500_v49, %v1561_v48 }
 0x520   :  { %v4700_v59 = vpop.f32.mrf.mxu1  ;;  %1630 = vst [vmem:[#allocation4 + $0x8] sm:$0xff] %v1626_v47 }
 0x521   :  { %3161 = vrcp.f32 %v2271_v57  ;;  %v1615_v28 = vpop.f32.mrf.mxu3 }
 0x522   :  { %v1616_v21 = vadd.f32 %v1615_v28, %v1587_v20 }
 0x524   :  { %v1623_v3 = vmax.f32 %v1616_v21, 0.0 }
 0x526   :  { %v1627_v10 = vadd.f32 %v3267_v6, %v1623_v3 }
 0x527   :  { %v4711_v46 = vpop.f32.mrf.mxu2  ;;  %v3162_v22 = vpop.eup %3161 }
 0x528   :  { %v4713_v53 = vpop.f32.mrf.mxu1  ;;  %1631 = vst [vmem:[#allocation4 + $0x10] sm:$0xff] %v1627_v10  ;;  %v2288_v60 = vmul.f32 %v3162_v22, %v3160_v13  ;;  %v2285_v15 = vmul.f32 %v3162_v22, %v3154_v12  ;;  %v2284_v27 = vmul.f32 %v3162_v22, %v4662_v34  ;;  %v2287_v43 = vmul.f32 %v3162_v22, %v3158_v45  ;;  %v3268_v34 = vld [vmem:[%s5187_s0 + $0x18] sm:$0xff] }
 0x529   :  { %v1618_v18 = vpop.f32.mrf.mxu3  ;;  %v2278_v57 = vmul.f32 %v3162_v22, %v4625_v2  ;;  %v2277_v20 = vmul.f32 %v3162_v22, %v4620_v55  ;;  %v2276_v28 = vmul.f32 %v3162_v22, %v4614_v5  ;;  %v2275_v21 = vmul.f32 %v3162_v22, %v4609_v52 }
 0x52a   :  { %v1619_v47 = vadd.f32 %v1618_v18, %v1590_v14  ;;  %2610 = vmatpush.msrb.mxu2 %v2288_v60  ;;  %v2274_v41 = vmul.f32 %v3162_v22, %v4599_v30  ;;  %v2286_v12 = vmul.f32 %v3162_v22, %v4670_v19  ;;  %v2273_v13 = vmul.f32 %v3162_v22, %v4597_v44 }
 0x52b   :  { %v2283_v30 = vmul.f32 %v3162_v22, %v4657_v61  ;;  %v2282_v52 = vmul.f32 %v3162_v22, %v4650_v1  ;;  %v2281_v5 = vmul.f32 %v3162_v22, %v4645_v39  ;;  %v2280_v3 = vmul.f32 %v3162_v22, %v4639_v26 }
 0x52c   :  { %v1624_v49 = vmax.f32 %v1619_v47, 0.0  ;;  %2611 = vmatpush.msrb.mxu2 %v2287_v43  ;;  %v2279_v48 = vmul.f32 %v3162_v22, %v4634_v37  ;;  %v2290_v10 = vmax.f32 %v4567_v16, %v4654_v24  ;;  %v2289_v22 = vmax.f32 %v4560_v9, %v4631_v56 }
 0x52d   :  { %v2291_v14 = vmax.f32 %v4586_v31, %v4675_v50  ;;  %v2292_v60 = vmax.f32 %v4605_v8, %v4689_v4 }
 0x52e   :  { %v1628_v45 = vadd.f32 %v3268_v34, %v1624_v49  ;;  %2612 = vmatpush.msrb.mxu2 %v2286_v12 }
 0x52f   :  { %v4727_v2 = vpop.f32.mrf.mxu2 }
 0x530   :  { %v4729_v55 = vpop.f32.mrf.mxu1  ;;  %1632 = vst [vmem:[#allocation4 + $0x18] sm:$0xff] %v1628_v45  ;;  %2613 = vmatpush.msrb.mxu2 %v2285_v15  ;;  %v2293_v15 = vmax.f32 %v2289_v22, %v4700_v59 }
 0x531   :  { %v2295_v18 = vmax.f32 %v2291_v14, %v4729_v55 }
 0x532   :  { %2614 = vmatpush.msrb.mxu2 %v2284_v27 }
 0x534   :  { %2615 = vmatpush.msrb.mxu2 %v2283_v30 }
 0x536   :  { %2616 = vmatpush.msrb.mxu2 %v2282_v52 }
 0x537   :  { %v4733_v44 = vpop.f32.mrf.mxu2 }
 0x538   :  { %v4736_v19 = vpop.f32.mrf.mxu1  ;;  %2617 = vmatpush.msrb.mxu2 %v2281_v5 }
 0x539   :  { %v2296_v27 = vmax.f32 %v2292_v60, %v4736_v19 }
 0x53a   :  { %2618 = vmatpush.msrb.mxu2 %v2280_v3 }
 0x53c   :  { %2619 = vmatpush.msrb.mxu2 %v2279_v48 }
 0x53e   :  { %2620 = vmatpush.msrb.mxu2 %v2278_v57 }
 0x53f   :  { %v4740_v6 = vpop.f32.mrf.mxu2 }
 0x540   :  { %v4742_v61 = vpop.f32.mrf.mxu1  ;;  %2621 = vmatpush.msrb.mxu2 %v2277_v20 }
 0x541   :  { %v2297_v57 = vmax.f32 %v2293_v15, %v4742_v61 }
 0x542   :  { %2622 = vmatpush.msrb.mxu2 %v2276_v28 }
 0x544   :  { %2623 = vmatpush.msrb.mxu2 %v2275_v21  ;;  %v2403_v21 = vmax.f32 %v4518_v35, %v4512_v11 }
 0x546   :  { %2624 = vmatpush.msrb.mxu2 %v2274_v41  ;;  %v2399_v41 = vmax.f32 %v4506_v7, %v4530_v42 }
 0x547   :  { %v4744_v1 = vpop.f32.mrf.mxu2 }
 0x548   :  { %v4746_v39 = vpop.f32.mrf.mxu1  ;;  %2625 = vmatpush.msrb.mxu2 %v2273_v13  ;;  %v2407_v13 = vmax.f32 %v2403_v21, %v4524_v63 }
 0x549   :  { %2626 = vmatmul.f32.vlgmr.msrb.gmra.mxu2 %v3821_v23  ;;  %v2294_v23 = vmax.f32 %v2290_v10, %v4713_v53 }
 0x54a   :  { %v2396_v45 = vmax.f32 %v2399_v41, %v2407_v13 }
 0x54b   :  { %v2298_v47 = vmax.f32 %v2294_v23, %v4746_v39 }
 0x54c   :  { %v2400_v52 = vmax.f32 %v2396_v45, %v4549_v32 }
 0x54d   :  { %v2301_v49 = vmax.f32 %v2297_v57, %v2298_v47 }
 0x54e   :  { %v2404_v10 = vmax.f32 %v2400_v52, %v4558_v62 }
 0x54f   :  { %v4749_v26 = vpop.f32.mrf.mxu2 }
 0x550   :  { %v4751_v37 = vpop.f32.mrf.mxu1  ;;  %v2397_v14 = vmax.f32 %v4565_v51, %v2404_v10 }
 0x551   :  { %2629 = vmatmul.f32.gmra.mxu2 %v3843_v38  ;;  %v2299_v20 = vmax.f32 %v2295_v18, %v4751_v37 }
 0x552   :  { %v2401_v60 = vmax.f32 %v2397_v14, %v4584_v17 }
 0x554   :  { %v2405_v15 = vmax.f32 %v2401_v60, %v4603_v25 }
 0x556   :  { %v2408_v57 = vmax.f32 %v4629_v0, %v2405_v15 }
 0x557   :  { %v4767_v38 = vpop.f32.mrf.mxu2 }
 0x558   :  { %v4769_v43 = vpop.f32.mrf.mxu1 }
 0x559   :  { %v2300_v28 = vmax.f32 %v2296_v27, %v4769_v43  ;;  %2632 = vmatmul.f32.gmra.mxu2 %v3872_v29 }
 0x55b   :  { %v2302_v12 = vmax.f32 %v2299_v20, %v2300_v28  ;;  %v5220_v28 = vld [vmem:[#allocation19_spill] sm:$0xff] }
 0x55c   :  { %v2398_v21 = vmax.f32 %v5220_v28, %v2408_v57 }
 0x55d   :  { %v2303_v34 = vmax.f32 %v2301_v49, %v2302_v12  ;;  %v5221_v49 = vld [vmem:[#allocation22_spill] sm:$0xff] }
 0x55e   :  { %v2402_v12 = vmax.f32 %v2398_v21, %v5221_v49 }
 0x55f   :  { %v2304_v30 = vrot.slane %v2303_v34, 4  ;;  %v4781_v5 = vpop.f32.mrf.mxu2 }
 0x560   :  { %v4783_v3 = vpop.f32.mrf.mxu1 }
 0x561   :  { %v2305_v48 = vmax.f32 %v2303_v34, %v2304_v30  ;;  %2635 = vmatmul.f32.gmra.mxu2 %v3903_v36 }
 0x563   :  { %v2306_v22 = vrot.slane %v2305_v48, 2 }
 0x565   :  { %v2307_v29 = vmax.f32 %v2305_v48, %v2306_v22 }
 0x567   :  { %v2308_v23 = vrot.slane %v2307_v29, 1  ;;  %v4790_v18 = vpop.f32.mrf.mxu2 }
 0x568   :  { %v4792_v27 = vpop.f32.mrf.mxu1 }
 0x569   :  { %v4794_v47 = vmax.f32 %v2307_v29, %v2308_v23 }
 0x56b   :  { %v2310_v20 = vsub.f32 %v4560_v9, %v4794_v47  ;;  %v2311_v36 = vsub.f32 %v4567_v16, %v4794_v47  ;;  %v2312_v41 = vsub.f32 %v4586_v31, %v4794_v47  ;;  %v2313_v13 = vsub.f32 %v4605_v8, %v4794_v47 }
 0x56c   :  { %v2314_v30 = vsub.f32 %v4631_v56, %v4794_v47  ;;  %v2406_v9 = vmax.f32 %v2402_v12, %v4783_v3  ;;  %v2315_v31 = vsub.f32 %v4654_v24, %v4794_v47  ;;  %v2316_v22 = vsub.f32 %v4675_v50, %v4794_v47 }
 0x56d   :  { %v2326_v34 = vmul.f32 1.442695, %v2310_v20  ;;  %v2328_v45 = vmul.f32 1.442695, %v2311_v36  ;;  %v2330_v52 = vmul.f32 1.442695, %v2312_v41  ;;  %v2317_v29 = vsub.f32 %v4689_v4, %v4794_v47 }
 0x56e   :  { %v2332_v10 = vmul.f32 1.442695, %v2313_v13  ;;  %v2409_v8 = vmax.f32 %v2406_v9, %v4792_v27  ;;  %v2334_v56 = vmul.f32 1.442695, %v2314_v30  ;;  %v2336_v60 = vmul.f32 1.442695, %v2315_v31 }
 0x56f   :  { %v4810_v48 = vpop.f32.mrf.mxu2  ;;  %3163 = vpow2.f32 %v2326_v34  ;;  %v2318_v57 = vsub.f32 %v4700_v59, %v4794_v47  ;;  %v2338_v20 = vmul.f32 1.442695, %v2316_v22  ;;  %v2319_v4 = vsub.f32 %v4713_v53, %v4794_v47 }
 0x570   :  { %v4812_v16 = vpop.f32.mrf.mxu1  ;;  %3165 = vpow2.f32 %v2328_v45  ;;  %v2340_v12 = vmul.f32 1.442695, %v2317_v29  ;;  %v2320_v59 = vsub.f32 %v4729_v55, %v4794_v47  ;;  %v2321_v9 = vsub.f32 %v4736_v19, %v4794_v47 }
 0x571   :  { %3167 = vpow2.f32 %v2330_v52  ;;  %v2410_v14 = vmax.f32 %v4812_v16, %v2409_v8  ;;  %v2342_v30 = vmul.f32 1.442695, %v2318_v57  ;;  %v2322_v31 = vsub.f32 %v4742_v61, %v4794_v47 }
 0x572   :  { %3169 = vpow2.f32 %v2332_v10  ;;  %v2344_v8 = vmul.f32 1.442695, %v2319_v4  ;;  %v2323_v55 = vsub.f32 %v4746_v39, %v4794_v47  ;;  %v2346_v29 = vmul.f32 1.442695, %v2320_v59 }
 0x573   :  { %v2411_v23 = vrot.slane %v2410_v14, 4  ;;  %3171 = vpow2.f32 %v2334_v56  ;;  %v2348_v61 = vmul.f32 1.442695, %v2321_v9  ;;  %v2324_v4 = vsub.f32 %v4751_v37, %v4794_v47 }
 0x574   :  { %3173 = vpow2.f32 %v2336_v60  ;;  %v2352_v59 = vmul.f32 1.442695, %v2323_v55 }
 0x575   :  { %v4822_v15 = vpop.eup %3163  ;;  %v2412_v50 = vmax.f32 %v2410_v14, %v2411_v23  ;;  %3175 = vpow2.f32 %v2338_v20  ;;  %v2350_v23 = vmul.f32 1.442695, %v2322_v31  ;;  %v2354_v31 = vmul.f32 1.442695, %v2324_v4 }
 0x576   :  { %v4824_v24 = vpop.eup %3165  ;;  %3177 = vpow2.f32 %v2340_v12 }
 0x577   :  { %v4828_v36 = vpop.f32.mrf.mxu2  ;;  %v2358_v21 = vadd.f32 %v4824_v24, %v4822_v15  ;;  %v4832_v41 = vpop.eup %3167  ;;  %v2413_v13 = vrot.slane %v2412_v50, 2  ;;  %3179 = vpow2.f32 %v2342_v30 }
 0x578   :  { %v4837_v45 = vpop.eup %3169  ;;  %3181 = vpow2.f32 %v2344_v8 }
 0x579   :  { %v2359_v34 = vadd.f32 %v4832_v41, %v2358_v21  ;;  %v2414_v52 = vmax.f32 %v2412_v50, %v2413_v13  ;;  %v4846_v10 = vpop.eup %3171  ;;  %3183 = vpow2.f32 %v2346_v29 }
 0x57a   :  { %v4849_v14 = vpop.eup %3173  ;;  %3185 = vpow2.f32 %v2348_v61 }
 0x57b   :  { %v2360_v53 = vadd.f32 %v4837_v45, %v2359_v34  ;;  %v2415_v22 = vrot.slane %v2414_v52, 1  ;;  %v4858_v20 = vpop.eup %3175  ;;  %v2325_v34 = vsub.f32 %v4769_v43, %v4794_v47  ;;  %3187 = vpow2.f32 %v2350_v23 }
 0x57c   :  { %v4869_v13 = vpop.eup %3177 }
 0x57d   :  { %v2361_v56 = vadd.f32 %v4846_v10, %v2360_v53  ;;  %v4853_v19 = vmax.f32 %v2414_v52, %v2415_v22  ;;  %v4876_v52 = vpop.eup %3179  ;;  %v2356_v22 = vmul.f32 1.442695, %v2325_v34 }
 0x57e   :  { %v4881_v47 = vpop.eup %3181 }
 0x57f   :  { %v4855_v60 = vpop.f32.mrf.mxu2  ;;  %v2362_v57 = vadd.f32 %v4849_v14, %v2361_v56  ;;  %v2417_v50 = vsub.f32 %v4783_v3, %v4853_v19  ;;  %v2418_v21 = vsub.f32 %v4792_v27, %v4853_v19  ;;  %v2419_v39 = vsub.f32 %v4812_v16, %v4853_v19  ;;  %v4888_v55 = vpop.eup %3183 }
 0x580   :  { %v2420_v3 = vsub.f32 %v4506_v7, %v4853_v19  ;;  %v2421_v37 = vsub.f32 %v4512_v11, %v4853_v19  ;;  %v2422_v7 = vsub.f32 %v4518_v35, %v4853_v19  ;;  %v2503_v11 = vmax.f32 %v4687_v40, %v4733_v44  ;;  %v4894_v23 = vpop.eup %3185 }
 0x581   :  { %v2363_v12 = vadd.f32 %v4858_v20, %v2362_v57  ;;  %v2433_v30 = vmul.f32 1.442695, %v2417_v50  ;;  %v2435_v16 = vmul.f32 1.442695, %v2418_v21  ;;  %v2437_v9 = vmul.f32 1.442695, %v2419_v39  ;;  %v4901_v21 = vpop.eup %3187 }
 0x582   :  { %v2439_v53 = vmul.f32 1.442695, %v2420_v3  ;;  %v2423_v29 = vsub.f32 %v4524_v63, %v4853_v19  ;;  %v2441_v61 = vmul.f32 1.442695, %v2421_v37  ;;  %v2504_v35 = vmax.f32 %v4698_v58, %v4740_v6 }
 0x583   :  { %v2364_v27 = vadd.f32 %v4869_v13, %v2363_v12  ;;  %3189 = vpow2.f32 %v2433_v30  ;;  %v2505_v57 = vmax.f32 %v4711_v46, %v4744_v1  ;;  %v2506_v39 = vmax.f32 %v4727_v2, %v4749_v26 }
 0x584   :  { %3191 = vpow2.f32 %v2435_v16  ;;  %v2424_v63 = vsub.f32 %v4530_v42, %v4853_v19  ;;  %v2443_v4 = vmul.f32 1.442695, %v2422_v7  ;;  %v2507_v34 = vmax.f32 %v2503_v11, %v4767_v38 }
 0x585   :  { %v2365_v43 = vadd.f32 %v4876_v52, %v2364_v27  ;;  %3193 = vpow2.f32 %v2352_v59  ;;  %v2508_v3 = vmax.f32 %v2504_v35, %v4781_v5  ;;  %v2509_v30 = vmax.f32 %v2505_v57, %v4790_v18 }
 0x586   :  { %3195 = vpow2.f32 %v2437_v9  ;;  %v2425_v16 = vsub.f32 %v4549_v32, %v4853_v19  ;;  %v2445_v42 = vmul.f32 1.442695, %v2423_v29 }
 0x587   :  { %v4885_v8 = vpop.f32.mrf.mxu2  ;;  %v2366_v56 = vadd.f32 %v4881_v47, %v2365_v43  ;;  %3197 = vpow2.f32 %v2354_v31  ;;  %v2510_v31 = vmax.f32 %v2506_v39, %v4810_v48  ;;  %v2512_v7 = vmax.f32 %v2508_v3, %v4855_v60 }
 0x588   :  { %3199 = vpow2.f32 %v2439_v53  ;;  %v2513_v35 = vmax.f32 %v2509_v30, %v4885_v8  ;;  %v2426_v39 = vsub.f32 %v4558_v62, %v4853_v19  ;;  %v2427_v62 = vsub.f32 %v4565_v51, %v4853_v19 }
 0x589   :  { %v2367_v50 = vadd.f32 %v4888_v55, %v2366_v56  ;;  %v4907_v12 = vpop.eup %3189  ;;  %3201 = vpow2.f32 %v2356_v22  ;;  %v2447_v22 = vmul.f32 1.442695, %v2424_v63  ;;  %v2511_v56 = vmax.f32 %v2507_v34, %v4828_v36 }
 0x58a   :  { %v4912_v27 = vpop.eup %3191  ;;  %3203 = vpow2.f32 %v2441_v61  ;;  %v2449_v63 = vmul.f32 1.442695, %v2425_v16  ;;  %v2451_v16 = vmul.f32 1.442695, %v2426_v39 }
 0x58b   :  { %v2368_v59 = vadd.f32 %v4894_v23, %v2367_v50  ;;  %v4917_v37 = vpop.eup %3193  ;;  %v2465_v43 = vadd.f32 %v4912_v27, %v4907_v12  ;;  %3205 = vpow2.f32 %v2443_v4  ;;  %v2515_v3 = vmax.f32 %v2511_v56, %v2512_v7 }
 0x58c   :  { %v4924_v53 = vpop.eup %3195  ;;  %3207 = vpow2.f32 %v2445_v42 }
 0x58d   :  { %v2369_v9 = vadd.f32 %v4901_v21, %v2368_v59  ;;  %v4929_v11 = vpop.eup %3197  ;;  %v2466_v61 = vadd.f32 %v4924_v53, %v2465_v43  ;;  %3209 = vpow2.f32 %v2447_v22 }
 0x58e   :  { %v4935_v50 = vpop.eup %3199  ;;  %3211 = vpow2.f32 %v2449_v63 }
 0x58f   :  { %v4927_v32 = vpop.f32.mrf.mxu2  ;;  %v2370_v29 = vadd.f32 %v4917_v37, %v2369_v9  ;;  %v4939_v4 = vpop.eup %3201  ;;  %v2467_v59 = vadd.f32 %v4935_v50, %v2466_v61  ;;  %3213 = vpow2.f32 %v2451_v16  ;;  %v2431_v16 = vsub.f32 %v5220_v28, %v4853_v19 }
 0x590   :  { %v2514_v57 = vmax.f32 %v2510_v31, %v4927_v32  ;;  %v4943_v43 = vpop.eup %3203 }
 0x591   :  { %v2371_v34 = vadd.f32 %v4929_v11, %v2370_v29  ;;  %v2468_v31 = vadd.f32 %v4943_v43, %v2467_v59  ;;  %v4947_v33 = vpop.eup %3205  ;;  %v2453_v59 = vmul.f32 1.442695, %v2427_v62 }
 0x592   :  { %v2516_v9 = vmax.f32 %v2513_v35, %v2514_v57  ;;  %v4952_v56 = vpop.eup %3207 }
 0x593   :  { %v2372_v30 = vadd.f32 %v4939_v4, %v2371_v34  ;;  %v2469_v29 = vadd.f32 %v4947_v33, %v2468_v31  ;;  %v4955_v57 = vpop.eup %3209  ;;  %v2428_v34 = vsub.f32 %v4584_v17, %v4853_v19  ;;  %3215 = vpow2.f32 %v2453_v59 }
 0x594   :  { %v2517_v54 = vmax.f32 %v2515_v3, %v2516_v9  ;;  %v4960_v3 = vpop.eup %3211  ;;  %v2430_v17 = vsub.f32 %v4629_v0, %v4853_v19 }
 0x595   :  { %v2373_v42 = vrot.slane %v2372_v30, 4  ;;  %v2470_v22 = vadd.f32 %v4952_v56, %v2469_v29  ;;  %v4967_v62 = vpop.eup %3213 }
 0x596   :  { %v2518_v7 = vrot.slane %v2517_v54, 4  ;;  %v2459_v59 = vmul.f32 1.442695, %v2430_v17 }
 0x597   :  { %v2374_v61 = vadd.f32 %v2373_v42, %v2372_v30  ;;  %v2471_v39 = vadd.f32 %v4955_v57, %v2470_v22  ;;  %v2455_v42 = vmul.f32 1.442695, %v2428_v34 }
 0x598   :  { %v2519_v35 = vmax.f32 %v2517_v54, %v2518_v7  ;;  %v2429_v54 = vsub.f32 %v4603_v25, %v4853_v19 }
 0x599   :  { %v2375_v51 = vrot.slane %v2374_v61, 2  ;;  %v2472_v31 = vadd.f32 %v4960_v3, %v2471_v39  ;;  %3217 = vpow2.f32 %v2455_v42  ;;  %v4980_v39 = vpop.eup %3215 }
 0x59a   :  { %v2520_v63 = vrot.slane %v2519_v35, 2  ;;  %v2457_v25 = vmul.f32 1.442695, %v2429_v54 }
 0x59b   :  { %v2376_v9 = vadd.f32 %v2375_v51, %v2374_v61  ;;  %v2473_v61 = vadd.f32 %v4967_v62, %v2472_v31 }
 0x59c   :  { %v2521_v30 = vmax.f32 %v2519_v35, %v2520_v63  ;;  %v2432_v35 = vsub.f32 %v5221_v49, %v4853_v19  ;;  %v2461_v63 = vmul.f32 1.442695, %v2431_v16 }
 0x59d   :  { %v2377_v29 = vrot.slane %v2376_v9, 1 }
 0x59e   :  { %v2522_v7 = vrot.slane %v2521_v30, 1  ;;  %v2463_v19 = vmul.f32 1.442695, %v2432_v35 }
 0x59f   :  { %v2378_v22 = vadd.f32 %v2377_v29, %v2376_v9  ;;  %v2474_v9 = vadd.f32 %v4980_v39, %v2473_v61 }
 0x5a0   :  { %v4972_v51 = vmax.f32 %v2521_v30, %v2522_v7 }
 0x5a1   :  { %3219 = vrcp.f32 %v2378_v22 }
 0x5a2   :  { %v2524_v34 = vsub.f32 %v4687_v40, %v4972_v51  ;;  %v2525_v0 = vsub.f32 %v4698_v58, %v4972_v51  ;;  %v2526_v28 = vsub.f32 %v4711_v46, %v4972_v51  ;;  %v2527_v49 = vsub.f32 %v4727_v2, %v4972_v51  ;;  %v4989_v58 = vpop.eup %3217 }
 0x5a3   :  { %3221 = vpow2.f32 %v2457_v25  ;;  %v2528_v40 = vsub.f32 %v4733_v44, %v4972_v51  ;;  %v2475_v46 = vadd.f32 %v4989_v58, %v2474_v9  ;;  %v2529_v29 = vsub.f32 %v4740_v6, %v4972_v51 }
 0x5a4   :  { %v2540_v31 = vmul.f32 1.442695, %v2524_v34  ;;  %v2542_v30 = vmul.f32 1.442695, %v2525_v0  ;;  %3223 = vpow2.f32 %v2459_v59  ;;  %v2544_v42 = vmul.f32 1.442695, %v2526_v28 }
 0x5a5   :  { %3225 = vpow2.f32 %v2461_v63  ;;  %v2546_v2 = vmul.f32 1.442695, %v2527_v49  ;;  %v2530_v44 = vsub.f32 %v4744_v1, %v4972_v51  ;;  %v2548_v7 = vmul.f32 1.442695, %v2528_v40 }
 0x5a6   :  { %3227 = vpow2.f32 %v2540_v31  ;;  %v2531_v61 = vsub.f32 %v4749_v26, %v4972_v51  ;;  %v2550_v6 = vmul.f32 1.442695, %v2529_v29  ;;  %v2533_v9 = vsub.f32 %v4781_v5, %v4972_v51 }
 0x5a7   :  { %v4991_v54 = vpop.eup %3219  ;;  %3229 = vpow2.f32 %v2542_v30  ;;  %v2552_v59 = vmul.f32 1.442695, %v2530_v44 }
 0x5a8   :  { %3231 = vpow2.f32 %v2463_v19  ;;  %v2395_v16 = vmul.f32 %v4991_v54, %v4939_v4  ;;  %v2392_v35 = vmul.f32 %v4991_v54, %v4901_v21  ;;  %v2394_v34 = vmul.f32 %v4991_v54, %v4929_v11 }
 0x5a9   :  { %v4998_v17 = vpop.eup %3221  ;;  %3233 = vpow2.f32 %v2544_v42  ;;  %v2391_v4 = vmul.f32 %v4991_v54, %v4894_v23  ;;  %v2390_v0 = vmul.f32 %v4991_v54, %v4888_v55  ;;  %v2532_v21 = vsub.f32 %v4767_v38, %v4972_v51 }
 0x5aa   :  { %v5002_v22 = vpop.eup %3223  ;;  %v2476_v25 = vadd.f32 %v4998_v17, %v2475_v46  ;;  %3235 = vpow2.f32 %v2546_v2  ;;  %2639 = vmatpush.msra.mxu3 %v2395_v16  ;;  %v2393_v63 = vmul.f32 %v4991_v54, %v4917_v37  ;;  %v5027_v11 = vmul.f32 %v4991_v54, %v4849_v14 }
 0x5ab   :  { %v5009_v1 = vpop.eup %3225  ;;  %3237 = vpow2.f32 %v2548_v7  ;;  %v5031_v55 = vmul.f32 %v4991_v54, %v4846_v10  ;;  %v5035_v23 = vmul.f32 %v4991_v54, %v4837_v45  ;;  %v5045_v14 = vmul.f32 %v4991_v54, %v4832_v41 }
 0x5ac   :  { %v5017_v26 = vpop.eup %3227  ;;  %2640 = vmatpush.msra.mxu3 %v2394_v34  ;;  %v5049_v10 = vmul.f32 %v4991_v54, %v4824_v24  ;;  %3239 = vpow2.f32 %v2550_v6  ;;  %v2554_v45 = vmul.f32 1.442695, %v2531_v61  ;;  %v2477_v19 = vadd.f32 %v5002_v22, %v2476_v25 }
 0x5ad   :  { %v5021_v28 = vpop.eup %3229  ;;  %v5056_v5 = vmul.f32 %v4991_v54, %v4822_v15  ;;  %v2534_v41 = vsub.f32 %v4790_v18, %v4972_v51  ;;  %3241 = vpow2.f32 %v2552_v59  ;;  %v2556_v24 = vmul.f32 1.442695, %v2532_v21 }
 0x5ae   :  { %v5037_v38 = vpop.eup %3231  ;;  %v2572_v37 = vadd.f32 %v5021_v28, %v5017_v26  ;;  %2641 = vmatpush.msra.mxu3 %v2393_v63  ;;  %v2478_v30 = vadd.f32 %v5009_v1, %v2477_v19  ;;  %v2535_v15 = vsub.f32 %v4810_v48, %v4972_v51  ;;  %3243 = vpow2.f32 %v2554_v45 }
 0x5af   :  { %v5051_v49 = vpop.eup %3233  ;;  %v2558_v29 = vmul.f32 1.442695, %v2533_v9  ;;  %v2536_v18 = vsub.f32 %v4828_v36, %v4972_v51  ;;  %3245 = vpow2.f32 %v2556_v24  ;;  %v2560_v16 = vmul.f32 1.442695, %v2534_v41 }
 0x5b0   :  { %v2573_v40 = vadd.f32 %v5051_v49, %v2572_v37  ;;  %v5059_v31 = vpop.eup %3235  ;;  %2642 = vmatpush.msra.mxu3 %v2392_v35  ;;  %v2479_v2 = vadd.f32 %v5037_v38, %v2478_v30  ;;  %v2389_v61 = vmul.f32 %v4991_v54, %v4881_v47  ;;  %v2537_v48 = vsub.f32 %v4855_v60, %v4972_v51 }
 0x5b1   :  { %v5064_v42 = vpop.eup %3237  ;;  %3247 = vpow2.f32 %v2558_v29  ;;  %v2562_v36 = vmul.f32 1.442695, %v2535_v15  ;;  %v2388_v34 = vmul.f32 %v4991_v54, %v4876_v52  ;;  %v2564_v60 = vmul.f32 1.442695, %v2536_v18 }
 0x5b2   :  { %v2574_v46 = vadd.f32 %v5059_v31, %v2573_v40  ;;  %2643 = vmatpush.msra.mxu3 %v2391_v4  ;;  %v5073_v7 = vpop.eup %3239  ;;  %v2480_v6 = vrot.slane %v2479_v2, 4  ;;  %3249 = vpow2.f32 %v2560_v16  ;;  %v2387_v59 = vmul.f32 %v4991_v54, %v4869_v13 }
 0x5b3   :  { %v5080_v25 = vpop.eup %3241  ;;  %v2539_v9 = vsub.f32 %v4927_v32, %v4972_v51  ;;  %3251 = vpow2.f32 %v2562_v36  ;;  %v2386_v45 = vmul.f32 %v4991_v54, %v4858_v20 }
 0x5b4   :  { %v2575_v44 = vadd.f32 %v5064_v42, %v2574_v46  ;;  %2644 = vmatpush.msra.mxu3 %v2390_v0  ;;  %v2481_v4 = vadd.f32 %v2480_v6, %v2479_v2  ;;  %v2538_v0 = vsub.f32 %v4885_v8, %v4972_v51  ;;  %v5087_v21 = vpop.eup %3243  ;;  %v2566_v8 = vmul.f32 1.442695, %v2537_v48 }
 0x5b5   :  { %v5094_v37 = vpop.eup %3245  ;;  %3253 = vpow2.f32 %v2564_v60  ;;  %v2570_v30 = vmul.f32 1.442695, %v2539_v9 }
 0x5b6   :  { %v2576_v35 = vadd.f32 %v5073_v7, %v2575_v44  ;;  %2645 = vmatpush.msra.mxu3 %v2389_v61  ;;  %v2482_v63 = vrot.slane %v2481_v4, 2  ;;  %v2568_v40 = vmul.f32 1.442695, %v2538_v0  ;;  %3255 = vpow2.f32 %v2566_v8  ;;  %v5223_v0 = vld [vmem:[#allocation8_spill] sm:$0xff] }
 0x5b7   :  { %v5099_v24 = vpop.eup %3247 }
 0x5b8   :  { %v2577_v47 = vadd.f32 %v5080_v25, %v2576_v35  ;;  %2646 = vmatpush.msra.mxu3 %v2388_v34  ;;  %v2483_v19 = vadd.f32 %v2482_v63, %v2481_v4  ;;  %v5102_v51 = vpop.eup %3249  ;;  %3257 = vpow2.f32 %v2568_v40  ;;  %v5222_v35 = vld [vmem:[#allocation7_spill] sm:$0xff] }
 0x5b9   :  { %v3252_v54 = vpop.eup %3251 }
 0x5ba   :  { %v2578_v52 = vadd.f32 %v5087_v21, %v2577_v47  ;;  %2647 = vmatpush.msra.mxu3 %v2387_v59  ;;  %v2484_v13 = vrot.slane %v2483_v19, 1  ;;  %v5224_v59 = vld [vmem:[#allocation9_spill] sm:$0xff] }
 0x5bb   :  { %v3254_v29 = vpop.eup %3253 }
 0x5bc   :  { %v2579_v41 = vadd.f32 %v5094_v37, %v2578_v52  ;;  %2648 = vmatpush.msra.mxu3 %v2386_v45  ;;  %v2485_v46 = vadd.f32 %v2484_v13, %v2483_v19  ;;  %v3256_v18 = vpop.eup %3255 }
 0x5be   :  { %v2580_v32 = vadd.f32 %v5099_v24, %v2579_v41  ;;  %2649 = vmatpush.msra.mxu3 %v5027_v11  ;;  %3259 = vrcp.f32 %v2485_v46  ;;  %v3258_v44 = vpop.eup %3257  ;;  %v5233_v46 = vld [vmem:[#allocation18_spill] sm:$0xff] }
 0x5bf   :  { %3261 = vpow2.f32 %v2570_v30  ;;  %v5231_v30 = vld [vmem:[#allocation16_spill] sm:$0xff] }
 0x5c0   :  { %v2581_v20 = vadd.f32 %v5102_v51, %v2580_v32  ;;  %2650 = vmatpush.msra.mxu3 %v5031_v55 }
 0x5c2   :  { %v2582_v15 = vadd.f32 %v3252_v54, %v2581_v20  ;;  %2651 = vmatpush.msra.mxu3 %v5035_v23 }
 0x5c4   :  { %v2583_v2 = vadd.f32 %v3254_v29, %v2582_v15  ;;  %2652 = vmatpush.msra.mxu3 %v5045_v14  ;;  %v5109_v11 = vpop.eup %3259 }
 0x5c5   :  { %v2502_v55 = vmul.f32 %v5109_v11, %v5037_v38  ;;  %v3262_v6 = vpop.eup %3261  ;;  %v2501_v23 = vmul.f32 %v5109_v11, %v5009_v1  ;;  %v2500_v36 = vmul.f32 %v5109_v11, %v5002_v22  ;;  %v2499_v38 = vmul.f32 %v5109_v11, %v4998_v17 }
 0x5c6   :  { %v2584_v16 = vadd.f32 %v3256_v18, %v2583_v2  ;;  %2653 = vmatpush.msra.mxu3 %v5049_v10  ;;  %v2497_v1 = vmul.f32 %v5109_v11, %v4980_v39  ;;  %v2496_v22 = vmul.f32 %v5109_v11, %v4967_v62  ;;  %v2495_v17 = vmul.f32 %v5109_v11, %v4960_v3 }
 0x5c7   :  { %2668 = vmatpush.msra.mxu2 %v2502_v55  ;;  %v2493_v39 = vmul.f32 %v5109_v11, %v4952_v56  ;;  %v2492_v62 = vmul.f32 %v5109_v11, %v4947_v33  ;;  %v2491_v3 = vmul.f32 %v5109_v11, %v4943_v43  ;;  %v2489_v45 = vmul.f32 %v5109_v11, %v4924_v53  ;;  %v5225_v43 = vld [vmem:[#allocation10_spill] sm:$0xff] }
 0x5c8   :  { %v2585_v61 = vadd.f32 %v3258_v44, %v2584_v16  ;;  %2654 = vmatpush.msra.mxu3 %v5056_v5  ;;  %v2498_v5 = vmul.f32 %v5109_v11, %v4989_v58  ;;  %v2494_v58 = vmul.f32 %v5109_v11, %v4955_v57  ;;  %v2490_v57 = vmul.f32 %v5109_v11, %v4935_v50 }
 0x5c9   :  { %2655 = vmatmul.f32.vlgmr.msra.gmra.mxu3 %v5222_v35  ;;  %2669 = vmatpush.msra.mxu2 %v2501_v23  ;;  %v2488_v53 = vmul.f32 %v5109_v11, %v4912_v27  ;;  %v5227_v27 = vld [vmem:[#allocation12_spill] sm:$0xff] }
 0x5ca   :  { %v2586_v48 = vadd.f32 %v3262_v6, %v2585_v61 }
 0x5cb   :  { %2670 = vmatpush.msra.mxu2 %v2500_v36 }
 0x5cc   :  { %v2587_v14 = vrot.slane %v2586_v48, 4 }
 0x5cd   :  { %2671 = vmatpush.msra.mxu2 %v2499_v38 }
 0x5ce   :  { %v2588_v10 = vadd.f32 %v2587_v14, %v2586_v48  ;;  %v5235_v14 = vld [vmem:[#allocation21_spill] sm:$0xff] }
 0x5cf   :  { %2672 = vmatpush.msra.mxu2 %v2498_v5 }
 0x5d0   :  { %v2589_v34 = vrot.slane %v2588_v10, 2 }
 0x5d1   :  { %2658 = vmatmul.f32.gmra.mxu3 %v5223_v0  ;;  %2673 = vmatpush.msra.mxu2 %v2497_v1 }
 0x5d2   :  { %v2590_v4 = vadd.f32 %v2589_v34, %v2588_v10  ;;  %v3269_v34 = vld [vmem:[%s5187_s0 + $0x20] sm:$0xff] }
 0x5d3   :  { %2674 = vmatpush.msra.mxu2 %v2496_v22  ;;  %v5236_v22 = vld [vmem:[#allocation23_spill] sm:$0xff] }
 0x5d4   :  { %v2591_v47 = vrot.slane %v2590_v4, 1 }
 0x5d5   :  { %2675 = vmatpush.msra.mxu2 %v2495_v17 }
 0x5d6   :  { %v2592_v60 = vadd.f32 %v2591_v47, %v2590_v4 }
 0x5d7   :  { %2676 = vmatpush.msra.mxu2 %v2494_v58 }
 0x5d8   :  { %3263 = vrcp.f32 %v2592_v60 }
 0x5d9   :  { %2661 = vmatmul.f32.gmra.mxu3 %v5224_v59  ;;  %2677 = vmatpush.msra.mxu2 %v2493_v39  ;;  %v3270_v39 = vld [vmem:[%s5187_s0 + $0x28] sm:$0xff] }
 0x5db   :  { %2678 = vmatpush.msra.mxu2 %v2492_v62 }
 0x5dd   :  { %2679 = vmatpush.msra.mxu2 %v2491_v3 }
 0x5de   :  { %v3264_v63 = vpop.eup %3263 }
 0x5df   :  { %v2609_v9 = vmul.f32 %v3264_v63, %v3262_v6  ;;  %v2606_v52 = vmul.f32 %v3264_v63, %v3254_v29  ;;  %v2605_v8 = vmul.f32 %v3264_v63, %v3252_v54  ;;  %v2604_v56 = vmul.f32 %v3264_v63, %v5102_v51  ;;  %2680 = vmatpush.msra.mxu2 %v2490_v57 }
 0x5e0   :  { %v2608_v19 = vmul.f32 %v3264_v63, %v3258_v44  ;;  %v2599_v33 = vmul.f32 %v3264_v63, %v5073_v7  ;;  %v2598_v40 = vmul.f32 %v3264_v63, %v5064_v42  ;;  %v2597_v41 = vmul.f32 %v3264_v63, %v5059_v31  ;;  %v5226_v31 = vld [vmem:[#allocation11_spill] sm:$0xff] }
 0x5e1   :  { %2697 = vmatpush.msrb.mxu3 %v2609_v9  ;;  %v2596_v13 = vmul.f32 %v3264_v63, %v5051_v49  ;;  %v2595_v50 = vmul.f32 %v3264_v63, %v5021_v28  ;;  %v2607_v32 = vmul.f32 %v3264_v63, %v3256_v18  ;;  %v2594_v51 = vmul.f32 %v3264_v63, %v5017_v26  ;;  %v5237_v9 = vld [vmem:[#allocation24_spill] sm:$0xff] }
 0x5e2   :  { %2664 = vmatmul.f32.gmra.mxu3 %v5225_v43  ;;  %2681 = vmatpush.msra.mxu2 %v2489_v45  ;;  %v2487_v42 = vmul.f32 %v5109_v11, %v4907_v12  ;;  %v2603_v28 = vmul.f32 %v3264_v63, %v5099_v24  ;;  %v2602_v26 = vmul.f32 %v3264_v63, %v5094_v37  ;;  %v5228_v12 = vld [vmem:[#allocation13_spill] sm:$0xff]  ;;  %v5229_v24 = vld [vmem:[#allocation15_spill] sm:$0xff]  ;;  %v5230_v37 = vld [vmem:[#allocation14_spill] sm:$0xff] }
 0x5e3   :  { %2698 = vmatpush.msrb.mxu3 %v2608_v19  ;;  %v2601_v49 = vmul.f32 %v3264_v63, %v5087_v21  ;;  %v2600_v7 = vmul.f32 %v3264_v63, %v5080_v25  ;;  %v5232_v21 = vld [vmem:[#allocation17_spill] sm:$0xff]  ;;  %v2627_v25 = vpop.f32.mrf.mxu2  ;;  %v5234_v11 = vld [vmem:[#allocation20_spill] sm:$0xff] }
 0x5e4   :  { %2682 = vmatpush.msra.mxu2 %v2488_v53  ;;  %v2628_v61 = vadd.f32 %v2627_v25, %v5234_v11  ;;  %v3271_v45 = vld [vmem:[%s5187_s0 + $0x30] sm:$0xff] }
 0x5e5   :  { %2699 = vmatpush.msrb.mxu3 %v2607_v32 }
 0x5e6   :  { %2683 = vmatpush.msra.mxu2 %v2487_v42 }
 0x5e7   :  { %2700 = vmatpush.msrb.mxu3 %v2606_v52  ;;  %2684 = vmatmul.f32.vlgmr.msra.gmra.mxu2 %v5226_v31 }
 0x5e9   :  { %2701 = vmatpush.msrb.mxu3 %v2605_v8 }
 0x5eb   :  { %2702 = vmatpush.msrb.mxu3 %v2604_v56  ;;  %v2630_v20 = vpop.f32.mrf.mxu2 }
 0x5ec   :  { %v2631_v36 = vadd.f32 %v2630_v20, %v5235_v14 }
 0x5ed   :  { %2703 = vmatpush.msrb.mxu3 %v2603_v28 }
 0x5ef   :  { %2704 = vmatpush.msrb.mxu3 %v2602_v26  ;;  %2687 = vmatmul.f32.gmra.mxu2 %v5227_v27 }
 0x5f1   :  { %2705 = vmatpush.msrb.mxu3 %v2601_v49 }
 0x5f3   :  { %2706 = vmatpush.msrb.mxu3 %v2600_v7  ;;  %v2633_v15 = vpop.f32.mrf.mxu2 }
 0x5f4   :  { %v2634_v60 = vadd.f32 %v2633_v15, %v5236_v22 }
 0x5f5   :  { %2707 = vmatpush.msrb.mxu3 %v2599_v33 }
 0x5f7   :  { %2708 = vmatpush.msrb.mxu3 %v2598_v40  ;;  %2690 = vmatmul.f32.gmra.mxu2 %v5228_v12 }
 0x5f9   :  { %2709 = vmatpush.msrb.mxu3 %v2597_v41 }
 0x5fb   :  { %2710 = vmatpush.msrb.mxu3 %v2596_v13  ;;  %v2636_v2 = vpop.f32.mrf.mxu2  ;;  %v3272_v13 = vld [vmem:[%s5187_s0 + $0x38] sm:$0xff] }
 0x5fc   :  { %v2637_v52 = vadd.f32 %v2636_v2, %v5237_v9 }
 0x5fd   :  { %2711 = vmatpush.msrb.mxu3 %v2595_v50 }
 0x5ff   :  { %2712 = vmatpush.msrb.mxu3 %v2594_v51  ;;  %2693 = vmatmul.f32.gmra.mxu2 %v5230_v37 }
 0x600   :  { %2713 = vmatmul.f32.vlgmr.msrb.gmra.mxu3 %v5229_v24 }
 0x608   :  { %2716 = vmatmul.f32.gmra.mxu3 %v5231_v30 }
 0x610   :  { %2719 = vmatmul.f32.gmra.mxu3 %v5232_v21 }
 0x618   :  { %2722 = vmatmul.f32.gmra.mxu3 %v5233_v46 }
 0x64c   :  { %v2656_v54 = vpop.f32.mrf.mxu3 }
 0x64d   :  { %v2657_v55 = vadd.f32 %v2656_v54, %v2628_v61 }
 0x654   :  { %v2659_v29 = vpop.f32.mrf.mxu3 }
 0x655   :  { %v2660_v38 = vadd.f32 %v2659_v29, %v2631_v36 }
 0x65c   :  { %v2662_v18 = vpop.f32.mrf.mxu3 }
 0x65d   :  { %v2663_v58 = vadd.f32 %v2662_v18, %v2634_v60 }
 0x665   :  { %v2665_v16 = vpop.f32.mrf.mxu3 }
 0x666   :  { %v2666_v56 = vadd.f32 %v2665_v16, %v2637_v52 }
 0x66a   :  { %v2685_v44 = vpop.f32.mrf.mxu2 }
 0x66b   :  { %v2686_v6 = vadd.f32 %v2685_v44, %v2657_v55 }
 0x672   :  { %v2688_v48 = vpop.f32.mrf.mxu2 }
 0x673   :  { %v2689_v4 = vadd.f32 %v2688_v48, %v2660_v38 }
 0x67a   :  { %v2691_v47 = vpop.f32.mrf.mxu2 }
 0x67b   :  { %v2692_v62 = vadd.f32 %v2691_v47, %v2663_v58 }
 0x682   :  { %v2694_v8 = vpop.f32.mrf.mxu2 }
 0x683   :  { %v2714_v23 = vpop.f32.mrf.mxu3  ;;  %v2695_v33 = vadd.f32 %v2694_v8, %v2666_v56 }
 0x684   :  { %v2715_v35 = vadd.f32 %v2714_v23, %v2686_v6 }
 0x686   :  { %v2726_v10 = vmax.f32 %v2715_v35, 0.0 }
 0x688   :  { %v2730_v5 = vadd.f32 %v3269_v34, %v2726_v10 }
 0x68a   :  { %2735 = vst [vmem:[#allocation4 + $0x20] sm:$0xff] %v2730_v5 }
 0x68b   :  { %v2717_v1 = vpop.f32.mrf.mxu3 }
 0x68c   :  { %v2718_v0 = vadd.f32 %v2717_v1, %v2689_v4 }
 0x68e   :  { %v2727_v17 = vmax.f32 %v2718_v0, 0.0 }
 0x690   :  { %v2731_v59 = vadd.f32 %v3270_v39, %v2727_v17 }
 0x692   :  { %2736 = vst [vmem:[#allocation4 + $0x28] sm:$0xff] %v2731_v59 }
 0x693   :  { %v2720_v63 = vpop.f32.mrf.mxu3 }
 0x694   :  { %v2721_v3 = vadd.f32 %v2720_v63, %v2692_v62 }
 0x696   :  { %v2728_v57 = vmax.f32 %v2721_v3, 0.0 }
 0x698   :  { %v2732_v19 = vadd.f32 %v3271_v45, %v2728_v57 }
 0x69a   :  { %2737 = vst [vmem:[#allocation4 + $0x30] sm:$0xff] %v2732_v19 }
 0x69b   :  { %v2723_v40 = vpop.f32.mrf.mxu3 }
 0x69c   :  { %v2724_v43 = vadd.f32 %v2723_v40, %v2695_v33 }
 0x69e   :  { %v2729_v41 = vmax.f32 %v2724_v43, 0.0 }
 0x6a0   :  { %v2733_v50 = vadd.f32 %v3272_v13, %v2729_v41 }
 0x6a2   :  { %2738 = vst [vmem:[#allocation4 + $0x38] sm:$0xff] %v2733_v50 }
 0x6a3   :  { %2751 = dma.vmem_to_hbm [thread:$0]  %s2744_s21, 1024, %s2746_s26, [#allocation5], %s3304_s2, %s3304_s2, %s3305_s3  }
 0x6a4   :  { %3297 = dma.done.wait [#allocation5], 1024  }
 0x6a5   :  { %3298 = vsyncadd [#allocation5], 4294966272 }
 0x6a6   :  { %2756 = vsyncpa [#allocation5], 1 }

</bundles_post_ra>
